<compile_context>
chip_gen: v7x
topology: tpu7x:2x2x1
jax: 0.10.0
libtpu: 0.0.40
codegen_flags: <defaults>
</compile_context>

<pallas_src>
import math
from functools import partial

import jax
import jax.numpy as jnp
from jax.experimental import pallas as pl
from jax.experimental.pallas import tpu as pltpu

C_PAD = 128  # lane width: all stage widths (16/32/64) are zero-padded to this


def _round_up(x, m):
    return ((x + m - 1) // m) * m


def _pick_tm(m):
    """Largest row-tile <= 1024 that divides M (fallback: whole array)."""
    for tm in (1024, 512, 256, 128, 64, 32, 16, 8):
        if m % tm == 0:
            return tm
    return m


# ----------------------------- Pallas kernels ------------------------------

def _fused_conv_bn_kernel(x_ref, w_ref, b_ref, *rest, relu, has_res):
    """out = maybe_relu((patches @ W_folded) + bias [+ residual])  (f32 acc)."""
    if has_res:
        r_ref, o_ref = rest
    else:
        (o_ref,) = rest
    acc = jnp.dot(x_ref[...], w_ref[...], preferred_element_type=jnp.float32)
    acc = acc + b_ref[...]
    if has_res:
        acc = acc + r_ref[...].astype(jnp.float32)
    if relu:
        acc = jnp.maximum(acc, 0.0)
    o_ref[...] = acc.astype(o_ref.dtype)


def fused_conv_bn(patches, w, bias, residual=None, relu=True):
    """patches: (M, K) bf16; w: (K, C_PAD) bf16 (BN scale folded);
    bias: (1, C_PAD) f32; residual: (M, C_PAD) bf16 or None."""
    M, K = patches.shape
    _, C = w.shape
    TM = _pick_tm(M)
    grid = (M // TM,)

    args = [patches, w, bias]
    in_specs = [
        pl.BlockSpec((TM, K), lambda i: (i, 0)),
        pl.BlockSpec((K, C), lambda i: (0, 0)),
        pl.BlockSpec((1, C), lambda i: (0, 0)),
    ]
    if residual is not None:
        args.append(residual)
        in_specs.append(pl.BlockSpec((TM, C), lambda i: (i, 0)))

    kernel = partial(_fused_conv_bn_kernel, relu=relu,
                     has_res=residual is not None)
    return pl.pallas_call(
        kernel,
        out_shape=jax.ShapeDtypeStruct((M, C), jnp.bfloat16),
        grid=grid,
        in_specs=in_specs,
        out_specs=pl.BlockSpec((TM, C), lambda i: (i, 0)),
        compiler_params=pltpu.CompilerParams(
            dimension_semantics=("parallel",),
            vmem_limit_bytes=32 * 1024 * 1024,  # safe on v7x (64 MiB physical)
        ),
    )(*args)


def _avgpool_kernel(x_ref, o_ref):
    # x: (N, H*W, C) -> mean over spatial axis -> (N, C), f32 accumulation.
    o_ref[...] = jnp.mean(x_ref[...].astype(jnp.float32), axis=1)


def global_avg_pool(x_nhwc):
    N, H, W, C = x_nhwc.shape
    x3 = x_nhwc.reshape(N, H * W, C)
    vmem = pl.BlockSpec(memory_space=pltpu.MemorySpace.VMEM)
    return pl.pallas_call(
        _avgpool_kernel,
        out_shape=jax.ShapeDtypeStruct((N, C), jnp.float32),
        in_specs=[vmem],
        out_specs=vmem,
    )(x3)


# ------------------------------- JAX glue ----------------------------------

def im2col_padded(x, stride, k_pad):
    """x: (N, H, W, C) NHWC (bf16), 3x3 kernel, padding=1 ->
    (N*Ho*Wo, k_pad) with the last k_pad - 9*C columns zero."""
    N, H, W, C = x.shape
    Ho, Wo = H // stride, W // stride
    xp = jnp.pad(x, ((0, 0), (1, 1), (1, 1), (0, 0)))
    taps = []
    for ky in range(3):
        for kx in range(3):
            taps.append(
                xp[:, ky:ky + (Ho - 1) * stride + 1:stride,
                      kx:kx + (Wo - 1) * stride + 1:stride, :])
    if k_pad > 9 * C:
        taps.append(jnp.zeros((N, Ho, Wo, k_pad - 9 * C), x.dtype))
    patches = jnp.concatenate(taps, axis=-1)
    return patches.reshape(N * Ho * Wo, k_pad), (N, Ho, Wo)


def _bn_fold(key, c, eps=1e-5):
    """Deterministic, non-trivial eval-mode BN params -> (scale, bias)."""
    k1, k2, k3, k4 = jax.random.split(key, 4)
    gamma = 1.0 + 0.1 * jax.random.normal(k1, (c,), jnp.float32)
    beta = 0.1 * jax.random.normal(k2, (c,), jnp.float32)
    mean = 0.1 * jax.random.normal(k3, (c,), jnp.float32)
    var = 1.0 + 0.1 * jnp.abs(jax.random.normal(k4, (c,), jnp.float32))
    scale = gamma / jnp.sqrt(var + eps)
    bias = beta - mean * scale
    return scale, bias


def make_conv_bn(key, cin, cout):
    """kaiming_normal_ 3x3 conv + folded BN, stored as a padded, bf16,
    scale-folded im2col weight matrix plus an f32 bias row."""
    kw, kb = jax.random.split(key)
    fan_in = cin * 9
    std = math.sqrt(2.0 / fan_in)
    w = jax.random.normal(kw, (cout, cin, 3, 3), jnp.float32) * std
    scale, bias = _bn_fold(kb, cout)
    # (cout, cin, kh, kw) -> (kh, kw, cin, cout) -> (9*cin, cout), fold scale.
    w2d = jnp.transpose(w, (2, 3, 1, 0)).reshape(9 * cin, cout) * scale[None, :]
    k_pad = _round_up(9 * cin, 128)
    w_p = jnp.pad(w2d, ((0, k_pad - 9 * cin), (0, C_PAD - cout)))
    b_p = jnp.pad(bias, (0, C_PAD - cout)).reshape(1, C_PAD)
    return {"w": w_p.astype(jnp.bfloat16), "b": b_p.astype(jnp.float32)}


def conv_bn_relu(x, wb, stride, cout, residual2d=None, relu=True):
    k_pad = wb["w"].shape[0]
    patches, (n, ho, wo) = im2col_padded(x, stride, k_pad)
    out = fused_conv_bn(patches, wb["w"], wb["b"], residual2d, relu)
    return out[:, :cout].reshape(n, ho, wo, cout)


def basic_block_forward(x, bp, cin, planes, stride):
    """BasicBlock (expansion=1, option-'A' shortcut):
    out = relu(bn2(conv2(relu(bn1(conv1(x))))) + shortcut(x))."""
    N, H, W, _ = x.shape
    Ho, Wo = H // stride, W // stride

    out = conv_bn_relu(x, bp["conv1"], stride, planes, None, relu=True)

    # shortcut (option 'A': stride-2 spatial subsample + zero-pad channels),
    # padded up to C_PAD so the in-kernel residual add is lane-dense.
    if stride != 1 or cin != planes:
        sc = x[:, ::2, ::2, :]
        pad = planes // 4
        sc = jnp.pad(sc, ((0, 0), (0, 0), (0, 0), (pad, C_PAD - cin - pad)))
    else:
        sc = jnp.pad(x, ((0, 0), (0, 0), (0, 0), (0, C_PAD - cin)))
    sc2d = sc.reshape(N * Ho * Wo, C_PAD)

    out = conv_bn_relu(out, bp["conv2"], 1, planes, sc2d, relu=True)
    return out


def make_resnet_s_params(key, num_blocks=(1, 1, 1)):
    """Returns (params_pytree_of_arrays, static_arch_tuple)."""
    arch = []
    in_planes = 16
    for planes, nb, stride in zip((16, 32, 64), num_blocks, (1, 2, 2)):
        for s in [stride] + [1] * (nb - 1):
            arch.append((in_planes, planes, s))
            in_planes = planes

    keys = jax.random.split(key, 1 + 2 * len(arch))
    params = {"stem": make_conv_bn(keys[0], 3, 16), "blocks": []}
    ki = 1
    for (cin, planes, _s) in arch:
        params["blocks"].append({
            "conv1": make_conv_bn(keys[ki], cin, planes),
            "conv2": make_conv_bn(keys[ki + 1], planes, planes),
        })
        ki += 2
    return params, tuple(arch)


def make_resnet_forward(arch):
    """arch is static (closed over); only arrays flow through jit."""
    @jax.jit
    def forward(x_nhwc, params):
        x = x_nhwc.astype(jnp.bfloat16)
        # stem: relu(bn1(conv1(x)))
        out = conv_bn_relu(x, params["stem"], 1, 16, None, relu=True)
        for bp, (cin, planes, stride) in zip(params["blocks"], arch):
            out = basic_block_forward(out, bp, cin, planes, stride)
        # F.avg_pool2d(out, out.size()[3]) then flatten -> (N, 64)
        return global_avg_pool(out)
    return forward


# --------------------------------- main -------------------------------------

if __name__ == "__main__":
    key = jax.random.PRNGKey(0)
    k_in, k_par = jax.random.split(key)

    # PyTorch-style NCHW input (batch=2, channels=3, 16x16)
    x_nchw = jax.random.normal(k_in, (2, 3, 16, 16), jnp.float32)
    x_nhwc = jnp.transpose(x_nchw, (0, 2, 3, 1))

    params, arch = make_resnet_s_params(k_par, num_blocks=(1, 1, 1))
    resnet_s_forward = make_resnet_forward(arch)

    encoding = resnet_s_forward(x_nhwc, params)
    encoding = jax.block_until_ready(encoding)

    assert encoding.shape == (2, 64), encoding.shape
    assert bool(jnp.all(jnp.isfinite(encoding)))
    print("KERNEL_OK")
</pallas_src>

<mosaic_0001>
module attributes {stable_mosaic.version = 11 : i64} {
  func.func @_fused_conv_bn_kernel(%arg0: i32, %arg1: memref<512x128xbf16, #tpu.memory_space<vmem>>, %arg2: memref<128x128xbf16, #tpu.memory_space<vmem>>, %arg3: memref<1x128xf32, #tpu.memory_space<vmem>>, %arg4: memref<512x128xbf16, #tpu.memory_space<vmem>>) attributes {dimension_semantics = [#tpu.dimension_semantics<parallel>], iteration_bounds = array<i64: 1>, scalar_prefetch = 0 : i64, scratch_operands = 0 : i64, tpu.core_type = #tpu.core_type<tc>, window_params = [{transform_indices = @transform_0, window_bounds = array<i64: 512, 128>}, {pipeline_mode = #tpu.pipeline_mode<synchronous>, transform_indices = @transform_1, window_bounds = array<i64: 128, 128>}, {pipeline_mode = #tpu.pipeline_mode<synchronous>, transform_indices = @transform_2, window_bounds = array<i64: 1, 128>}, {transform_indices = @transform_3, window_bounds = array<i64: 512, 128>}]} {
    %c0 = arith.constant 0 : index
    %c0_0 = arith.constant 0 : index
    %0 = vector.load %arg1[%c0, %c0_0] : memref<512x128xbf16, #tpu.memory_space<vmem>>, vector<512x128xbf16>
    %c0_1 = arith.constant 0 : index
    %c0_2 = arith.constant 0 : index
    %1 = vector.load %arg2[%c0_1, %c0_2] : memref<128x128xbf16, #tpu.memory_space<vmem>>, vector<128x128xbf16>
    %cst = arith.constant dense<0.000000e+00> : vector<512x128xf32>
    %2 = tpu.matmul %0, %1, %cst {dimension_numbers = #tpu.dot_dimension_numbers<[1], [0], [0], [1], [0, 0, 1, 1], [], []>} : vector<512x128xbf16>, vector<128x128xbf16>, vector<512x128xf32> -> vector<512x128xf32>
    %c0_3 = arith.constant 0 : index
    %c0_4 = arith.constant 0 : index
    %3 = vector.load %arg3[%c0_3, %c0_4] : memref<1x128xf32, #tpu.memory_space<vmem>>, vector<1x128xf32>
    %4 = vector.broadcast %3 : vector<1x128xf32> to vector<512x128xf32>
    %5 = arith.addf %2, %4 : vector<512x128xf32>
    %cst_5 = arith.constant 0.000000e+00 : f32
    %6 = vector.broadcast %cst_5 : f32 to vector<512x128xf32>
    %7 = arith.maximumf %5, %6 : vector<512x128xf32>
    %8 = arith.truncf %7 : vector<512x128xf32> to vector<512x128xbf16>
    %c0_6 = arith.constant 0 : index
    %c0_7 = arith.constant 0 : index
    %9 = vector.load %arg4[%c0_6, %c0_7] : memref<512x128xbf16, #tpu.memory_space<vmem>>, vector<512x128xbf16>
    tpu.vector_store %arg4[%c0_6, %c0_7], %8 {strides = array<i32>} : memref<512x128xbf16, #tpu.memory_space<vmem>>, vector<512x128xbf16>,
    return
  }
  func.func @transform_0(%arg0: i32) -> (i32, i32) {
    %c0_i32 = arith.constant 0 : i32
    %c0_i32_0 = arith.constant 0 : i32
    return %arg0, %c0_i32 : i32, i32
  }
  func.func @transform_1(%arg0: i32) -> (i32, i32) {
    %c0_i32 = arith.constant 0 : i32
    %c0_i32_0 = arith.constant 0 : i32
    %c0_i32_1 = arith.constant 0 : i32
    return %c0_i32, %c0_i32_0 : i32, i32
  }
  func.func @transform_2(%arg0: i32) -> (i32, i32) {
    %c0_i32 = arith.constant 0 : i32
    %c0_i32_0 = arith.constant 0 : i32
    %c0_i32_1 = arith.constant 0 : i32
    return %c0_i32, %c0_i32_0 : i32, i32
  }
  func.func @transform_3(%arg0: i32) -> (i32, i32) {
    %c0_i32 = arith.constant 0 : i32
    %c0_i32_0 = arith.constant 0 : i32
    return %arg0, %c0_i32 : i32, i32
  }
}

module attributes {stable_mosaic.version = 11 : i64} {
  func.func @_fused_conv_bn_kernel(%arg0: i32, %arg1: memref<512x256xbf16, #tpu.memory_space<vmem>>, %arg2: memref<256x128xbf16, #tpu.memory_space<vmem>>, %arg3: memref<1x128xf32, #tpu.memory_space<vmem>>, %arg4: memref<512x128xbf16, #tpu.memory_space<vmem>>) attributes {dimension_semantics = [#tpu.dimension_semantics<parallel>], iteration_bounds = array<i64: 1>, scalar_prefetch = 0 : i64, scratch_operands = 0 : i64, tpu.core_type = #tpu.core_type<tc>, window_params = [{transform_indices = @transform_0, window_bounds = array<i64: 512, 256>}, {pipeline_mode = #tpu.pipeline_mode<synchronous>, transform_indices = @transform_1, window_bounds = array<i64: 256, 128>}, {pipeline_mode = #tpu.pipeline_mode<synchronous>, transform_indices = @transform_2, window_bounds = array<i64: 1, 128>}, {transform_indices = @transform_3, window_bounds = array<i64: 512, 128>}]} {
    %c0 = arith.constant 0 : index
    %c0_0 = arith.constant 0 : index
    %0 = vector.load %arg1[%c0, %c0_0] : memref<512x256xbf16, #tpu.memory_space<vmem>>, vector<512x256xbf16>
    %c0_1 = arith.constant 0 : index
    %c0_2 = arith.constant 0 : index
    %1 = vector.load %arg2[%c0_1, %c0_2] : memref<256x128xbf16, #tpu.memory_space<vmem>>, vector<256x128xbf16>
    %cst = arith.constant dense<0.000000e+00> : vector<512x128xf32>
    %2 = tpu.matmul %0, %1, %cst {dimension_numbers = #tpu.dot_dimension_numbers<[1], [0], [0], [1], [0, 0, 1, 1], [], []>} : vector<512x256xbf16>, vector<256x128xbf16>, vector<512x128xf32> -> vector<512x128xf32>
    %c0_3 = arith.constant 0 : index
    %c0_4 = arith.constant 0 : index
    %3 = vector.load %arg3[%c0_3, %c0_4] : memref<1x128xf32, #tpu.memory_space<vmem>>, vector<1x128xf32>
    %4 = vector.broadcast %3 : vector<1x128xf32> to vector<512x128xf32>
    %5 = arith.addf %2, %4 : vector<512x128xf32>
    %cst_5 = arith.constant 0.000000e+00 : f32
    %6 = vector.broadcast %cst_5 : f32 to vector<512x128xf32>
    %7 = arith.maximumf %5, %6 : vector<512x128xf32>
    %8 = arith.truncf %7 : vector<512x128xf32> to vector<512x128xbf16>
    %c0_6 = arith.constant 0 : index
    %c0_7 = arith.constant 0 : index
    %9 = vector.load %arg4[%c0_6, %c0_7] : memref<512x128xbf16, #tpu.memory_space<vmem>>, vector<512x128xbf16>
    tpu.vector_store %arg4[%c0_6, %c0_7], %8 {strides = array<i32>} : memref<512x128xbf16, #tpu.memory_space<vmem>>, vector<512x128xbf16>,
    return
  }
  func.func @transform_0(%arg0: i32) -> (i32, i32) {
    %c0_i32 = arith.constant 0 : i32
    %c0_i32_0 = arith.constant 0 : i32
    return %arg0, %c0_i32 : i32, i32
  }
  func.func @transform_1(%arg0: i32) -> (i32, i32) {
    %c0_i32 = arith.constant 0 : i32
    %c0_i32_0 = arith.constant 0 : i32
    %c0_i32_1 = arith.constant 0 : i32
    return %c0_i32, %c0_i32_0 : i32, i32
  }
  func.func @transform_2(%arg0: i32) -> (i32, i32) {
    %c0_i32 = arith.constant 0 : i32
    %c0_i32_0 = arith.constant 0 : i32
    %c0_i32_1 = arith.constant 0 : i32
    return %c0_i32, %c0_i32_0 : i32, i32
  }
  func.func @transform_3(%arg0: i32) -> (i32, i32) {
    %c0_i32 = arith.constant 0 : i32
    %c0_i32_0 = arith.constant 0 : i32
    return %arg0, %c0_i32 : i32, i32
  }
}

module attributes {stable_mosaic.version = 11 : i64} {
  func.func @_fused_conv_bn_kernel(%arg0: i32, %arg1: memref<512x256xbf16, #tpu.memory_space<vmem>>, %arg2: memref<256x128xbf16, #tpu.memory_space<vmem>>, %arg3: memref<1x128xf32, #tpu.memory_space<vmem>>, %arg4: memref<512x128xbf16, #tpu.memory_space<vmem>>, %arg5: memref<512x128xbf16, #tpu.memory_space<vmem>>) attributes {dimension_semantics = [#tpu.dimension_semantics<parallel>], iteration_bounds = array<i64: 1>, scalar_prefetch = 0 : i64, scratch_operands = 0 : i64, tpu.core_type = #tpu.core_type<tc>, window_params = [{transform_indices = @transform_0, window_bounds = array<i64: 512, 256>}, {pipeline_mode = #tpu.pipeline_mode<synchronous>, transform_indices = @transform_1, window_bounds = array<i64: 256, 128>}, {pipeline_mode = #tpu.pipeline_mode<synchronous>, transform_indices = @transform_2, window_bounds = array<i64: 1, 128>}, {transform_indices = @transform_3, window_bounds = array<i64: 512, 128>}, {transform_indices = @transform_4, window_bounds = array<i64: 512, 128>}]} {
    %c0 = arith.constant 0 : index
    %c0_0 = arith.constant 0 : index
    %0 = vector.load %arg1[%c0, %c0_0] : memref<512x256xbf16, #tpu.memory_space<vmem>>, vector<512x256xbf16>
    %c0_1 = arith.constant 0 : index
    %c0_2 = arith.constant 0 : index
    %1 = vector.load %arg2[%c0_1, %c0_2] : memref<256x128xbf16, #tpu.memory_space<vmem>>, vector<256x128xbf16>
    %cst = arith.constant dense<0.000000e+00> : vector<512x128xf32>
    %2 = tpu.matmul %0, %1, %cst {dimension_numbers = #tpu.dot_dimension_numbers<[1], [0], [0], [1], [0, 0, 1, 1], [], []>} : vector<512x256xbf16>, vector<256x128xbf16>, vector<512x128xf32> -> vector<512x128xf32>
    %c0_3 = arith.constant 0 : index
    %c0_4 = arith.constant 0 : index
    %3 = vector.load %arg3[%c0_3, %c0_4] : memref<1x128xf32, #tpu.memory_space<vmem>>, vector<1x128xf32>
    %4 = vector.broadcast %3 : vector<1x128xf32> to vector<512x128xf32>
    %5 = arith.addf %2, %4 : vector<512x128xf32>
    %c0_5 = arith.constant 0 : index
    %c0_6 = arith.constant 0 : index
    %6 = vector.load %arg4[%c0_5, %c0_6] : memref<512x128xbf16, #tpu.memory_space<vmem>>, vector<512x128xbf16>
    %7 = arith.extf %6 : vector<512x128xbf16> to vector<512x128xf32>
    %8 = arith.addf %5, %7 : vector<512x128xf32>
    %cst_7 = arith.constant 0.000000e+00 : f32
    %9 = vector.broadcast %cst_7 : f32 to vector<512x128xf32>
    %10 = arith.maximumf %8, %9 : vector<512x128xf32>
    %11 = arith.truncf %10 : vector<512x128xf32> to vector<512x128xbf16>
    %c0_8 = arith.constant 0 : index
    %c0_9 = arith.constant 0 : index
    %12 = vector.load %arg5[%c0_8, %c0_9] : memref<512x128xbf16, #tpu.memory_space<vmem>>, vector<512x128xbf16>
    tpu.vector_store %arg5[%c0_8, %c0_9], %11 {strides = array<i32>} : memref<512x128xbf16, #tpu.memory_space<vmem>>, vector<512x128xbf16>,
    return
  }
  func.func @transform_0(%arg0: i32) -> (i32, i32) {
    %c0_i32 = arith.constant 0 : i32
    %c0_i32_0 = arith.constant 0 : i32
    return %arg0, %c0_i32 : i32, i32
  }
  func.func @transform_1(%arg0: i32) -> (i32, i32) {
    %c0_i32 = arith.constant 0 : i32
    %c0_i32_0 = arith.constant 0 : i32
    %c0_i32_1 = arith.constant 0 : i32
    return %c0_i32, %c0_i32_0 : i32, i32
  }
  func.func @transform_2(%arg0: i32) -> (i32, i32) {
    %c0_i32 = arith.constant 0 : i32
    %c0_i32_0 = arith.constant 0 : i32
    %c0_i32_1 = arith.constant 0 : i32
    return %c0_i32, %c0_i32_0 : i32, i32
  }
  func.func @transform_3(%arg0: i32) -> (i32, i32) {
    %c0_i32 = arith.constant 0 : i32
    %c0_i32_0 = arith.constant 0 : i32
    return %arg0, %c0_i32 : i32, i32
  }
  func.func @transform_4(%arg0: i32) -> (i32, i32) {
    %c0_i32 = arith.constant 0 : i32
    %c0_i32_0 = arith.constant 0 : i32
    return %arg0, %c0_i32 : i32, i32
  }
}

module attributes {stable_mosaic.version = 11 : i64} {
  func.func @_fused_conv_bn_kernel(%arg0: i32, %arg1: memref<128x256xbf16, #tpu.memory_space<vmem>>, %arg2: memref<256x128xbf16, #tpu.memory_space<vmem>>, %arg3: memref<1x128xf32, #tpu.memory_space<vmem>>, %arg4: memref<128x128xbf16, #tpu.memory_space<vmem>>) attributes {dimension_semantics = [#tpu.dimension_semantics<parallel>], iteration_bounds = array<i64: 1>, scalar_prefetch = 0 : i64, scratch_operands = 0 : i64, tpu.core_type = #tpu.core_type<tc>, window_params = [{transform_indices = @transform_0, window_bounds = array<i64: 128, 256>}, {pipeline_mode = #tpu.pipeline_mode<synchronous>, transform_indices = @transform_1, window_bounds = array<i64: 256, 128>}, {pipeline_mode = #tpu.pipeline_mode<synchronous>, transform_indices = @transform_2, window_bounds = array<i64: 1, 128>}, {transform_indices = @transform_3, window_bounds = array<i64: 128, 128>}]} {
    %c0 = arith.constant 0 : index
    %c0_0 = arith.constant 0 : index
    %0 = vector.load %arg1[%c0, %c0_0] : memref<128x256xbf16, #tpu.memory_space<vmem>>, vector<128x256xbf16>
    %c0_1 = arith.constant 0 : index
    %c0_2 = arith.constant 0 : index
    %1 = vector.load %arg2[%c0_1, %c0_2] : memref<256x128xbf16, #tpu.memory_space<vmem>>, vector<256x128xbf16>
    %cst = arith.constant dense<0.000000e+00> : vector<128x128xf32>
    %2 = tpu.matmul %0, %1, %cst {dimension_numbers = #tpu.dot_dimension_numbers<[1], [0], [0], [1], [0, 0, 1, 1], [], []>} : vector<128x256xbf16>, vector<256x128xbf16>, vector<128x128xf32> -> vector<128x128xf32>
    %c0_3 = arith.constant 0 : index
    %c0_4 = arith.constant 0 : index
    %3 = vector.load %arg3[%c0_3, %c0_4] : memref<1x128xf32, #tpu.memory_space<vmem>>, vector<1x128xf32>
    %4 = vector.broadcast %3 : vector<1x128xf32> to vector<128x128xf32>
    %5 = arith.addf %2, %4 : vector<128x128xf32>
    %cst_5 = arith.constant 0.000000e+00 : f32
    %6 = vector.broadcast %cst_5 : f32 to vector<128x128xf32>
    %7 = arith.maximumf %5, %6 : vector<128x128xf32>
    %8 = arith.truncf %7 : vector<128x128xf32> to vector<128x128xbf16>
    %c0_6 = arith.constant 0 : index
    %c0_7 = arith.constant 0 : index
    %9 = vector.load %arg4[%c0_6, %c0_7] : memref<128x128xbf16, #tpu.memory_space<vmem>>, vector<128x128xbf16>
    tpu.vector_store %arg4[%c0_6, %c0_7], %8 {strides = array<i32>} : memref<128x128xbf16, #tpu.memory_space<vmem>>, vector<128x128xbf16>,
    return
  }
  func.func @transform_0(%arg0: i32) -> (i32, i32) {
    %c0_i32 = arith.constant 0 : i32
    %c0_i32_0 = arith.constant 0 : i32
    return %arg0, %c0_i32 : i32, i32
  }
  func.func @transform_1(%arg0: i32) -> (i32, i32) {
    %c0_i32 = arith.constant 0 : i32
    %c0_i32_0 = arith.constant 0 : i32
    %c0_i32_1 = arith.constant 0 : i32
    return %c0_i32, %c0_i32_0 : i32, i32
  }
  func.func @transform_2(%arg0: i32) -> (i32, i32) {
    %c0_i32 = arith.constant 0 : i32
    %c0_i32_0 = arith.constant 0 : i32
    %c0_i32_1 = arith.constant 0 : i32
    return %c0_i32, %c0_i32_0 : i32, i32
  }
  func.func @transform_3(%arg0: i32) -> (i32, i32) {
    %c0_i32 = arith.constant 0 : i32
    %c0_i32_0 = arith.constant 0 : i32
    return %arg0, %c0_i32 : i32, i32
  }
}

module attributes {stable_mosaic.version = 11 : i64} {
  func.func @_fused_conv_bn_kernel(%arg0: i32, %arg1: memref<128x384xbf16, #tpu.memory_space<vmem>>, %arg2: memref<384x128xbf16, #tpu.memory_space<vmem>>, %arg3: memref<1x128xf32, #tpu.memory_space<vmem>>, %arg4: memref<128x128xbf16, #tpu.memory_space<vmem>>, %arg5: memref<128x128xbf16, #tpu.memory_space<vmem>>) attributes {dimension_semantics = [#tpu.dimension_semantics<parallel>], iteration_bounds = array<i64: 1>, scalar_prefetch = 0 : i64, scratch_operands = 0 : i64, tpu.core_type = #tpu.core_type<tc>, window_params = [{transform_indices = @transform_0, window_bounds = array<i64: 128, 384>}, {pipeline_mode = #tpu.pipeline_mode<synchronous>, transform_indices = @transform_1, window_bounds = array<i64: 384, 128>}, {pipeline_mode = #tpu.pipeline_mode<synchronous>, transform_indices = @transform_2, window_bounds = array<i64: 1, 128>}, {transform_indices = @transform_3, window_bounds = array<i64: 128, 128>}, {transform_indices = @transform_4, window_bounds = array<i64: 128, 128>}]} {
    %c0 = arith.constant 0 : index
    %c0_0 = arith.constant 0 : index
    %0 = vector.load %arg1[%c0, %c0_0] : memref<128x384xbf16, #tpu.memory_space<vmem>>, vector<128x384xbf16>
    %c0_1 = arith.constant 0 : index
    %c0_2 = arith.constant 0 : index
    %1 = vector.load %arg2[%c0_1, %c0_2] : memref<384x128xbf16, #tpu.memory_space<vmem>>, vector<384x128xbf16>
    %cst = arith.constant dense<0.000000e+00> : vector<128x128xf32>
    %2 = tpu.matmul %0, %1, %cst {dimension_numbers = #tpu.dot_dimension_numbers<[1], [0], [0], [1], [0, 0, 1, 1], [], []>} : vector<128x384xbf16>, vector<384x128xbf16>, vector<128x128xf32> -> vector<128x128xf32>
    %c0_3 = arith.constant 0 : index
    %c0_4 = arith.constant 0 : index
    %3 = vector.load %arg3[%c0_3, %c0_4] : memref<1x128xf32, #tpu.memory_space<vmem>>, vector<1x128xf32>
    %4 = vector.broadcast %3 : vector<1x128xf32> to vector<128x128xf32>
    %5 = arith.addf %2, %4 : vector<128x128xf32>
    %c0_5 = arith.constant 0 : index
    %c0_6 = arith.constant 0 : index
    %6 = vector.load %arg4[%c0_5, %c0_6] : memref<128x128xbf16, #tpu.memory_space<vmem>>, vector<128x128xbf16>
    %7 = arith.extf %6 : vector<128x128xbf16> to vector<128x128xf32>
    %8 = arith.addf %5, %7 : vector<128x128xf32>
    %cst_7 = arith.constant 0.000000e+00 : f32
    %9 = vector.broadcast %cst_7 : f32 to vector<128x128xf32>
    %10 = arith.maximumf %8, %9 : vector<128x128xf32>
    %11 = arith.truncf %10 : vector<128x128xf32> to vector<128x128xbf16>
    %c0_8 = arith.constant 0 : index
    %c0_9 = arith.constant 0 : index
    %12 = vector.load %arg5[%c0_8, %c0_9] : memref<128x128xbf16, #tpu.memory_space<vmem>>, vector<128x128xbf16>
    tpu.vector_store %arg5[%c0_8, %c0_9], %11 {strides = array<i32>} : memref<128x128xbf16, #tpu.memory_space<vmem>>, vector<128x128xbf16>,
    return
  }
  func.func @transform_0(%arg0: i32) -> (i32, i32) {
    %c0_i32 = arith.constant 0 : i32
    %c0_i32_0 = arith.constant 0 : i32
    return %arg0, %c0_i32 : i32, i32
  }
  func.func @transform_1(%arg0: i32) -> (i32, i32) {
    %c0_i32 = arith.constant 0 : i32
    %c0_i32_0 = arith.constant 0 : i32
    %c0_i32_1 = arith.constant 0 : i32
    return %c0_i32, %c0_i32_0 : i32, i32
  }
  func.func @transform_2(%arg0: i32) -> (i32, i32) {
    %c0_i32 = arith.constant 0 : i32
    %c0_i32_0 = arith.constant 0 : i32
    %c0_i32_1 = arith.constant 0 : i32
    return %c0_i32, %c0_i32_0 : i32, i32
  }
  func.func @transform_3(%arg0: i32) -> (i32, i32) {
    %c0_i32 = arith.constant 0 : i32
    %c0_i32_0 = arith.constant 0 : i32
    return %arg0, %c0_i32 : i32, i32
  }
  func.func @transform_4(%arg0: i32) -> (i32, i32) {
    %c0_i32 = arith.constant 0 : i32
    %c0_i32_0 = arith.constant 0 : i32
    return %arg0, %c0_i32 : i32, i32
  }
}

module attributes {stable_mosaic.version = 11 : i64} {
  func.func @_fused_conv_bn_kernel(%arg0: i32, %arg1: memref<32x384xbf16, #tpu.memory_space<vmem>>, %arg2: memref<384x128xbf16, #tpu.memory_space<vmem>>, %arg3: memref<1x128xf32, #tpu.memory_space<vmem>>, %arg4: memref<32x128xbf16, #tpu.memory_space<vmem>>) attributes {dimension_semantics = [#tpu.dimension_semantics<parallel>], iteration_bounds = array<i64: 1>, scalar_prefetch = 0 : i64, scratch_operands = 0 : i64, tpu.core_type = #tpu.core_type<tc>, window_params = [{transform_indices = @transform_0, window_bounds = array<i64: 32, 384>}, {pipeline_mode = #tpu.pipeline_mode<synchronous>, transform_indices = @transform_1, window_bounds = array<i64: 384, 128>}, {pipeline_mode = #tpu.pipeline_mode<synchronous>, transform_indices = @transform_2, window_bounds = array<i64: 1, 128>}, {transform_indices = @transform_3, window_bounds = array<i64: 32, 128>}]} {
    %c0 = arith.constant 0 : index
    %c0_0 = arith.constant 0 : index
    %0 = vector.load %arg1[%c0, %c0_0] : memref<32x384xbf16, #tpu.memory_space<vmem>>, vector<32x384xbf16>
    %c0_1 = arith.constant 0 : index
    %c0_2 = arith.constant 0 : index
    %1 = vector.load %arg2[%c0_1, %c0_2] : memref<384x128xbf16, #tpu.memory_space<vmem>>, vector<384x128xbf16>
    %cst = arith.constant dense<0.000000e+00> : vector<32x128xf32>
    %2 = tpu.matmul %0, %1, %cst {dimension_numbers = #tpu.dot_dimension_numbers<[1], [0], [0], [1], [0, 0, 1, 1], [], []>} : vector<32x384xbf16>, vector<384x128xbf16>, vector<32x128xf32> -> vector<32x128xf32>
    %c0_3 = arith.constant 0 : index
    %c0_4 = arith.constant 0 : index
    %3 = vector.load %arg3[%c0_3, %c0_4] : memref<1x128xf32, #tpu.memory_space<vmem>>, vector<1x128xf32>
    %4 = vector.broadcast %3 : vector<1x128xf32> to vector<32x128xf32>
    %5 = arith.addf %2, %4 : vector<32x128xf32>
    %cst_5 = arith.constant 0.000000e+00 : f32
    %6 = vector.broadcast %cst_5 : f32 to vector<32x128xf32>
    %7 = arith.maximumf %5, %6 : vector<32x128xf32>
    %8 = arith.truncf %7 : vector<32x128xf32> to vector<32x128xbf16>
    %c0_6 = arith.constant 0 : index
    %c0_7 = arith.constant 0 : index
    %9 = vector.load %arg4[%c0_6, %c0_7] : memref<32x128xbf16, #tpu.memory_space<vmem>>, vector<32x128xbf16>
    tpu.vector_store %arg4[%c0_6, %c0_7], %8 {strides = array<i32>} : memref<32x128xbf16, #tpu.memory_space<vmem>>, vector<32x128xbf16>,
    return
  }
  func.func @transform_0(%arg0: i32) -> (i32, i32) {
    %c0_i32 = arith.constant 0 : i32
    %c0_i32_0 = arith.constant 0 : i32
    return %arg0, %c0_i32 : i32, i32
  }
  func.func @transform_1(%arg0: i32) -> (i32, i32) {
    %c0_i32 = arith.constant 0 : i32
    %c0_i32_0 = arith.constant 0 : i32
    %c0_i32_1 = arith.constant 0 : i32
    return %c0_i32, %c0_i32_0 : i32, i32
  }
  func.func @transform_2(%arg0: i32) -> (i32, i32) {
    %c0_i32 = arith.constant 0 : i32
    %c0_i32_0 = arith.constant 0 : i32
    %c0_i32_1 = arith.constant 0 : i32
    return %c0_i32, %c0_i32_0 : i32, i32
  }
  func.func @transform_3(%arg0: i32) -> (i32, i32) {
    %c0_i32 = arith.constant 0 : i32
    %c0_i32_0 = arith.constant 0 : i32
    return %arg0, %c0_i32 : i32, i32
  }
}

module attributes {stable_mosaic.version = 11 : i64} {
  func.func @_fused_conv_bn_kernel(%arg0: i32, %arg1: memref<32x640xbf16, #tpu.memory_space<vmem>>, %arg2: memref<640x128xbf16, #tpu.memory_space<vmem>>, %arg3: memref<1x128xf32, #tpu.memory_space<vmem>>, %arg4: memref<32x128xbf16, #tpu.memory_space<vmem>>, %arg5: memref<32x128xbf16, #tpu.memory_space<vmem>>) attributes {dimension_semantics = [#tpu.dimension_semantics<parallel>], iteration_bounds = array<i64: 1>, scalar_prefetch = 0 : i64, scratch_operands = 0 : i64, tpu.core_type = #tpu.core_type<tc>, window_params = [{transform_indices = @transform_0, window_bounds = array<i64: 32, 640>}, {pipeline_mode = #tpu.pipeline_mode<synchronous>, transform_indices = @transform_1, window_bounds = array<i64: 640, 128>}, {pipeline_mode = #tpu.pipeline_mode<synchronous>, transform_indices = @transform_2, window_bounds = array<i64: 1, 128>}, {transform_indices = @transform_3, window_bounds = array<i64: 32, 128>}, {transform_indices = @transform_4, window_bounds = array<i64: 32, 128>}]} {
    %c0 = arith.constant 0 : index
    %c0_0 = arith.constant 0 : index
    %0 = vector.load %arg1[%c0, %c0_0] : memref<32x640xbf16, #tpu.memory_space<vmem>>, vector<32x640xbf16>
    %c0_1 = arith.constant 0 : index
    %c0_2 = arith.constant 0 : index
    %1 = vector.load %arg2[%c0_1, %c0_2] : memref<640x128xbf16, #tpu.memory_space<vmem>>, vector<640x128xbf16>
    %cst = arith.constant dense<0.000000e+00> : vector<32x128xf32>
    %2 = tpu.matmul %0, %1, %cst {dimension_numbers = #tpu.dot_dimension_numbers<[1], [0], [0], [1], [0, 0, 1, 1], [], []>} : vector<32x640xbf16>, vector<640x128xbf16>, vector<32x128xf32> -> vector<32x128xf32>
    %c0_3 = arith.constant 0 : index
    %c0_4 = arith.constant 0 : index
    %3 = vector.load %arg3[%c0_3, %c0_4] : memref<1x128xf32, #tpu.memory_space<vmem>>, vector<1x128xf32>
    %4 = vector.broadcast %3 : vector<1x128xf32> to vector<32x128xf32>
    %5 = arith.addf %2, %4 : vector<32x128xf32>
    %c0_5 = arith.constant 0 : index
    %c0_6 = arith.constant 0 : index
    %6 = vector.load %arg4[%c0_5, %c0_6] : memref<32x128xbf16, #tpu.memory_space<vmem>>, vector<32x128xbf16>
    %7 = arith.extf %6 : vector<32x128xbf16> to vector<32x128xf32>
    %8 = arith.addf %5, %7 : vector<32x128xf32>
    %cst_7 = arith.constant 0.000000e+00 : f32
    %9 = vector.broadcast %cst_7 : f32 to vector<32x128xf32>
    %10 = arith.maximumf %8, %9 : vector<32x128xf32>
    %11 = arith.truncf %10 : vector<32x128xf32> to vector<32x128xbf16>
    %c0_8 = arith.constant 0 : index
    %c0_9 = arith.constant 0 : index
    %12 = vector.load %arg5[%c0_8, %c0_9] : memref<32x128xbf16, #tpu.memory_space<vmem>>, vector<32x128xbf16>
    tpu.vector_store %arg5[%c0_8, %c0_9], %11 {strides = array<i32>} : memref<32x128xbf16, #tpu.memory_space<vmem>>, vector<32x128xbf16>,
    return
  }
  func.func @transform_0(%arg0: i32) -> (i32, i32) {
    %c0_i32 = arith.constant 0 : i32
    %c0_i32_0 = arith.constant 0 : i32
    return %arg0, %c0_i32 : i32, i32
  }
  func.func @transform_1(%arg0: i32) -> (i32, i32) {
    %c0_i32 = arith.constant 0 : i32
    %c0_i32_0 = arith.constant 0 : i32
    %c0_i32_1 = arith.constant 0 : i32
    return %c0_i32, %c0_i32_0 : i32, i32
  }
  func.func @transform_2(%arg0: i32) -> (i32, i32) {
    %c0_i32 = arith.constant 0 : i32
    %c0_i32_0 = arith.constant 0 : i32
    %c0_i32_1 = arith.constant 0 : i32
    return %c0_i32, %c0_i32_0 : i32, i32
  }
  func.func @transform_3(%arg0: i32) -> (i32, i32) {
    %c0_i32 = arith.constant 0 : i32
    %c0_i32_0 = arith.constant 0 : i32
    return %arg0, %c0_i32 : i32, i32
  }
  func.func @transform_4(%arg0: i32) -> (i32, i32) {
    %c0_i32 = arith.constant 0 : i32
    %c0_i32_0 = arith.constant 0 : i32
    return %arg0, %c0_i32 : i32, i32
  }
}

module attributes {stable_mosaic.version = 11 : i64} {
  func.func @_avgpool_kernel(%arg0: memref<2x16x64xbf16, #tpu.memory_space<vmem>>, %arg1: memref<2x64xf32, #tpu.memory_space<vmem>>) attributes {dimension_semantics = [], scalar_prefetch = 0 : i64, scratch_operands = 0 : i64, tpu.core_type = #tpu.core_type<tc>} {
    %c0 = arith.constant 0 : index
    %c0_0 = arith.constant 0 : index
    %c0_1 = arith.constant 0 : index
    %0 = vector.load %arg0[%c0, %c0_0, %c0_1] : memref<2x16x64xbf16, #tpu.memory_space<vmem>>, vector<2x16x64xbf16>
    %1 = arith.extf %0 : vector<2x16x64xbf16> to vector<2x16x64xf32>
    %cst = arith.constant dense<0.000000e+00> : vector<2x64xf32>
    %2 = vector.multi_reduction <add>, %1, %cst [1] : vector<2x16x64xf32> to vector<2x64xf32>
    %cst_2 = arith.constant 1.600000e+01 : f32
    %3 = vector.broadcast %cst_2 : f32 to vector<2x64xf32>
    %4 = arith.divf %2, %3 : vector<2x64xf32>
    %c0_3 = arith.constant 0 : index
    %c0_4 = arith.constant 0 : index
    %5 = vector.load %arg1[%c0_3, %c0_4] : memref<2x64xf32, #tpu.memory_space<vmem>>, vector<2x64xf32>
    tpu.vector_store %arg1[%c0_3, %c0_4], %4 {strides = array<i32>} : memref<2x64xf32, #tpu.memory_space<vmem>>, vector<2x64xf32>,
    return
  }
}

</mosaic_0001>

<bundles_post_ra>
// kernel: forward.8
= control target key start
LH: loop header
LB: loop body
LE: loop exit
PB: predicated region body
PF: predicated region fallthrough
CT: control target
= control target key end

     0   :  { %s1860_s1 = inlined_call_operand.vmem [shape: bf16[128,128], index: 1, kind: input, shape index: {}]   ;;  %s1861_s0 = inlined_call_operand.vmem [shape: bf16[512,128], index: 0, kind: input, shape index: {}]   ;;  %s1862_s2 = inlined_call_operand.vmem [shape: f32[1,128], index: 2, kind: input, shape index: {}]   ;;  %s1863_s3 = inlined_call_operand.vmem [shape: bf16[512,128], index: 3, kind: output, shape index: {}]  }
   0x1   :  { %v1515_v0 = vld [vmem:[%s1860_s1] sm:$0xff]   ;;  %v1516_v1 = vld [vmem:[%s1860_s1 + $0x8] sm:$0xff]   ;;  %v1517_v2 = vld [vmem:[%s1860_s1 + $0x10] sm:$0xff]  }
   0x2   :  { %1419 = vmatprep.subr.bf16.mxu0 %v1515_v0  ;;  %1499 = vmatprep.subr.bf16.mxu1 %v1515_v0  ;;  %v1518_v3 = vld [vmem:[%s1860_s1 + $0x18] sm:$0xff]   ;;  %v1523_v4 = vld [vmem:[%s1861_s0] sm:$0xff]   ;;  %v1520_v7 = vld [vmem:[%s1860_s1 + $0x28] sm:$0xff]  }
   0x3   :  { %1420 = vmatpush3.bf16.msra.mxu0 %v1515_v0  ;;  %1507 = vmatpush3.bf16.msra.mxu1 %v1515_v0  ;;  %v1524_v5 = vld [vmem:[%s1861_s0 + $0x80] sm:$0xff]   ;;  %v1521_v8 = vld [vmem:[%s1860_s1 + $0x30] sm:$0xff]   ;;  %v1522_v9 = vld [vmem:[%s1860_s1 + $0x38] sm:$0xff]  }
   0x4   :  { %1421 = vmatprep.subr.bf16.mxu0 %v1516_v1  ;;  %1500 = vmatprep.subr.bf16.mxu1 %v1516_v1  ;;  %v1519_v6 = vld [vmem:[%s1860_s1 + $0x20] sm:$0xff]   ;;  %v1525_v10 = vld [vmem:[%s1861_s0 + $0x8] sm:$0xff]   ;;  %v1527_v12 = vld [vmem:[%s1861_s0 + $0x10] sm:$0xff]  }
   0x5   :  { %1435 = vmatprep.mubr.bf16.mxu0 %v1523_v4  ;;  %1467 = vmatprep.mubr.bf16.mxu1 %v1524_v5  ;;  %v1526_v11 = vld [vmem:[%s1861_s0 + $0x88] sm:$0xff]   ;;  %v1528_v13 = vld [vmem:[%s1861_s0 + $0x90] sm:$0xff]   ;;  %v1529_v14 = vld [vmem:[%s1861_s0 + $0x18] sm:$0xff]  }
   0x6   :  { %v1530_v15 = vld [vmem:[%s1861_s0 + $0x98] sm:$0xff]   ;;  %v1531_v16 = vld [vmem:[%s1861_s0 + $0x20] sm:$0xff]   ;;  %v1533_v18 = vld [vmem:[%s1861_s0 + $0x28] sm:$0xff]  }
   0x7   :  { %1422 = vmatpush3.bf16.msra.mxu0 %v1516_v1  ;;  %1508 = vmatpush3.bf16.msra.mxu1 %v1516_v1  ;;  %v1532_v17 = vld [vmem:[%s1861_s0 + $0xa0] sm:$0xff]   ;;  %v1534_v19 = vld [vmem:[%s1861_s0 + $0xa8] sm:$0xff]   ;;  %v1535_v20 = vld [vmem:[%s1861_s0 + $0x30] sm:$0xff]  }
   0x8   :  { %1423 = vmatprep.subr.bf16.mxu0 %v1517_v2  ;;  %1501 = vmatprep.subr.bf16.mxu1 %v1517_v2  ;;  %v1536_v21 = vld [vmem:[%s1861_s0 + $0xb0] sm:$0xff]   ;;  %v1537_v22 = vld [vmem:[%s1861_s0 + $0x38] sm:$0xff]   ;;  %v1539_v24 = vld [vmem:[%s1861_s0 + $0x40] sm:$0xff]  }
   0x9   :  { %v1538_v23 = vld [vmem:[%s1861_s0 + $0xb8] sm:$0xff]   ;;  %v1540_v25 = vld [vmem:[%s1861_s0 + $0xc0] sm:$0xff]   ;;  %v1541_v26 = vld [vmem:[%s1861_s0 + $0x48] sm:$0xff]  }
   0xa   :  { %v1542_v27 = vld [vmem:[%s1861_s0 + $0xc8] sm:$0xff]   ;;  %v1543_v28 = vld [vmem:[%s1861_s0 + $0x50] sm:$0xff]   ;;  %v1545_v30 = vld [vmem:[%s1861_s0 + $0x58] sm:$0xff]  }
   0xb   :  { %1424 = vmatpush3.bf16.msra.mxu0 %v1517_v2  ;;  %1509 = vmatpush3.bf16.msra.mxu1 %v1517_v2  ;;  %v1544_v29 = vld [vmem:[%s1861_s0 + $0xd0] sm:$0xff]   ;;  %v1546_v31 = vld [vmem:[%s1861_s0 + $0xd8] sm:$0xff]   ;;  %v1547_v32 = vld [vmem:[%s1861_s0 + $0x60] sm:$0xff]  }
   0xc   :  { %1425 = vmatprep.subr.bf16.mxu0 %v1518_v3  ;;  %1502 = vmatprep.subr.bf16.mxu1 %v1518_v3  ;;  %v1548_v33 = vld [vmem:[%s1861_s0 + $0xe0] sm:$0xff]   ;;  %v1549_v34 = vld [vmem:[%s1861_s0 + $0x68] sm:$0xff]   ;;  %v1551_v36 = vld [vmem:[%s1861_s0 + $0x70] sm:$0xff]  }
   0xd   :  { %v1550_v35 = vld [vmem:[%s1861_s0 + $0xe8] sm:$0xff]   ;;  %v1552_v37 = vld [vmem:[%s1861_s0 + $0xf0] sm:$0xff]   ;;  %v1553_v38 = vld [vmem:[%s1861_s0 + $0x78] sm:$0xff]  }
   0xe   :  { %v1554_v39 = vld [vmem:[%s1861_s0 + $0xf8] sm:$0xff]   ;;  %v1698_v40 = vld [vmem:[%s1862_s2] ss:$0 sm:$0xff] }
   0xf   :  { %1426 = vmatpush3.bf16.msra.mxu0 %v1518_v3  ;;  %1510 = vmatpush3.bf16.msra.mxu1 %v1518_v3 }
  0x10   :  { %1427 = vmatprep.subr.bf16.mxu0 %v1519_v6  ;;  %1503 = vmatprep.subr.bf16.mxu1 %v1519_v6 }
  0x13   :  { %1428 = vmatpush3.bf16.msra.mxu0 %v1519_v6  ;;  %1511 = vmatpush3.bf16.msra.mxu1 %v1519_v6 }
  0x14   :  { %1429 = vmatprep.subr.bf16.mxu0 %v1520_v7  ;;  %1504 = vmatprep.subr.bf16.mxu1 %v1520_v7 }
  0x17   :  { %1430 = vmatpush3.bf16.msra.mxu0 %v1520_v7  ;;  %1512 = vmatpush3.bf16.msra.mxu1 %v1520_v7 }
  0x18   :  { %1431 = vmatprep.subr.bf16.mxu0 %v1521_v8  ;;  %1505 = vmatprep.subr.bf16.mxu1 %v1521_v8 }
  0x1b   :  { %1432 = vmatpush3.bf16.msra.mxu0 %v1521_v8  ;;  %1513 = vmatpush3.bf16.msra.mxu1 %v1521_v8 }
  0x1c   :  { %1433 = vmatprep.subr.bf16.mxu0 %v1522_v9  ;;  %1506 = vmatprep.subr.bf16.mxu1 %v1522_v9 }
  0x1f   :  { %1434 = vmatpush3.bf16.msra.mxu0 %v1522_v9  ;;  %1514 = vmatpush3.bf16.msra.mxu1 %v1522_v9 }
  0x22   :  { %1436 = vmatmul.mubr.bf16.vlgmr.msra.gmra.mrb[0].mxu0 %v1525_v10  ;;  %1468 = vmatmul.mubr.bf16.vlgmr.msra.gmra.mrb[0].mxu1 %v1526_v11 }
  0x23   :  { %1439 = vmatprep.mubr.bf16.mxu0 %v1527_v12  ;;  %1471 = vmatprep.mubr.bf16.mxu1 %v1528_v13 }
  0x2a   :  { %1440 = vmatmul.mubr.bf16.gmra.mrb[4].mxu0 %v1529_v14  ;;  %1472 = vmatmul.mubr.bf16.gmra.mrb[4].mxu1 %v1530_v15 }
  0x2b   :  { %1443 = vmatprep.mubr.bf16.mxu0 %v1531_v16  ;;  %1475 = vmatprep.mubr.bf16.mxu1 %v1532_v17 }
  0x32   :  { %1444 = vmatmul.mubr.bf16.gmra.mrb[8].mxu0 %v1533_v18  ;;  %1476 = vmatmul.mubr.bf16.gmra.mrb[8].mxu1 %v1534_v19 }
  0x33   :  { %1447 = vmatprep.mubr.bf16.mxu0 %v1535_v20  ;;  %1479 = vmatprep.mubr.bf16.mxu1 %v1536_v21 }
  0x3a   :  { %1448 = vmatmul.mubr.bf16.gmra.mrb[12].mxu0 %v1537_v22  ;;  %1480 = vmatmul.mubr.bf16.gmra.mrb[12].mxu1 %v1538_v23 }
  0x3b   :  { %1451 = vmatprep.mubr.bf16.mxu0 %v1539_v24  ;;  %1483 = vmatprep.mubr.bf16.mxu1 %v1540_v25 }
  0x42   :  { %1452 = vmatmul.mubr.bf16.gmra.mrb[16].mxu0 %v1541_v26  ;;  %1484 = vmatmul.mubr.bf16.gmra.mrb[16].mxu1 %v1542_v27 }
  0x43   :  { %1455 = vmatprep.mubr.bf16.mxu0 %v1543_v28  ;;  %1487 = vmatprep.mubr.bf16.mxu1 %v1544_v29 }
  0x4a   :  { %1456 = vmatmul.mubr.bf16.gmra.mrb[20].mxu0 %v1545_v30  ;;  %1488 = vmatmul.mubr.bf16.gmra.mrb[20].mxu1 %v1546_v31 }
  0x4b   :  { %1459 = vmatprep.mubr.bf16.mxu0 %v1547_v32  ;;  %1491 = vmatprep.mubr.bf16.mxu1 %v1548_v33 }
  0x52   :  { %1460 = vmatmul.mubr.bf16.gmra.mrb[24].mxu0 %v1549_v34  ;;  %1492 = vmatmul.mubr.bf16.gmra.mrb[24].mxu1 %v1550_v35 }
  0x53   :  { %1463 = vmatprep.mubr.bf16.mxu0 %v1551_v36  ;;  %1495 = vmatprep.mubr.bf16.mxu1 %v1552_v37 }
  0x5a   :  { %1464 = vmatmul.mubr.bf16.gmra.mrb[28].mxu0 %v1553_v38  ;;  %1496 = vmatmul.mubr.bf16.gmra.mrb[28].mxu1 %v1554_v39 }
  0xf5   :  { %v1437_v41 = vpop.f32.mrb[0].mxu0  ;;  %v1469_v42 = vpop.f32.mrb[0].mxu1 }
  0xf6   :  { %v385_v43 = vadd.f32 %v1437_v41, %v1698_v40  ;;  %v513_v44 = vadd.f32 %v1469_v42, %v1698_v40  ;;  %v376_v45 = vpop.f32.mrb[1].mxu0  ;;  %v504_v46 = vpop.f32.mrb[1].mxu1 }
  0xf7   :  { %v377_v47 = vadd.f32 %v1698_v40, %v376_v45  ;;  %v505_v48 = vadd.f32 %v1698_v40, %v504_v46  ;;  %v1438_v49 = vpop.f32.mrb[2].mxu0  ;;  %v1470_v50 = vpop.f32.mrb[2].mxu1 }
  0xf8   :  { %v388_v51 = vadd.f32 %v1438_v49, %v1698_v40  ;;  %v516_v52 = vadd.f32 %v1470_v50, %v1698_v40  ;;  %v379_v53 = vpop.f32.mrb[3].mxu0  ;;  %v507_v54 = vpop.f32.mrb[3].mxu1  ;;  %v633_v57 = vmax.f32 %v385_v43, 0.0  ;;  %v665_v58 = vmax.f32 %v513_v44, 0.0 }
  0xf9   :  { %v380_v55 = vadd.f32 %v1698_v40, %v379_v53  ;;  %v508_v56 = vadd.f32 %v1698_v40, %v507_v54  ;;  %v631_v61 = vmax.f32 %v377_v47, 0.0  ;;  %v663_v62 = vmax.f32 %v505_v48, 0.0 }
  0xfa   :  { %v634_v59 = vmax.f32 %v388_v51, 0.0  ;;  %v666_v60 = vmax.f32 %v516_v52, 0.0 }
  0xfb   :  { %v632_v63 = vmax.f32 %v380_v55, 0.0  ;;  %v664_v0 = vmax.f32 %v508_v56, 0.0 }
  0xfc   :  { %v1196_v1 = vpack.c.bf16 %v634_v59, %v633_v57  ;;  %v1276_v2 = vpack.c.bf16 %v666_v60, %v665_v58 }
  0xfd   :  { %v1191_v3 = vpack.c.bf16 %v632_v63, %v631_v61  ;;  %v1271_v4 = vpack.c.bf16 %v664_v0, %v663_v62  ;;  %v1441_v5 = vpop.f32.mrb[4].mxu0  ;;  %v1473_v6 = vpop.f32.mrb[4].mxu1 }
  0xfe   :  { %1348 = vst [vmem:[%s1863_s3 + $0x8] sm:$0xff] %v1196_v1   ;;  %1364 = vst [vmem:[%s1863_s3 + $0x88] sm:$0xff] %v1276_v2   ;;  %v401_v7 = vadd.f32 %v1441_v5, %v1698_v40  ;;  %v529_v8 = vadd.f32 %v1473_v6, %v1698_v40  ;;  %v392_v9 = vpop.f32.mrb[5].mxu0  ;;  %v520_v10 = vpop.f32.mrb[5].mxu1 }
  0xff   :  { %1192 = vst [vmem:[%s1863_s3] sm:$0xff] %v1191_v3   ;;  %1363 = vst [vmem:[%s1863_s3 + $0x80] sm:$0xff] %v1271_v4   ;;  %v393_v11 = vadd.f32 %v1698_v40, %v392_v9  ;;  %v521_v12 = vadd.f32 %v1698_v40, %v520_v10  ;;  %v1442_v13 = vpop.f32.mrb[6].mxu0  ;;  %v1474_v14 = vpop.f32.mrb[6].mxu1 }
 0x100   :  { %v404_v15 = vadd.f32 %v1442_v13, %v1698_v40  ;;  %v532_v16 = vadd.f32 %v1474_v14, %v1698_v40  ;;  %v395_v17 = vpop.f32.mrb[7].mxu0  ;;  %v523_v18 = vpop.f32.mrb[7].mxu1  ;;  %v637_v21 = vmax.f32 %v401_v7, 0.0  ;;  %v669_v22 = vmax.f32 %v529_v8, 0.0 }
 0x101   :  { %v396_v19 = vadd.f32 %v1698_v40, %v395_v17  ;;  %v524_v20 = vadd.f32 %v1698_v40, %v523_v18  ;;  %v635_v25 = vmax.f32 %v393_v11, 0.0  ;;  %v667_v26 = vmax.f32 %v521_v12, 0.0 }
 0x102   :  { %v638_v23 = vmax.f32 %v404_v15, 0.0  ;;  %v670_v24 = vmax.f32 %v532_v16, 0.0 }
 0x103   :  { %v636_v27 = vmax.f32 %v396_v19, 0.0  ;;  %v668_v28 = vmax.f32 %v524_v20, 0.0 }
 0x104   :  { %v1206_v29 = vpack.c.bf16 %v638_v23, %v637_v21  ;;  %v1286_v30 = vpack.c.bf16 %v670_v24, %v669_v22 }
 0x105   :  { %v1201_v31 = vpack.c.bf16 %v636_v27, %v635_v25  ;;  %v1281_v32 = vpack.c.bf16 %v668_v28, %v667_v26  ;;  %v1445_v33 = vpop.f32.mrb[8].mxu0  ;;  %v1477_v34 = vpop.f32.mrb[8].mxu1 }
 0x106   :  { %1350 = vst [vmem:[%s1863_s3 + $0x18] sm:$0xff] %v1206_v29   ;;  %1366 = vst [vmem:[%s1863_s3 + $0x98] sm:$0xff] %v1286_v30   ;;  %v417_v35 = vadd.f32 %v1445_v33, %v1698_v40  ;;  %v545_v36 = vadd.f32 %v1477_v34, %v1698_v40  ;;  %v408_v37 = vpop.f32.mrb[9].mxu0  ;;  %v536_v38 = vpop.f32.mrb[9].mxu1 }
 0x107   :  { %1349 = vst [vmem:[%s1863_s3 + $0x10] sm:$0xff] %v1201_v31   ;;  %1365 = vst [vmem:[%s1863_s3 + $0x90] sm:$0xff] %v1281_v32   ;;  %v409_v39 = vadd.f32 %v1698_v40, %v408_v37  ;;  %v537_v41 = vadd.f32 %v1698_v40, %v536_v38  ;;  %v1446_v42 = vpop.f32.mrb[10].mxu0  ;;  %v1478_v43 = vpop.f32.mrb[10].mxu1 }
 0x108   :  { %v420_v44 = vadd.f32 %v1446_v42, %v1698_v40  ;;  %v548_v45 = vadd.f32 %v1478_v43, %v1698_v40  ;;  %v411_v46 = vpop.f32.mrb[11].mxu0  ;;  %v539_v47 = vpop.f32.mrb[11].mxu1  ;;  %v641_v50 = vmax.f32 %v417_v35, 0.0  ;;  %v673_v51 = vmax.f32 %v545_v36, 0.0 }
 0x109   :  { %v412_v48 = vadd.f32 %v1698_v40, %v411_v46  ;;  %v540_v49 = vadd.f32 %v1698_v40, %v539_v47  ;;  %v639_v54 = vmax.f32 %v409_v39, 0.0  ;;  %v671_v55 = vmax.f32 %v537_v41, 0.0 }
 0x10a   :  { %v642_v52 = vmax.f32 %v420_v44, 0.0  ;;  %v674_v53 = vmax.f32 %v548_v45, 0.0 }
 0x10b   :  { %v640_v56 = vmax.f32 %v412_v48, 0.0  ;;  %v672_v57 = vmax.f32 %v540_v49, 0.0 }
 0x10c   :  { %v1216_v58 = vpack.c.bf16 %v642_v52, %v641_v50  ;;  %v1296_v59 = vpack.c.bf16 %v674_v53, %v673_v51 }
 0x10d   :  { %v1211_v60 = vpack.c.bf16 %v640_v56, %v639_v54  ;;  %v1291_v61 = vpack.c.bf16 %v672_v57, %v671_v55  ;;  %v1449_v62 = vpop.f32.mrb[12].mxu0  ;;  %v1481_v63 = vpop.f32.mrb[12].mxu1 }
 0x10e   :  { %1352 = vst [vmem:[%s1863_s3 + $0x28] sm:$0xff] %v1216_v58   ;;  %1368 = vst [vmem:[%s1863_s3 + $0xa8] sm:$0xff] %v1296_v59   ;;  %v433_v0 = vadd.f32 %v1449_v62, %v1698_v40  ;;  %v561_v1 = vadd.f32 %v1481_v63, %v1698_v40  ;;  %v424_v2 = vpop.f32.mrb[13].mxu0  ;;  %v552_v3 = vpop.f32.mrb[13].mxu1 }
 0x10f   :  { %1351 = vst [vmem:[%s1863_s3 + $0x20] sm:$0xff] %v1211_v60   ;;  %1367 = vst [vmem:[%s1863_s3 + $0xa0] sm:$0xff] %v1291_v61   ;;  %v425_v4 = vadd.f32 %v1698_v40, %v424_v2  ;;  %v553_v5 = vadd.f32 %v1698_v40, %v552_v3  ;;  %v1450_v6 = vpop.f32.mrb[14].mxu0  ;;  %v1482_v7 = vpop.f32.mrb[14].mxu1 }
 0x110   :  { %v436_v8 = vadd.f32 %v1450_v6, %v1698_v40  ;;  %v564_v9 = vadd.f32 %v1482_v7, %v1698_v40  ;;  %v427_v10 = vpop.f32.mrb[15].mxu0  ;;  %v555_v11 = vpop.f32.mrb[15].mxu1  ;;  %v645_v14 = vmax.f32 %v433_v0, 0.0  ;;  %v677_v15 = vmax.f32 %v561_v1, 0.0 }
 0x111   :  { %v428_v12 = vadd.f32 %v1698_v40, %v427_v10  ;;  %v556_v13 = vadd.f32 %v1698_v40, %v555_v11  ;;  %v643_v18 = vmax.f32 %v425_v4, 0.0  ;;  %v675_v19 = vmax.f32 %v553_v5, 0.0 }
 0x112   :  { %v646_v16 = vmax.f32 %v436_v8, 0.0  ;;  %v678_v17 = vmax.f32 %v564_v9, 0.0 }
 0x113   :  { %v644_v20 = vmax.f32 %v428_v12, 0.0  ;;  %v676_v21 = vmax.f32 %v556_v13, 0.0 }
 0x114   :  { %v1226_v22 = vpack.c.bf16 %v646_v16, %v645_v14  ;;  %v1306_v23 = vpack.c.bf16 %v678_v17, %v677_v15 }
 0x115   :  { %v1221_v24 = vpack.c.bf16 %v644_v20, %v643_v18  ;;  %v1301_v25 = vpack.c.bf16 %v676_v21, %v675_v19  ;;  %v1453_v26 = vpop.f32.mrb[16].mxu0  ;;  %v1485_v27 = vpop.f32.mrb[16].mxu1 }
 0x116   :  { %1354 = vst [vmem:[%s1863_s3 + $0x38] sm:$0xff] %v1226_v22   ;;  %1370 = vst [vmem:[%s1863_s3 + $0xb8] sm:$0xff] %v1306_v23   ;;  %v449_v28 = vadd.f32 %v1453_v26, %v1698_v40  ;;  %v577_v29 = vadd.f32 %v1485_v27, %v1698_v40  ;;  %v440_v30 = vpop.f32.mrb[17].mxu0  ;;  %v568_v31 = vpop.f32.mrb[17].mxu1 }
 0x117   :  { %1353 = vst [vmem:[%s1863_s3 + $0x30] sm:$0xff] %v1221_v24   ;;  %1369 = vst [vmem:[%s1863_s3 + $0xb0] sm:$0xff] %v1301_v25   ;;  %v441_v32 = vadd.f32 %v1698_v40, %v440_v30  ;;  %v569_v33 = vadd.f32 %v1698_v40, %v568_v31  ;;  %v1454_v34 = vpop.f32.mrb[18].mxu0  ;;  %v1486_v35 = vpop.f32.mrb[18].mxu1 }
 0x118   :  { %v452_v36 = vadd.f32 %v1454_v34, %v1698_v40  ;;  %v580_v37 = vadd.f32 %v1486_v35, %v1698_v40  ;;  %v443_v38 = vpop.f32.mrb[19].mxu0  ;;  %v571_v39 = vpop.f32.mrb[19].mxu1  ;;  %v649_v43 = vmax.f32 %v449_v28, 0.0  ;;  %v681_v44 = vmax.f32 %v577_v29, 0.0 }
 0x119   :  { %v444_v41 = vadd.f32 %v1698_v40, %v443_v38  ;;  %v572_v42 = vadd.f32 %v1698_v40, %v571_v39  ;;  %v647_v47 = vmax.f32 %v441_v32, 0.0  ;;  %v679_v48 = vmax.f32 %v569_v33, 0.0 }
 0x11a   :  { %v650_v45 = vmax.f32 %v452_v36, 0.0  ;;  %v682_v46 = vmax.f32 %v580_v37, 0.0 }
 0x11b   :  { %v648_v49 = vmax.f32 %v444_v41, 0.0  ;;  %v680_v50 = vmax.f32 %v572_v42, 0.0 }
 0x11c   :  { %v1236_v51 = vpack.c.bf16 %v650_v45, %v649_v43  ;;  %v1316_v52 = vpack.c.bf16 %v682_v46, %v681_v44 }
 0x11d   :  { %v1231_v53 = vpack.c.bf16 %v648_v49, %v647_v47  ;;  %v1311_v54 = vpack.c.bf16 %v680_v50, %v679_v48  ;;  %v1457_v55 = vpop.f32.mrb[20].mxu0  ;;  %v1489_v56 = vpop.f32.mrb[20].mxu1 }
 0x11e   :  { %1356 = vst [vmem:[%s1863_s3 + $0x48] sm:$0xff] %v1236_v51   ;;  %1372 = vst [vmem:[%s1863_s3 + $0xc8] sm:$0xff] %v1316_v52   ;;  %v465_v57 = vadd.f32 %v1457_v55, %v1698_v40  ;;  %v593_v58 = vadd.f32 %v1489_v56, %v1698_v40  ;;  %v456_v59 = vpop.f32.mrb[21].mxu0  ;;  %v584_v60 = vpop.f32.mrb[21].mxu1 }
 0x11f   :  { %1355 = vst [vmem:[%s1863_s3 + $0x40] sm:$0xff] %v1231_v53   ;;  %1371 = vst [vmem:[%s1863_s3 + $0xc0] sm:$0xff] %v1311_v54   ;;  %v457_v61 = vadd.f32 %v1698_v40, %v456_v59  ;;  %v585_v62 = vadd.f32 %v1698_v40, %v584_v60  ;;  %v1458_v63 = vpop.f32.mrb[22].mxu0  ;;  %v1490_v0 = vpop.f32.mrb[22].mxu1 }
 0x120   :  { %v468_v1 = vadd.f32 %v1458_v63, %v1698_v40  ;;  %v596_v2 = vadd.f32 %v1490_v0, %v1698_v40  ;;  %v459_v3 = vpop.f32.mrb[23].mxu0  ;;  %v587_v4 = vpop.f32.mrb[23].mxu1  ;;  %v653_v7 = vmax.f32 %v465_v57, 0.0  ;;  %v685_v8 = vmax.f32 %v593_v58, 0.0 }
 0x121   :  { %v460_v5 = vadd.f32 %v1698_v40, %v459_v3  ;;  %v588_v6 = vadd.f32 %v1698_v40, %v587_v4  ;;  %v651_v11 = vmax.f32 %v457_v61, 0.0  ;;  %v683_v12 = vmax.f32 %v585_v62, 0.0 }
 0x122   :  { %v654_v9 = vmax.f32 %v468_v1, 0.0  ;;  %v686_v10 = vmax.f32 %v596_v2, 0.0 }
 0x123   :  { %v652_v13 = vmax.f32 %v460_v5, 0.0  ;;  %v684_v14 = vmax.f32 %v588_v6, 0.0 }
 0x124   :  { %v1246_v15 = vpack.c.bf16 %v654_v9, %v653_v7  ;;  %v1326_v16 = vpack.c.bf16 %v686_v10, %v685_v8 }
 0x125   :  { %v1241_v17 = vpack.c.bf16 %v652_v13, %v651_v11  ;;  %v1321_v18 = vpack.c.bf16 %v684_v14, %v683_v12  ;;  %v1461_v19 = vpop.f32.mrb[24].mxu0  ;;  %v1493_v20 = vpop.f32.mrb[24].mxu1 }
 0x126   :  { %1358 = vst [vmem:[%s1863_s3 + $0x58] sm:$0xff] %v1246_v15   ;;  %1374 = vst [vmem:[%s1863_s3 + $0xd8] sm:$0xff] %v1326_v16   ;;  %v481_v21 = vadd.f32 %v1461_v19, %v1698_v40  ;;  %v609_v22 = vadd.f32 %v1493_v20, %v1698_v40  ;;  %v472_v23 = vpop.f32.mrb[25].mxu0  ;;  %v600_v24 = vpop.f32.mrb[25].mxu1 }
 0x127   :  { %1357 = vst [vmem:[%s1863_s3 + $0x50] sm:$0xff] %v1241_v17   ;;  %1373 = vst [vmem:[%s1863_s3 + $0xd0] sm:$0xff] %v1321_v18   ;;  %v473_v25 = vadd.f32 %v1698_v40, %v472_v23  ;;  %v601_v26 = vadd.f32 %v1698_v40, %v600_v24  ;;  %v1462_v27 = vpop.f32.mrb[26].mxu0  ;;  %v1494_v28 = vpop.f32.mrb[26].mxu1 }
 0x128   :  { %v484_v29 = vadd.f32 %v1462_v27, %v1698_v40  ;;  %v612_v30 = vadd.f32 %v1494_v28, %v1698_v40  ;;  %v475_v31 = vpop.f32.mrb[27].mxu0  ;;  %v603_v32 = vpop.f32.mrb[27].mxu1  ;;  %v657_v35 = vmax.f32 %v481_v21, 0.0  ;;  %v689_v36 = vmax.f32 %v609_v22, 0.0 }
 0x129   :  { %v476_v33 = vadd.f32 %v1698_v40, %v475_v31  ;;  %v604_v34 = vadd.f32 %v1698_v40, %v603_v32  ;;  %v655_v39 = vmax.f32 %v473_v25, 0.0  ;;  %v687_v41 = vmax.f32 %v601_v26, 0.0 }
 0x12a   :  { %v658_v37 = vmax.f32 %v484_v29, 0.0  ;;  %v690_v38 = vmax.f32 %v612_v30, 0.0 }
 0x12b   :  { %v656_v42 = vmax.f32 %v476_v33, 0.0  ;;  %v688_v43 = vmax.f32 %v604_v34, 0.0 }
 0x12c   :  { %v1256_v44 = vpack.c.bf16 %v658_v37, %v657_v35  ;;  %v1336_v45 = vpack.c.bf16 %v690_v38, %v689_v36 }
 0x12d   :  { %v1251_v46 = vpack.c.bf16 %v656_v42, %v655_v39  ;;  %v1331_v47 = vpack.c.bf16 %v688_v43, %v687_v41  ;;  %v1465_v48 = vpop.f32.mrb[28].mxu0  ;;  %v1497_v49 = vpop.f32.mrb[28].mxu1 }
 0x12e   :  { %1360 = vst [vmem:[%s1863_s3 + $0x68] sm:$0xff] %v1256_v44   ;;  %1376 = vst [vmem:[%s1863_s3 + $0xe8] sm:$0xff] %v1336_v45   ;;  %v497_v50 = vadd.f32 %v1465_v48, %v1698_v40  ;;  %v625_v51 = vadd.f32 %v1497_v49, %v1698_v40  ;;  %v488_v52 = vpop.f32.mrb[29].mxu0  ;;  %v616_v53 = vpop.f32.mrb[29].mxu1 }
 0x12f   :  { %1359 = vst [vmem:[%s1863_s3 + $0x60] sm:$0xff] %v1251_v46   ;;  %1375 = vst [vmem:[%s1863_s3 + $0xe0] sm:$0xff] %v1331_v47   ;;  %v489_v54 = vadd.f32 %v1698_v40, %v488_v52  ;;  %v617_v55 = vadd.f32 %v1698_v40, %v616_v53  ;;  %v1466_v56 = vpop.f32.mrb[30].mxu0  ;;  %v1498_v57 = vpop.f32.mrb[30].mxu1 }
 0x130   :  { %v500_v58 = vadd.f32 %v1466_v56, %v1698_v40  ;;  %v628_v59 = vadd.f32 %v1498_v57, %v1698_v40  ;;  %v491_v60 = vpop.f32.mrb[31].mxu0  ;;  %v619_v61 = vpop.f32.mrb[31].mxu1  ;;  %v661_v0 = vmax.f32 %v497_v50, 0.0  ;;  %v693_v1 = vmax.f32 %v625_v51, 0.0 }
 0x131   :  { %v492_v62 = vadd.f32 %v1698_v40, %v491_v60  ;;  %v620_v63 = vadd.f32 %v1698_v40, %v619_v61  ;;  %v659_v4 = vmax.f32 %v489_v54, 0.0  ;;  %v691_v5 = vmax.f32 %v617_v55, 0.0 }
 0x132   :  { %v662_v2 = vmax.f32 %v500_v58, 0.0  ;;  %v694_v3 = vmax.f32 %v628_v59, 0.0 }
 0x133   :  { %v660_v6 = vmax.f32 %v492_v62, 0.0  ;;  %v692_v7 = vmax.f32 %v620_v63, 0.0 }
 0x134   :  { %v1266_v8 = vpack.c.bf16 %v662_v2, %v661_v0  ;;  %v1346_v9 = vpack.c.bf16 %v694_v3, %v693_v1 }
 0x135   :  { %v1261_v10 = vpack.c.bf16 %v660_v6, %v659_v4  ;;  %v1341_v11 = vpack.c.bf16 %v692_v7, %v691_v5 }
 0x136   :  { %1362 = vst [vmem:[%s1863_s3 + $0x78] sm:$0xff] %v1266_v8   ;;  %1378 = vst [vmem:[%s1863_s3 + $0xf8] sm:$0xff] %v1346_v9  }
 0x137   :  { %1361 = vst [vmem:[%s1863_s3 + $0x70] sm:$0xff] %v1261_v10   ;;  %1377 = vst [vmem:[%s1863_s3 + $0xf0] sm:$0xff] %v1341_v11  }

// kernel: forward.9
= control target key start
LH: loop header
LB: loop body
LE: loop exit
PB: predicated region body
PF: predicated region fallthrough
CT: control target
= control target key end

     0   :  { %v1756_v0 = vmov 0   ;;  %s2214_s1 = inlined_call_operand.vmem [shape: bf16[256,128], index: 1, kind: input, shape index: {}]   ;;  %s2215_s0 = inlined_call_operand.vmem [shape: bf16[512,256], index: 0, kind: input, shape index: {}]   ;;  %s2216_s2 = inlined_call_operand.vmem [shape: f32[1,128], index: 2, kind: input, shape index: {}]   ;;  %s2217_s3 = inlined_call_operand.vmem [shape: bf16[512,128], index: 3, kind: output, shape index: {}]  }
   0x1   :  { %534 = vmatprep.subr.bf16.mxu0 %v1756_v0  ;;  %1611 = vmatprep.subr.bf16.mxu1 %v1756_v0  ;;  %v1644_v1 = vld [vmem:[%s2214_s1] sm:$0xff]   ;;  %v1645_v2 = vld [vmem:[%s2214_s1 + $0x8] sm:$0xff]   ;;  %v1646_v3 = vld [vmem:[%s2214_s1 + $0x10] sm:$0xff]  }
   0x2   :  { %535 = vmatpush1.bf16.msra.mxu0 %v1644_v1  ;;  %1627 = vmatpush1.bf16.msra.mxu1 %v1644_v1  ;;  %v1647_v4 = vld [vmem:[%s2214_s1 + $0x18] sm:$0xff]   ;;  %v1648_v5 = vld [vmem:[%s2214_s1 + $0x20] sm:$0xff]   ;;  %v1649_v7 = vld [vmem:[%s2214_s1 + $0x28] sm:$0xff]  }
   0x3   :  { %536 = vmatprep.subr.bf16.mxu0 %v1756_v0  ;;  %1612 = vmatprep.subr.bf16.mxu1 %v1756_v0  ;;  %v1662_v6 = vld [vmem:[%s2215_s0 + $0x4] ss:$8 sps:$4 sm:$0xff]   ;;  %v1650_v9 = vld [vmem:[%s2214_s1 + $0x30] sm:$0xff]   ;;  %v1651_v10 = vld [vmem:[%s2214_s1 + $0x38] sm:$0xff]  }
   0x4   :  { %v1665_v8 = vld [vmem:[%s2215_s0 + $0x104] ss:$8 sps:$4 sm:$0xff]   ;;  %566 = vmatprep.mubr.bf16.mxu0 %v1662_v6  ;;  %v1654_v13 = vld [vmem:[%s2214_s1 + $0x50] sm:$0xff]   ;;  %v1655_v14 = vld [vmem:[%s2214_s1 + $0x58] sm:$0xff]  }
   0x5   :  { %694 = vmatprep.mubr.bf16.mxu1 %v1665_v8  ;;  %v1652_v11 = vld [vmem:[%s2214_s1 + $0x40] sm:$0xff]   ;;  %v1653_v12 = vld [vmem:[%s2214_s1 + $0x48] sm:$0xff]   ;;  %v1658_v17 = vld [vmem:[%s2214_s1 + $0x70] sm:$0xff]  }
   0x6   :  { %537 = vmatpush1.bf16.msra.mxu0 %v1645_v2  ;;  %1628 = vmatpush1.bf16.msra.mxu1 %v1645_v2  ;;  %v1656_v15 = vld [vmem:[%s2214_s1 + $0x60] sm:$0xff]   ;;  %v1657_v16 = vld [vmem:[%s2214_s1 + $0x68] sm:$0xff]   ;;  %v1659_v18 = vld [vmem:[%s2214_s1 + $0x78] sm:$0xff]  }
   0x7   :  { %538 = vmatprep.subr.bf16.mxu0 %v1756_v0  ;;  %1613 = vmatprep.subr.bf16.mxu1 %v1756_v0  ;;  %v1660_v19 = vld [vmem:[%s2215_s0] ss:$8 sps:$4 sm:$0xff]   ;;  %v1666_v21 = vld [vmem:[%s2215_s0 + $0x14] ss:$8 sps:$4 sm:$0xff]   ;;  %v1670_v23 = vld [vmem:[%s2215_s0 + $0x10] ss:$8 sps:$4 sm:$0xff]  }
   0x8   :  { %v1663_v20 = vld [vmem:[%s2215_s0 + $0x100] ss:$8 sps:$4 sm:$0xff]   ;;  %v1668_v22 = vld [vmem:[%s2215_s0 + $0x114] ss:$8 sps:$4 sm:$0xff]   ;;  %v1671_v24 = vld [vmem:[%s2215_s0 + $0x110] ss:$8 sps:$4 sm:$0xff]  }
   0x9   :  { %v1672_v25 = vld [vmem:[%s2215_s0 + $0x24] ss:$8 sps:$4 sm:$0xff]   ;;  %v1676_v27 = vld [vmem:[%s2215_s0 + $0x20] ss:$8 sps:$4 sm:$0xff]   ;;  %v1678_v29 = vld [vmem:[%s2215_s0 + $0x34] ss:$8 sps:$4 sm:$0xff]  }
   0xa   :  { %539 = vmatpush1.bf16.msra.mxu0 %v1646_v3  ;;  %1629 = vmatpush1.bf16.msra.mxu1 %v1646_v3  ;;  %v1674_v26 = vld [vmem:[%s2215_s0 + $0x124] ss:$8 sps:$4 sm:$0xff]   ;;  %v1677_v28 = vld [vmem:[%s2215_s0 + $0x120] ss:$8 sps:$4 sm:$0xff]   ;;  %v1680_v30 = vld [vmem:[%s2215_s0 + $0x134] ss:$8 sps:$4 sm:$0xff]  }
   0xb   :  { %540 = vmatprep.subr.bf16.mxu0 %v1756_v0  ;;  %1614 = vmatprep.subr.bf16.mxu1 %v1756_v0  ;;  %v1682_v31 = vld [vmem:[%s2215_s0 + $0x30] ss:$8 sps:$4 sm:$0xff]   ;;  %v1684_v33 = vld [vmem:[%s2215_s0 + $0x44] ss:$8 sps:$4 sm:$0xff]   ;;  %v1688_v35 = vld [vmem:[%s2215_s0 + $0x40] ss:$8 sps:$4 sm:$0xff]  }
   0xc   :  { %v1683_v32 = vld [vmem:[%s2215_s0 + $0x130] ss:$8 sps:$4 sm:$0xff]   ;;  %v1686_v34 = vld [vmem:[%s2215_s0 + $0x144] ss:$8 sps:$4 sm:$0xff]   ;;  %v1689_v36 = vld [vmem:[%s2215_s0 + $0x140] ss:$8 sps:$4 sm:$0xff]  }
   0xd   :  { %v1690_v37 = vld [vmem:[%s2215_s0 + $0x54] ss:$8 sps:$4 sm:$0xff]   ;;  %v1694_v39 = vld [vmem:[%s2215_s0 + $0x50] ss:$8 sps:$4 sm:$0xff]   ;;  %v1696_v41 = vld [vmem:[%s2215_s0 + $0x64] ss:$8 sps:$4 sm:$0xff]  }
   0xe   :  { %541 = vmatpush1.bf16.msra.mxu0 %v1647_v4  ;;  %1630 = vmatpush1.bf16.msra.mxu1 %v1647_v4  ;;  %v1692_v38 = vld [vmem:[%s2215_s0 + $0x154] ss:$8 sps:$4 sm:$0xff]   ;;  %v1695_v40 = vld [vmem:[%s2215_s0 + $0x150] ss:$8 sps:$4 sm:$0xff]   ;;  %v1698_v42 = vld [vmem:[%s2215_s0 + $0x164] ss:$8 sps:$4 sm:$0xff]  }
   0xf   :  { %542 = vmatprep.subr.bf16.mxu0 %v1756_v0  ;;  %1615 = vmatprep.subr.bf16.mxu1 %v1756_v0  ;;  %v1700_v43 = vld [vmem:[%s2215_s0 + $0x60] ss:$8 sps:$4 sm:$0xff]   ;;  %v1702_v45 = vld [vmem:[%s2215_s0 + $0x74] ss:$8 sps:$4 sm:$0xff]   ;;  %v1706_v47 = vld [vmem:[%s2215_s0 + $0x70] ss:$8 sps:$4 sm:$0xff]  }
  0x10   :  { %v1701_v44 = vld [vmem:[%s2215_s0 + $0x160] ss:$8 sps:$4 sm:$0xff]   ;;  %v1704_v46 = vld [vmem:[%s2215_s0 + $0x174] ss:$8 sps:$4 sm:$0xff]   ;;  %v1707_v48 = vld [vmem:[%s2215_s0 + $0x170] ss:$8 sps:$4 sm:$0xff]  }
  0x11   :  { %v1708_v49 = vld [vmem:[%s2215_s0 + $0x84] ss:$8 sps:$4 sm:$0xff]   ;;  %v1712_v51 = vld [vmem:[%s2215_s0 + $0x80] ss:$8 sps:$4 sm:$0xff]   ;;  %v1714_v53 = vld [vmem:[%s2215_s0 + $0x94] ss:$8 sps:$4 sm:$0xff]  }
  0x12   :  { %543 = vmatpush1.bf16.msra.mxu0 %v1648_v5  ;;  %1631 = vmatpush1.bf16.msra.mxu1 %v1648_v5  ;;  %v1710_v50 = vld [vmem:[%s2215_s0 + $0x184] ss:$8 sps:$4 sm:$0xff]   ;;  %v1713_v52 = vld [vmem:[%s2215_s0 + $0x180] ss:$8 sps:$4 sm:$0xff]   ;;  %v1716_v54 = vld [vmem:[%s2215_s0 + $0x194] ss:$8 sps:$4 sm:$0xff]  }
  0x13   :  { %544 = vmatprep.subr.bf16.mxu0 %v1756_v0  ;;  %1616 = vmatprep.subr.bf16.mxu1 %v1756_v0  ;;  %v1718_v55 = vld [vmem:[%s2215_s0 + $0x90] ss:$8 sps:$4 sm:$0xff]   ;;  %v1720_v57 = vld [vmem:[%s2215_s0 + $0xa4] ss:$8 sps:$4 sm:$0xff]   ;;  %v1724_v59 = vld [vmem:[%s2215_s0 + $0xa0] ss:$8 sps:$4 sm:$0xff]  }
  0x14   :  { %v1719_v56 = vld [vmem:[%s2215_s0 + $0x190] ss:$8 sps:$4 sm:$0xff]   ;;  %v1722_v58 = vld [vmem:[%s2215_s0 + $0x1a4] ss:$8 sps:$4 sm:$0xff]   ;;  %v1725_v60 = vld [vmem:[%s2215_s0 + $0x1a0] ss:$8 sps:$4 sm:$0xff]  }
  0x15   :  { %v1726_v61 = vld [vmem:[%s2215_s0 + $0xb4] ss:$8 sps:$4 sm:$0xff]   ;;  %v1730_v63 = vld [vmem:[%s2215_s0 + $0xb0] ss:$8 sps:$4 sm:$0xff]   ;;  %v1732_v1 = vld [vmem:[%s2215_s0 + $0xc4] ss:$8 sps:$4 sm:$0xff]  }
  0x16   :  { %545 = vmatpush1.bf16.msra.mxu0 %v1649_v7  ;;  %1632 = vmatpush1.bf16.msra.mxu1 %v1649_v7  ;;  %v1728_v62 = vld [vmem:[%s2215_s0 + $0x1b4] ss:$8 sps:$4 sm:$0xff]   ;;  %v1734_v2 = vld [vmem:[%s2215_s0 + $0x1c4] ss:$8 sps:$4 sm:$0xff]   ;;  %v1736_v3 = vld [vmem:[%s2215_s0 + $0xc0] ss:$8 sps:$4 sm:$0xff]  }
  0x17   :  { %546 = vmatprep.subr.bf16.mxu0 %v1756_v0  ;;  %1617 = vmatprep.subr.bf16.mxu1 %v1756_v0  ;;  %v1737_v4 = vld [vmem:[%s2215_s0 + $0x1c0] ss:$8 sps:$4 sm:$0xff]   ;;  %v1738_v5 = vld [vmem:[%s2215_s0 + $0xd4] ss:$8 sps:$4 sm:$0xff]   ;;  %v1742_v7 = vld [vmem:[%s2215_s0 + $0xd0] ss:$8 sps:$4 sm:$0xff]  }
  0x18   :  { %v1740_v6 = vld [vmem:[%s2215_s0 + $0x1d4] ss:$8 sps:$4 sm:$0xff]   ;;  %v1743_v8 = vld [vmem:[%s2215_s0 + $0x1d0] ss:$8 sps:$4 sm:$0xff]  }
  0x1a   :  { %547 = vmatpush1.bf16.msra.mxu0 %v1650_v9  ;;  %1633 = vmatpush1.bf16.msra.mxu1 %v1650_v9  ;;  %v1744_v9 = vld [vmem:[%s2215_s0 + $0xe4] ss:$8 sps:$4 sm:$0xff]  }
  0x1b   :  { %548 = vmatprep.subr.bf16.mxu0 %v1756_v0  ;;  %1618 = vmatprep.subr.bf16.mxu1 %v1756_v0 }
  0x1e   :  { %549 = vmatpush1.bf16.msra.mxu0 %v1651_v10  ;;  %1634 = vmatpush1.bf16.msra.mxu1 %v1651_v10  ;;  %v1746_v10 = vld [vmem:[%s2215_s0 + $0x1e4] ss:$8 sps:$4 sm:$0xff]  }
  0x1f   :  { %550 = vmatprep.subr.bf16.mxu0 %v1756_v0  ;;  %1619 = vmatprep.subr.bf16.mxu1 %v1756_v0 }
  0x22   :  { %551 = vmatpush1.bf16.msra.mxu0 %v1652_v11  ;;  %1635 = vmatpush1.bf16.msra.mxu1 %v1652_v11  ;;  %v1748_v11 = vld [vmem:[%s2215_s0 + $0xe0] ss:$8 sps:$4 sm:$0xff]  }
  0x23   :  { %552 = vmatprep.subr.bf16.mxu0 %v1756_v0  ;;  %1620 = vmatprep.subr.bf16.mxu1 %v1756_v0 }
  0x26   :  { %553 = vmatpush1.bf16.msra.mxu0 %v1653_v12  ;;  %1636 = vmatpush1.bf16.msra.mxu1 %v1653_v12  ;;  %v1749_v12 = vld [vmem:[%s2215_s0 + $0x1e0] ss:$8 sps:$4 sm:$0xff]  }
  0x27   :  { %554 = vmatprep.subr.bf16.mxu0 %v1756_v0  ;;  %1621 = vmatprep.subr.bf16.mxu1 %v1756_v0 }
  0x2a   :  { %555 = vmatpush1.bf16.msra.mxu0 %v1654_v13  ;;  %1637 = vmatpush1.bf16.msra.mxu1 %v1654_v13  ;;  %v1750_v13 = vld [vmem:[%s2215_s0 + $0xf4] ss:$8 sps:$4 sm:$0xff]  }
  0x2b   :  { %556 = vmatprep.subr.bf16.mxu0 %v1756_v0  ;;  %1622 = vmatprep.subr.bf16.mxu1 %v1756_v0 }
  0x2e   :  { %557 = vmatpush1.bf16.msra.mxu0 %v1655_v14  ;;  %1638 = vmatpush1.bf16.msra.mxu1 %v1655_v14  ;;  %v1752_v14 = vld [vmem:[%s2215_s0 + $0x1f4] ss:$8 sps:$4 sm:$0xff]  }
  0x2f   :  { %558 = vmatprep.subr.bf16.mxu0 %v1756_v0  ;;  %1623 = vmatprep.subr.bf16.mxu1 %v1756_v0 }
  0x32   :  { %559 = vmatpush1.bf16.msra.mxu0 %v1656_v15  ;;  %1639 = vmatpush1.bf16.msra.mxu1 %v1656_v15  ;;  %v1754_v15 = vld [vmem:[%s2215_s0 + $0xf0] ss:$8 sps:$4 sm:$0xff]  }
  0x33   :  { %560 = vmatprep.subr.bf16.mxu0 %v1756_v0  ;;  %1624 = vmatprep.subr.bf16.mxu1 %v1756_v0 }
  0x36   :  { %561 = vmatpush1.bf16.msra.mxu0 %v1657_v16  ;;  %1640 = vmatpush1.bf16.msra.mxu1 %v1657_v16  ;;  %v1755_v16 = vld [vmem:[%s2215_s0 + $0x1f0] ss:$8 sps:$4 sm:$0xff]  }
  0x37   :  { %562 = vmatprep.subr.bf16.mxu0 %v1756_v0  ;;  %1625 = vmatprep.subr.bf16.mxu1 %v1756_v0 }
  0x3a   :  { %563 = vmatpush1.bf16.msra.mxu0 %v1658_v17  ;;  %1641 = vmatpush1.bf16.msra.mxu1 %v1658_v17  ;;  %v2052_v17 = vld [vmem:[%s2216_s2] ss:$0 sm:$0xff] }
  0x3b   :  { %564 = vmatprep.subr.bf16.mxu0 %v1756_v0  ;;  %1626 = vmatprep.subr.bf16.mxu1 %v1756_v0  ;;  %v1731_v0 = vld [vmem:[%s2215_s0 + $0x1b0] ss:$8 sps:$4 sm:$0xff]  }
  0x3e   :  { %565 = vmatpush1.bf16.msra.mxu0 %v1659_v18  ;;  %1642 = vmatpush1.bf16.msra.mxu1 %v1659_v18 }
  0x41   :  { %567 = vmatmul.mubr.bf16.vlgmr.msra.gmra.mrb[0].mxu0 %v1660_v19  ;;  %695 = vmatmul.mubr.bf16.vlgmr.msra.gmra.mrb[0].mxu1 %v1663_v20 }
  0x42   :  { %574 = vmatprep.mubr.bf16.mxu0 %v1666_v21  ;;  %702 = vmatprep.mubr.bf16.mxu1 %v1668_v22 }
  0x49   :  { %575 = vmatmul.mubr.bf16.gmra.mrb[4].mxu0 %v1670_v23  ;;  %703 = vmatmul.mubr.bf16.gmra.mrb[4].mxu1 %v1671_v24 }
  0x4a   :  { %582 = vmatprep.mubr.bf16.mxu0 %v1672_v25  ;;  %710 = vmatprep.mubr.bf16.mxu1 %v1674_v26 }
  0x51   :  { %583 = vmatmul.mubr.bf16.gmra.mrb[8].mxu0 %v1676_v27  ;;  %711 = vmatmul.mubr.bf16.gmra.mrb[8].mxu1 %v1677_v28 }
  0x52   :  { %590 = vmatprep.mubr.bf16.mxu0 %v1678_v29  ;;  %718 = vmatprep.mubr.bf16.mxu1 %v1680_v30 }
  0x59   :  { %591 = vmatmul.mubr.bf16.gmra.mrb[12].mxu0 %v1682_v31  ;;  %719 = vmatmul.mubr.bf16.gmra.mrb[12].mxu1 %v1683_v32 }
  0x5a   :  { %598 = vmatprep.mubr.bf16.mxu0 %v1684_v33  ;;  %726 = vmatprep.mubr.bf16.mxu1 %v1686_v34 }
  0x61   :  { %599 = vmatmul.mubr.bf16.gmra.mrb[16].mxu0 %v1688_v35  ;;  %727 = vmatmul.mubr.bf16.gmra.mrb[16].mxu1 %v1689_v36 }
  0x62   :  { %606 = vmatprep.mubr.bf16.mxu0 %v1690_v37  ;;  %734 = vmatprep.mubr.bf16.mxu1 %v1692_v38 }
  0x69   :  { %607 = vmatmul.mubr.bf16.gmra.mrb[20].mxu0 %v1694_v39  ;;  %735 = vmatmul.mubr.bf16.gmra.mrb[20].mxu1 %v1695_v40 }
  0x6a   :  { %614 = vmatprep.mubr.bf16.mxu0 %v1696_v41  ;;  %742 = vmatprep.mubr.bf16.mxu1 %v1698_v42 }
  0x71   :  { %615 = vmatmul.mubr.bf16.gmra.mrb[24].mxu0 %v1700_v43  ;;  %743 = vmatmul.mubr.bf16.gmra.mrb[24].mxu1 %v1701_v44 }
  0x72   :  { %622 = vmatprep.mubr.bf16.mxu0 %v1702_v45  ;;  %750 = vmatprep.mubr.bf16.mxu1 %v1704_v46 }
  0x79   :  { %623 = vmatmul.mubr.bf16.gmra.mrb[28].mxu0 %v1706_v47  ;;  %751 = vmatmul.mubr.bf16.gmra.mrb[28].mxu1 %v1707_v48 }
  0x7a   :  { %630 = vmatprep.mubr.bf16.mxu0 %v1708_v49  ;;  %758 = vmatprep.mubr.bf16.mxu1 %v1710_v50 }
  0x81   :  { %631 = vmatmul.mubr.bf16.gmra.mrb[32].mxu0 %v1712_v51  ;;  %759 = vmatmul.mubr.bf16.gmra.mrb[32].mxu1 %v1713_v52 }
  0x82   :  { %638 = vmatprep.mubr.bf16.mxu0 %v1714_v53  ;;  %766 = vmatprep.mubr.bf16.mxu1 %v1716_v54 }
  0x89   :  { %639 = vmatmul.mubr.bf16.gmra.mrb[36].mxu0 %v1718_v55  ;;  %767 = vmatmul.mubr.bf16.gmra.mrb[36].mxu1 %v1719_v56 }
  0x8a   :  { %646 = vmatprep.mubr.bf16.mxu0 %v1720_v57  ;;  %774 = vmatprep.mubr.bf16.mxu1 %v1722_v58 }
  0x91   :  { %647 = vmatmul.mubr.bf16.gmra.mrb[40].mxu0 %v1724_v59  ;;  %775 = vmatmul.mubr.bf16.gmra.mrb[40].mxu1 %v1725_v60 }
  0x92   :  { %654 = vmatprep.mubr.bf16.mxu0 %v1726_v61  ;;  %782 = vmatprep.mubr.bf16.mxu1 %v1728_v62 }
  0x99   :  { %655 = vmatmul.mubr.bf16.gmra.mrb[44].mxu0 %v1730_v63  ;;  %783 = vmatmul.mubr.bf16.gmra.mrb[44].mxu1 %v1731_v0 }
  0x9a   :  { %662 = vmatprep.mubr.bf16.mxu0 %v1732_v1  ;;  %790 = vmatprep.mubr.bf16.mxu1 %v1734_v2 }
  0xa1   :  { %663 = vmatmul.mubr.bf16.gmra.mrb[48].mxu0 %v1736_v3  ;;  %791 = vmatmul.mubr.bf16.gmra.mrb[48].mxu1 %v1737_v4 }
  0xa2   :  { %670 = vmatprep.mubr.bf16.mxu0 %v1738_v5  ;;  %798 = vmatprep.mubr.bf16.mxu1 %v1740_v6 }
  0xa9   :  { %671 = vmatmul.mubr.bf16.gmra.mrb[52].mxu0 %v1742_v7  ;;  %799 = vmatmul.mubr.bf16.gmra.mrb[52].mxu1 %v1743_v8 }
  0xaa   :  { %678 = vmatprep.mubr.bf16.mxu0 %v1744_v9  ;;  %806 = vmatprep.mubr.bf16.mxu1 %v1746_v10 }
  0xb1   :  { %679 = vmatmul.mubr.bf16.gmra.mrb[56].mxu0 %v1748_v11  ;;  %807 = vmatmul.mubr.bf16.gmra.mrb[56].mxu1 %v1749_v12 }
  0xb2   :  { %686 = vmatprep.mubr.bf16.mxu0 %v1750_v13  ;;  %814 = vmatprep.mubr.bf16.mxu1 %v1752_v14 }
  0xb9   :  { %687 = vmatmul.mubr.bf16.gmra.mrb[60].mxu0 %v1754_v15  ;;  %815 = vmatmul.mubr.bf16.gmra.mrb[60].mxu1 %v1755_v16 }
 0x114   :  { %v568_v18 = vpop.f32.mrb[0].mxu0  ;;  %v696_v19 = vpop.f32.mrb[0].mxu1 }
 0x115   :  { %v569_v20 = vadd.f32 %v2052_v17, %v568_v18  ;;  %v697_v21 = vadd.f32 %v2052_v17, %v696_v19  ;;  %v570_v22 = vpop.f32.mrb[1].mxu0  ;;  %v698_v23 = vpop.f32.mrb[1].mxu1 }
 0x116   :  { %v571_v24 = vpop.f32.mrb[2].mxu0  ;;  %v699_v25 = vpop.f32.mrb[2].mxu1 }
 0x117   :  { %v572_v26 = vadd.f32 %v2052_v17, %v571_v24  ;;  %v700_v27 = vadd.f32 %v2052_v17, %v699_v25  ;;  %v573_v28 = vpop.f32.mrb[3].mxu0  ;;  %v701_v29 = vpop.f32.mrb[3].mxu1  ;;  %v823_v30 = vmax.f32 %v569_v20, 0.0  ;;  %v855_v31 = vmax.f32 %v697_v21, 0.0 }
 0x119   :  { %v824_v32 = vmax.f32 %v572_v26, 0.0  ;;  %v856_v33 = vmax.f32 %v700_v27, 0.0 }
 0x11b   :  { %v1423_v34 = vpack.c.bf16 %v824_v32, %v823_v30  ;;  %v1503_v35 = vpack.c.bf16 %v856_v33, %v855_v31 }
 0x11c   :  { %v576_v36 = vpop.f32.mrb[4].mxu0  ;;  %v704_v37 = vpop.f32.mrb[4].mxu1 }
 0x11d   :  { %1424 = vst [vmem:[%s2217_s3] sm:$0xff] %v1423_v34   ;;  %1595 = vst [vmem:[%s2217_s3 + $0x80] sm:$0xff] %v1503_v35   ;;  %v577_v38 = vadd.f32 %v2052_v17, %v576_v36  ;;  %v705_v39 = vadd.f32 %v2052_v17, %v704_v37  ;;  %v578_v40 = vpop.f32.mrb[5].mxu0  ;;  %v706_v41 = vpop.f32.mrb[5].mxu1 }
 0x11e   :  { %v579_v42 = vpop.f32.mrb[6].mxu0  ;;  %v707_v43 = vpop.f32.mrb[6].mxu1 }
 0x11f   :  { %v580_v44 = vadd.f32 %v2052_v17, %v579_v42  ;;  %v708_v45 = vadd.f32 %v2052_v17, %v707_v43  ;;  %v581_v46 = vpop.f32.mrb[7].mxu0  ;;  %v709_v47 = vpop.f32.mrb[7].mxu1  ;;  %v825_v48 = vmax.f32 %v577_v38, 0.0  ;;  %v857_v49 = vmax.f32 %v705_v39, 0.0 }
 0x121   :  { %v826_v50 = vmax.f32 %v580_v44, 0.0  ;;  %v858_v51 = vmax.f32 %v708_v45, 0.0 }
 0x123   :  { %v1428_v52 = vpack.c.bf16 %v826_v50, %v825_v48  ;;  %v1508_v53 = vpack.c.bf16 %v858_v51, %v857_v49 }
 0x124   :  { %v584_v54 = vpop.f32.mrb[8].mxu0  ;;  %v712_v55 = vpop.f32.mrb[8].mxu1 }
 0x125   :  { %1580 = vst [vmem:[%s2217_s3 + $0x8] sm:$0xff] %v1428_v52   ;;  %1596 = vst [vmem:[%s2217_s3 + $0x88] sm:$0xff] %v1508_v53   ;;  %v585_v56 = vadd.f32 %v2052_v17, %v584_v54  ;;  %v713_v57 = vadd.f32 %v2052_v17, %v712_v55  ;;  %v586_v58 = vpop.f32.mrb[9].mxu0  ;;  %v714_v59 = vpop.f32.mrb[9].mxu1 }
 0x126   :  { %v587_v60 = vpop.f32.mrb[10].mxu0  ;;  %v715_v61 = vpop.f32.mrb[10].mxu1 }
 0x127   :  { %v588_v62 = vadd.f32 %v2052_v17, %v587_v60  ;;  %v716_v63 = vadd.f32 %v2052_v17, %v715_v61  ;;  %v589_v0 = vpop.f32.mrb[11].mxu0  ;;  %v717_v1 = vpop.f32.mrb[11].mxu1  ;;  %v827_v2 = vmax.f32 %v585_v56, 0.0  ;;  %v859_v3 = vmax.f32 %v713_v57, 0.0 }
 0x129   :  { %v828_v4 = vmax.f32 %v588_v62, 0.0  ;;  %v860_v5 = vmax.f32 %v716_v63, 0.0 }
 0x12b   :  { %v1433_v6 = vpack.c.bf16 %v828_v4, %v827_v2  ;;  %v1513_v7 = vpack.c.bf16 %v860_v5, %v859_v3 }
 0x12c   :  { %v592_v8 = vpop.f32.mrb[12].mxu0  ;;  %v720_v9 = vpop.f32.mrb[12].mxu1 }
 0x12d   :  { %1581 = vst [vmem:[%s2217_s3 + $0x10] sm:$0xff] %v1433_v6   ;;  %1597 = vst [vmem:[%s2217_s3 + $0x90] sm:$0xff] %v1513_v7   ;;  %v593_v10 = vadd.f32 %v2052_v17, %v592_v8  ;;  %v721_v11 = vadd.f32 %v2052_v17, %v720_v9  ;;  %v594_v12 = vpop.f32.mrb[13].mxu0  ;;  %v722_v13 = vpop.f32.mrb[13].mxu1 }
 0x12e   :  { %v595_v14 = vpop.f32.mrb[14].mxu0  ;;  %v723_v15 = vpop.f32.mrb[14].mxu1 }
 0x12f   :  { %v596_v16 = vadd.f32 %v2052_v17, %v595_v14  ;;  %v724_v18 = vadd.f32 %v2052_v17, %v723_v15  ;;  %v597_v19 = vpop.f32.mrb[15].mxu0  ;;  %v725_v20 = vpop.f32.mrb[15].mxu1  ;;  %v829_v21 = vmax.f32 %v593_v10, 0.0  ;;  %v861_v22 = vmax.f32 %v721_v11, 0.0 }
 0x131   :  { %v830_v23 = vmax.f32 %v596_v16, 0.0  ;;  %v862_v24 = vmax.f32 %v724_v18, 0.0 }
 0x133   :  { %v1438_v25 = vpack.c.bf16 %v830_v23, %v829_v21  ;;  %v1518_v26 = vpack.c.bf16 %v862_v24, %v861_v22 }
 0x134   :  { %v600_v27 = vpop.f32.mrb[16].mxu0  ;;  %v728_v28 = vpop.f32.mrb[16].mxu1 }
 0x135   :  { %1582 = vst [vmem:[%s2217_s3 + $0x18] sm:$0xff] %v1438_v25   ;;  %1598 = vst [vmem:[%s2217_s3 + $0x98] sm:$0xff] %v1518_v26   ;;  %v601_v29 = vadd.f32 %v2052_v17, %v600_v27  ;;  %v729_v30 = vadd.f32 %v2052_v17, %v728_v28  ;;  %v602_v31 = vpop.f32.mrb[17].mxu0  ;;  %v730_v32 = vpop.f32.mrb[17].mxu1 }
 0x136   :  { %v603_v33 = vpop.f32.mrb[18].mxu0  ;;  %v731_v34 = vpop.f32.mrb[18].mxu1 }
 0x137   :  { %v604_v35 = vadd.f32 %v2052_v17, %v603_v33  ;;  %v732_v36 = vadd.f32 %v2052_v17, %v731_v34  ;;  %v605_v37 = vpop.f32.mrb[19].mxu0  ;;  %v733_v38 = vpop.f32.mrb[19].mxu1  ;;  %v831_v39 = vmax.f32 %v601_v29, 0.0  ;;  %v863_v40 = vmax.f32 %v729_v30, 0.0 }
 0x139   :  { %v832_v41 = vmax.f32 %v604_v35, 0.0  ;;  %v864_v42 = vmax.f32 %v732_v36, 0.0 }
 0x13b   :  { %v1443_v43 = vpack.c.bf16 %v832_v41, %v831_v39  ;;  %v1523_v44 = vpack.c.bf16 %v864_v42, %v863_v40 }
 0x13c   :  { %v608_v45 = vpop.f32.mrb[20].mxu0  ;;  %v736_v46 = vpop.f32.mrb[20].mxu1 }
 0x13d   :  { %1583 = vst [vmem:[%s2217_s3 + $0x20] sm:$0xff] %v1443_v43   ;;  %1599 = vst [vmem:[%s2217_s3 + $0xa0] sm:$0xff] %v1523_v44   ;;  %v609_v47 = vadd.f32 %v2052_v17, %v608_v45  ;;  %v737_v48 = vadd.f32 %v2052_v17, %v736_v46  ;;  %v610_v49 = vpop.f32.mrb[21].mxu0  ;;  %v738_v50 = vpop.f32.mrb[21].mxu1 }
 0x13e   :  { %v611_v51 = vpop.f32.mrb[22].mxu0  ;;  %v739_v52 = vpop.f32.mrb[22].mxu1 }
 0x13f   :  { %v612_v53 = vadd.f32 %v2052_v17, %v611_v51  ;;  %v740_v54 = vadd.f32 %v2052_v17, %v739_v52  ;;  %v613_v55 = vpop.f32.mrb[23].mxu0  ;;  %v741_v56 = vpop.f32.mrb[23].mxu1  ;;  %v833_v57 = vmax.f32 %v609_v47, 0.0  ;;  %v865_v58 = vmax.f32 %v737_v48, 0.0 }
 0x141   :  { %v834_v59 = vmax.f32 %v612_v53, 0.0  ;;  %v866_v60 = vmax.f32 %v740_v54, 0.0 }
 0x143   :  { %v1448_v61 = vpack.c.bf16 %v834_v59, %v833_v57  ;;  %v1528_v62 = vpack.c.bf16 %v866_v60, %v865_v58 }
 0x144   :  { %v616_v63 = vpop.f32.mrb[24].mxu0  ;;  %v744_v0 = vpop.f32.mrb[24].mxu1 }
 0x145   :  { %1584 = vst [vmem:[%s2217_s3 + $0x28] sm:$0xff] %v1448_v61   ;;  %1600 = vst [vmem:[%s2217_s3 + $0xa8] sm:$0xff] %v1528_v62   ;;  %v617_v1 = vadd.f32 %v2052_v17, %v616_v63  ;;  %v745_v2 = vadd.f32 %v2052_v17, %v744_v0  ;;  %v618_v3 = vpop.f32.mrb[25].mxu0  ;;  %v746_v4 = vpop.f32.mrb[25].mxu1 }
 0x146   :  { %v619_v5 = vpop.f32.mrb[26].mxu0  ;;  %v747_v6 = vpop.f32.mrb[26].mxu1 }
 0x147   :  { %v620_v7 = vadd.f32 %v2052_v17, %v619_v5  ;;  %v748_v8 = vadd.f32 %v2052_v17, %v747_v6  ;;  %v621_v9 = vpop.f32.mrb[27].mxu0  ;;  %v749_v10 = vpop.f32.mrb[27].mxu1  ;;  %v835_v11 = vmax.f32 %v617_v1, 0.0  ;;  %v867_v12 = vmax.f32 %v745_v2, 0.0 }
 0x149   :  { %v836_v13 = vmax.f32 %v620_v7, 0.0  ;;  %v868_v14 = vmax.f32 %v748_v8, 0.0 }
 0x14b   :  { %v1453_v15 = vpack.c.bf16 %v836_v13, %v835_v11  ;;  %v1533_v16 = vpack.c.bf16 %v868_v14, %v867_v12 }
 0x14c   :  { %v624_v18 = vpop.f32.mrb[28].mxu0  ;;  %v752_v19 = vpop.f32.mrb[28].mxu1 }
 0x14d   :  { %1585 = vst [vmem:[%s2217_s3 + $0x30] sm:$0xff] %v1453_v15   ;;  %1601 = vst [vmem:[%s2217_s3 + $0xb0] sm:$0xff] %v1533_v16   ;;  %v625_v20 = vadd.f32 %v2052_v17, %v624_v18  ;;  %v753_v21 = vadd.f32 %v2052_v17, %v752_v19  ;;  %v626_v22 = vpop.f32.mrb[29].mxu0  ;;  %v754_v23 = vpop.f32.mrb[29].mxu1 }
 0x14e   :  { %v627_v24 = vpop.f32.mrb[30].mxu0  ;;  %v755_v25 = vpop.f32.mrb[30].mxu1 }
 0x14f   :  { %v628_v26 = vadd.f32 %v2052_v17, %v627_v24  ;;  %v756_v27 = vadd.f32 %v2052_v17, %v755_v25  ;;  %v629_v28 = vpop.f32.mrb[31].mxu0  ;;  %v757_v29 = vpop.f32.mrb[31].mxu1  ;;  %v837_v30 = vmax.f32 %v625_v20, 0.0  ;;  %v869_v31 = vmax.f32 %v753_v21, 0.0 }
 0x151   :  { %v838_v32 = vmax.f32 %v628_v26, 0.0  ;;  %v870_v33 = vmax.f32 %v756_v27, 0.0 }
 0x153   :  { %v1458_v34 = vpack.c.bf16 %v838_v32, %v837_v30  ;;  %v1538_v35 = vpack.c.bf16 %v870_v33, %v869_v31 }
 0x154   :  { %v632_v36 = vpop.f32.mrb[32].mxu0  ;;  %v760_v37 = vpop.f32.mrb[32].mxu1 }
 0x155   :  { %1586 = vst [vmem:[%s2217_s3 + $0x38] sm:$0xff] %v1458_v34   ;;  %1602 = vst [vmem:[%s2217_s3 + $0xb8] sm:$0xff] %v1538_v35   ;;  %v633_v38 = vadd.f32 %v2052_v17, %v632_v36  ;;  %v761_v39 = vadd.f32 %v2052_v17, %v760_v37  ;;  %v634_v40 = vpop.f32.mrb[33].mxu0  ;;  %v762_v41 = vpop.f32.mrb[33].mxu1 }
 0x156   :  { %v635_v42 = vpop.f32.mrb[34].mxu0  ;;  %v763_v43 = vpop.f32.mrb[34].mxu1 }
 0x157   :  { %v636_v44 = vadd.f32 %v2052_v17, %v635_v42  ;;  %v764_v45 = vadd.f32 %v2052_v17, %v763_v43  ;;  %v637_v46 = vpop.f32.mrb[35].mxu0  ;;  %v765_v47 = vpop.f32.mrb[35].mxu1  ;;  %v839_v48 = vmax.f32 %v633_v38, 0.0  ;;  %v871_v49 = vmax.f32 %v761_v39, 0.0 }
 0x159   :  { %v840_v50 = vmax.f32 %v636_v44, 0.0  ;;  %v872_v51 = vmax.f32 %v764_v45, 0.0 }
 0x15b   :  { %v1463_v52 = vpack.c.bf16 %v840_v50, %v839_v48  ;;  %v1543_v53 = vpack.c.bf16 %v872_v51, %v871_v49 }
 0x15c   :  { %v640_v54 = vpop.f32.mrb[36].mxu0  ;;  %v768_v55 = vpop.f32.mrb[36].mxu1 }
 0x15d   :  { %1587 = vst [vmem:[%s2217_s3 + $0x40] sm:$0xff] %v1463_v52   ;;  %1603 = vst [vmem:[%s2217_s3 + $0xc0] sm:$0xff] %v1543_v53   ;;  %v641_v56 = vadd.f32 %v2052_v17, %v640_v54  ;;  %v769_v57 = vadd.f32 %v2052_v17, %v768_v55  ;;  %v642_v58 = vpop.f32.mrb[37].mxu0  ;;  %v770_v59 = vpop.f32.mrb[37].mxu1 }
 0x15e   :  { %v643_v60 = vpop.f32.mrb[38].mxu0  ;;  %v771_v61 = vpop.f32.mrb[38].mxu1 }
 0x15f   :  { %v644_v62 = vadd.f32 %v2052_v17, %v643_v60  ;;  %v772_v63 = vadd.f32 %v2052_v17, %v771_v61  ;;  %v645_v0 = vpop.f32.mrb[39].mxu0  ;;  %v773_v1 = vpop.f32.mrb[39].mxu1  ;;  %v841_v2 = vmax.f32 %v641_v56, 0.0  ;;  %v873_v3 = vmax.f32 %v769_v57, 0.0 }
 0x161   :  { %v842_v4 = vmax.f32 %v644_v62, 0.0  ;;  %v874_v5 = vmax.f32 %v772_v63, 0.0 }
 0x163   :  { %v1468_v6 = vpack.c.bf16 %v842_v4, %v841_v2  ;;  %v1548_v7 = vpack.c.bf16 %v874_v5, %v873_v3 }
 0x164   :  { %v648_v8 = vpop.f32.mrb[40].mxu0  ;;  %v776_v9 = vpop.f32.mrb[40].mxu1 }
 0x165   :  { %1588 = vst [vmem:[%s2217_s3 + $0x48] sm:$0xff] %v1468_v6   ;;  %1604 = vst [vmem:[%s2217_s3 + $0xc8] sm:$0xff] %v1548_v7   ;;  %v649_v10 = vadd.f32 %v2052_v17, %v648_v8  ;;  %v777_v11 = vadd.f32 %v2052_v17, %v776_v9  ;;  %v650_v12 = vpop.f32.mrb[41].mxu0  ;;  %v778_v13 = vpop.f32.mrb[41].mxu1 }
 0x166   :  { %v651_v14 = vpop.f32.mrb[42].mxu0  ;;  %v779_v15 = vpop.f32.mrb[42].mxu1 }
 0x167   :  { %v652_v16 = vadd.f32 %v2052_v17, %v651_v14  ;;  %v780_v18 = vadd.f32 %v2052_v17, %v779_v15  ;;  %v653_v19 = vpop.f32.mrb[43].mxu0  ;;  %v781_v20 = vpop.f32.mrb[43].mxu1  ;;  %v843_v21 = vmax.f32 %v649_v10, 0.0  ;;  %v875_v22 = vmax.f32 %v777_v11, 0.0 }
 0x169   :  { %v844_v23 = vmax.f32 %v652_v16, 0.0  ;;  %v876_v24 = vmax.f32 %v780_v18, 0.0 }
 0x16b   :  { %v1473_v25 = vpack.c.bf16 %v844_v23, %v843_v21  ;;  %v1553_v26 = vpack.c.bf16 %v876_v24, %v875_v22 }
 0x16c   :  { %v656_v27 = vpop.f32.mrb[44].mxu0  ;;  %v784_v28 = vpop.f32.mrb[44].mxu1 }
 0x16d   :  { %1589 = vst [vmem:[%s2217_s3 + $0x50] sm:$0xff] %v1473_v25   ;;  %1605 = vst [vmem:[%s2217_s3 + $0xd0] sm:$0xff] %v1553_v26   ;;  %v657_v29 = vadd.f32 %v2052_v17, %v656_v27  ;;  %v785_v30 = vadd.f32 %v2052_v17, %v784_v28  ;;  %v658_v31 = vpop.f32.mrb[45].mxu0  ;;  %v786_v32 = vpop.f32.mrb[45].mxu1 }
 0x16e   :  { %v659_v33 = vpop.f32.mrb[46].mxu0  ;;  %v787_v34 = vpop.f32.mrb[46].mxu1 }
 0x16f   :  { %v660_v35 = vadd.f32 %v2052_v17, %v659_v33  ;;  %v788_v36 = vadd.f32 %v2052_v17, %v787_v34  ;;  %v661_v37 = vpop.f32.mrb[47].mxu0  ;;  %v789_v38 = vpop.f32.mrb[47].mxu1  ;;  %v845_v39 = vmax.f32 %v657_v29, 0.0  ;;  %v877_v40 = vmax.f32 %v785_v30, 0.0 }
 0x171   :  { %v846_v41 = vmax.f32 %v660_v35, 0.0  ;;  %v878_v42 = vmax.f32 %v788_v36, 0.0 }
 0x173   :  { %v1478_v43 = vpack.c.bf16 %v846_v41, %v845_v39  ;;  %v1558_v44 = vpack.c.bf16 %v878_v42, %v877_v40 }
 0x174   :  { %v664_v45 = vpop.f32.mrb[48].mxu0  ;;  %v792_v46 = vpop.f32.mrb[48].mxu1 }
 0x175   :  { %1590 = vst [vmem:[%s2217_s3 + $0x58] sm:$0xff] %v1478_v43   ;;  %1606 = vst [vmem:[%s2217_s3 + $0xd8] sm:$0xff] %v1558_v44   ;;  %v665_v47 = vadd.f32 %v2052_v17, %v664_v45  ;;  %v793_v48 = vadd.f32 %v2052_v17, %v792_v46  ;;  %v666_v49 = vpop.f32.mrb[49].mxu0  ;;  %v794_v50 = vpop.f32.mrb[49].mxu1 }
 0x176   :  { %v667_v51 = vpop.f32.mrb[50].mxu0  ;;  %v795_v52 = vpop.f32.mrb[50].mxu1 }
 0x177   :  { %v668_v53 = vadd.f32 %v2052_v17, %v667_v51  ;;  %v796_v54 = vadd.f32 %v2052_v17, %v795_v52  ;;  %v669_v55 = vpop.f32.mrb[51].mxu0  ;;  %v797_v56 = vpop.f32.mrb[51].mxu1  ;;  %v847_v57 = vmax.f32 %v665_v47, 0.0  ;;  %v879_v58 = vmax.f32 %v793_v48, 0.0 }
 0x179   :  { %v848_v59 = vmax.f32 %v668_v53, 0.0  ;;  %v880_v60 = vmax.f32 %v796_v54, 0.0 }
 0x17b   :  { %v1483_v61 = vpack.c.bf16 %v848_v59, %v847_v57  ;;  %v1563_v62 = vpack.c.bf16 %v880_v60, %v879_v58 }
 0x17c   :  { %v672_v63 = vpop.f32.mrb[52].mxu0  ;;  %v800_v0 = vpop.f32.mrb[52].mxu1 }
 0x17d   :  { %1591 = vst [vmem:[%s2217_s3 + $0x60] sm:$0xff] %v1483_v61   ;;  %1607 = vst [vmem:[%s2217_s3 + $0xe0] sm:$0xff] %v1563_v62   ;;  %v673_v1 = vadd.f32 %v2052_v17, %v672_v63  ;;  %v801_v2 = vadd.f32 %v2052_v17, %v800_v0  ;;  %v674_v3 = vpop.f32.mrb[53].mxu0  ;;  %v802_v4 = vpop.f32.mrb[53].mxu1 }
 0x17e   :  { %v675_v5 = vpop.f32.mrb[54].mxu0  ;;  %v803_v6 = vpop.f32.mrb[54].mxu1 }
 0x17f   :  { %v676_v7 = vadd.f32 %v2052_v17, %v675_v5  ;;  %v804_v8 = vadd.f32 %v2052_v17, %v803_v6  ;;  %v677_v9 = vpop.f32.mrb[55].mxu0  ;;  %v805_v10 = vpop.f32.mrb[55].mxu1  ;;  %v849_v11 = vmax.f32 %v673_v1, 0.0  ;;  %v881_v12 = vmax.f32 %v801_v2, 0.0 }
 0x181   :  { %v850_v13 = vmax.f32 %v676_v7, 0.0  ;;  %v882_v14 = vmax.f32 %v804_v8, 0.0 }
 0x183   :  { %v1488_v15 = vpack.c.bf16 %v850_v13, %v849_v11  ;;  %v1568_v16 = vpack.c.bf16 %v882_v14, %v881_v12 }
 0x184   :  { %v680_v18 = vpop.f32.mrb[56].mxu0  ;;  %v808_v19 = vpop.f32.mrb[56].mxu1 }
 0x185   :  { %1592 = vst [vmem:[%s2217_s3 + $0x68] sm:$0xff] %v1488_v15   ;;  %1608 = vst [vmem:[%s2217_s3 + $0xe8] sm:$0xff] %v1568_v16   ;;  %v681_v20 = vadd.f32 %v2052_v17, %v680_v18  ;;  %v809_v21 = vadd.f32 %v2052_v17, %v808_v19  ;;  %v682_v22 = vpop.f32.mrb[57].mxu0  ;;  %v810_v23 = vpop.f32.mrb[57].mxu1 }
 0x186   :  { %v683_v24 = vpop.f32.mrb[58].mxu0  ;;  %v811_v25 = vpop.f32.mrb[58].mxu1 }
 0x187   :  { %v684_v26 = vadd.f32 %v2052_v17, %v683_v24  ;;  %v812_v27 = vadd.f32 %v2052_v17, %v811_v25  ;;  %v685_v28 = vpop.f32.mrb[59].mxu0  ;;  %v813_v29 = vpop.f32.mrb[59].mxu1  ;;  %v851_v30 = vmax.f32 %v681_v20, 0.0  ;;  %v883_v31 = vmax.f32 %v809_v21, 0.0 }
 0x189   :  { %v852_v32 = vmax.f32 %v684_v26, 0.0  ;;  %v884_v33 = vmax.f32 %v812_v27, 0.0 }
 0x18b   :  { %v1493_v34 = vpack.c.bf16 %v852_v32, %v851_v30  ;;  %v1573_v35 = vpack.c.bf16 %v884_v33, %v883_v31 }
 0x18c   :  { %v688_v36 = vpop.f32.mrb[60].mxu0  ;;  %v816_v37 = vpop.f32.mrb[60].mxu1 }
 0x18d   :  { %1593 = vst [vmem:[%s2217_s3 + $0x70] sm:$0xff] %v1493_v34   ;;  %1609 = vst [vmem:[%s2217_s3 + $0xf0] sm:$0xff] %v1573_v35   ;;  %v689_v38 = vadd.f32 %v2052_v17, %v688_v36  ;;  %v817_v39 = vadd.f32 %v2052_v17, %v816_v37  ;;  %v690_v40 = vpop.f32.mrb[61].mxu0  ;;  %v818_v41 = vpop.f32.mrb[61].mxu1 }
 0x18e   :  { %v691_v42 = vpop.f32.mrb[62].mxu0  ;;  %v819_v43 = vpop.f32.mrb[62].mxu1 }
 0x18f   :  { %v692_v44 = vadd.f32 %v2052_v17, %v691_v42  ;;  %v820_v45 = vadd.f32 %v2052_v17, %v819_v43  ;;  %v693_v46 = vpop.f32.mrb[63].mxu0  ;;  %v821_v47 = vpop.f32.mrb[63].mxu1  ;;  %v853_v48 = vmax.f32 %v689_v38, 0.0  ;;  %v885_v49 = vmax.f32 %v817_v39, 0.0 }
 0x191   :  { %v854_v50 = vmax.f32 %v692_v44, 0.0  ;;  %v886_v51 = vmax.f32 %v820_v45, 0.0 }
 0x193   :  { %v1498_v52 = vpack.c.bf16 %v854_v50, %v853_v48  ;;  %v1578_v53 = vpack.c.bf16 %v886_v51, %v885_v49 }
 0x195   :  { %1594 = vst [vmem:[%s2217_s3 + $0x78] sm:$0xff] %v1498_v52   ;;  %1610 = vst [vmem:[%s2217_s3 + $0xf8] sm:$0xff] %v1578_v53  }

// kernel: forward.10
= control target key start
LH: loop header
LB: loop body
LE: loop exit
PB: predicated region body
PF: predicated region fallthrough
CT: control target
= control target key end

     0   :  { %v2110_v0 = vmov 0   ;;  %s2669_s1 = inlined_call_operand.vmem [shape: bf16[256,128], index: 1, kind: input, shape index: {}]   ;;  %s2670_s0 = inlined_call_operand.vmem [shape: bf16[512,256], index: 0, kind: input, shape index: {}]   ;;  %s2671_s3 = inlined_call_operand.vmem [shape: bf16[512,128], index: 3, kind: input, shape index: {}]   ;;  %s2672_s2 = inlined_call_operand.vmem [shape: f32[1,128], index: 2, kind: input, shape index: {}]   ;;  %s2673_s4 = inlined_call_operand.vmem [shape: bf16[512,128], index: 4, kind: output, shape index: {}]  }
   0x1   :  { %537 = vmatprep.subr.bf16.mxu0 %v2110_v0  ;;  %1965 = vmatprep.subr.bf16.mxu1 %v2110_v0  ;;  %v1998_v1 = vld [vmem:[%s2669_s1] sm:$0xff]   ;;  %v1999_v2 = vld [vmem:[%s2669_s1 + $0x8] sm:$0xff]   ;;  %v2000_v3 = vld [vmem:[%s2669_s1 + $0x10] sm:$0xff]  }
   0x2   :  { %538 = vmatpush1.bf16.msra.mxu0 %v1998_v1  ;;  %1981 = vmatpush1.bf16.msra.mxu1 %v1998_v1  ;;  %v2001_v4 = vld [vmem:[%s2669_s1 + $0x18] sm:$0xff]   ;;  %v2002_v5 = vld [vmem:[%s2669_s1 + $0x20] sm:$0xff]   ;;  %v2003_v7 = vld [vmem:[%s2669_s1 + $0x28] sm:$0xff]  }
   0x3   :  { %539 = vmatprep.subr.bf16.mxu0 %v2110_v0  ;;  %1966 = vmatprep.subr.bf16.mxu1 %v2110_v0  ;;  %v2016_v6 = vld [vmem:[%s2670_s0 + $0x4] ss:$8 sps:$4 sm:$0xff]   ;;  %v2004_v9 = vld [vmem:[%s2669_s1 + $0x30] sm:$0xff]   ;;  %v2005_v10 = vld [vmem:[%s2669_s1 + $0x38] sm:$0xff]  }
   0x4   :  { %v2019_v8 = vld [vmem:[%s2670_s0 + $0x104] ss:$8 sps:$4 sm:$0xff]   ;;  %569 = vmatprep.mubr.bf16.mxu0 %v2016_v6  ;;  %v2008_v13 = vld [vmem:[%s2669_s1 + $0x50] sm:$0xff]   ;;  %v2009_v14 = vld [vmem:[%s2669_s1 + $0x58] sm:$0xff]  }
   0x5   :  { %697 = vmatprep.mubr.bf16.mxu1 %v2019_v8  ;;  %v2006_v11 = vld [vmem:[%s2669_s1 + $0x40] sm:$0xff]   ;;  %v2007_v12 = vld [vmem:[%s2669_s1 + $0x48] sm:$0xff]   ;;  %v2012_v17 = vld [vmem:[%s2669_s1 + $0x70] sm:$0xff]  }
   0x6   :  { %540 = vmatpush1.bf16.msra.mxu0 %v1999_v2  ;;  %1982 = vmatpush1.bf16.msra.mxu1 %v1999_v2  ;;  %v2010_v15 = vld [vmem:[%s2669_s1 + $0x60] sm:$0xff]   ;;  %v2011_v16 = vld [vmem:[%s2669_s1 + $0x68] sm:$0xff]   ;;  %v2013_v18 = vld [vmem:[%s2669_s1 + $0x78] sm:$0xff]  }
   0x7   :  { %541 = vmatprep.subr.bf16.mxu0 %v2110_v0  ;;  %1967 = vmatprep.subr.bf16.mxu1 %v2110_v0  ;;  %v2014_v19 = vld [vmem:[%s2670_s0] ss:$8 sps:$4 sm:$0xff]   ;;  %v2020_v21 = vld [vmem:[%s2670_s0 + $0x14] ss:$8 sps:$4 sm:$0xff]   ;;  %v2024_v23 = vld [vmem:[%s2670_s0 + $0x10] ss:$8 sps:$4 sm:$0xff]  }
   0x8   :  { %v2017_v20 = vld [vmem:[%s2670_s0 + $0x100] ss:$8 sps:$4 sm:$0xff]   ;;  %v2022_v22 = vld [vmem:[%s2670_s0 + $0x114] ss:$8 sps:$4 sm:$0xff]   ;;  %v2025_v24 = vld [vmem:[%s2670_s0 + $0x110] ss:$8 sps:$4 sm:$0xff]  }
   0x9   :  { %v2026_v25 = vld [vmem:[%s2670_s0 + $0x24] ss:$8 sps:$4 sm:$0xff]   ;;  %v2030_v27 = vld [vmem:[%s2670_s0 + $0x20] ss:$8 sps:$4 sm:$0xff]   ;;  %v2032_v29 = vld [vmem:[%s2670_s0 + $0x34] ss:$8 sps:$4 sm:$0xff]  }
   0xa   :  { %542 = vmatpush1.bf16.msra.mxu0 %v2000_v3  ;;  %1983 = vmatpush1.bf16.msra.mxu1 %v2000_v3  ;;  %v2028_v26 = vld [vmem:[%s2670_s0 + $0x124] ss:$8 sps:$4 sm:$0xff]   ;;  %v2031_v28 = vld [vmem:[%s2670_s0 + $0x120] ss:$8 sps:$4 sm:$0xff]   ;;  %v2034_v30 = vld [vmem:[%s2670_s0 + $0x134] ss:$8 sps:$4 sm:$0xff]  }
   0xb   :  { %543 = vmatprep.subr.bf16.mxu0 %v2110_v0  ;;  %1968 = vmatprep.subr.bf16.mxu1 %v2110_v0  ;;  %v2036_v31 = vld [vmem:[%s2670_s0 + $0x30] ss:$8 sps:$4 sm:$0xff]   ;;  %v2038_v33 = vld [vmem:[%s2670_s0 + $0x44] ss:$8 sps:$4 sm:$0xff]   ;;  %v2042_v35 = vld [vmem:[%s2670_s0 + $0x40] ss:$8 sps:$4 sm:$0xff]  }
   0xc   :  { %v2037_v32 = vld [vmem:[%s2670_s0 + $0x130] ss:$8 sps:$4 sm:$0xff]   ;;  %v2040_v34 = vld [vmem:[%s2670_s0 + $0x144] ss:$8 sps:$4 sm:$0xff]   ;;  %v2043_v36 = vld [vmem:[%s2670_s0 + $0x140] ss:$8 sps:$4 sm:$0xff]  }
   0xd   :  { %v2044_v37 = vld [vmem:[%s2670_s0 + $0x54] ss:$8 sps:$4 sm:$0xff]   ;;  %v2048_v39 = vld [vmem:[%s2670_s0 + $0x50] ss:$8 sps:$4 sm:$0xff]   ;;  %v2050_v41 = vld [vmem:[%s2670_s0 + $0x64] ss:$8 sps:$4 sm:$0xff]  }
   0xe   :  { %544 = vmatpush1.bf16.msra.mxu0 %v2001_v4  ;;  %1984 = vmatpush1.bf16.msra.mxu1 %v2001_v4  ;;  %v2046_v38 = vld [vmem:[%s2670_s0 + $0x154] ss:$8 sps:$4 sm:$0xff]   ;;  %v2049_v40 = vld [vmem:[%s2670_s0 + $0x150] ss:$8 sps:$4 sm:$0xff]   ;;  %v2052_v42 = vld [vmem:[%s2670_s0 + $0x164] ss:$8 sps:$4 sm:$0xff]  }
   0xf   :  { %545 = vmatprep.subr.bf16.mxu0 %v2110_v0  ;;  %1969 = vmatprep.subr.bf16.mxu1 %v2110_v0  ;;  %v2054_v43 = vld [vmem:[%s2670_s0 + $0x60] ss:$8 sps:$4 sm:$0xff]   ;;  %v2056_v45 = vld [vmem:[%s2670_s0 + $0x74] ss:$8 sps:$4 sm:$0xff]   ;;  %v2060_v47 = vld [vmem:[%s2670_s0 + $0x70] ss:$8 sps:$4 sm:$0xff]  }
  0x10   :  { %v2055_v44 = vld [vmem:[%s2670_s0 + $0x160] ss:$8 sps:$4 sm:$0xff]   ;;  %v2058_v46 = vld [vmem:[%s2670_s0 + $0x174] ss:$8 sps:$4 sm:$0xff]   ;;  %v2061_v48 = vld [vmem:[%s2670_s0 + $0x170] ss:$8 sps:$4 sm:$0xff]  }
  0x11   :  { %v2062_v49 = vld [vmem:[%s2670_s0 + $0x84] ss:$8 sps:$4 sm:$0xff]   ;;  %v2066_v51 = vld [vmem:[%s2670_s0 + $0x80] ss:$8 sps:$4 sm:$0xff]   ;;  %v2068_v53 = vld [vmem:[%s2670_s0 + $0x94] ss:$8 sps:$4 sm:$0xff]  }
  0x12   :  { %546 = vmatpush1.bf16.msra.mxu0 %v2002_v5  ;;  %1985 = vmatpush1.bf16.msra.mxu1 %v2002_v5  ;;  %v2064_v50 = vld [vmem:[%s2670_s0 + $0x184] ss:$8 sps:$4 sm:$0xff]   ;;  %v2067_v52 = vld [vmem:[%s2670_s0 + $0x180] ss:$8 sps:$4 sm:$0xff]   ;;  %v2070_v54 = vld [vmem:[%s2670_s0 + $0x194] ss:$8 sps:$4 sm:$0xff]  }
  0x13   :  { %547 = vmatprep.subr.bf16.mxu0 %v2110_v0  ;;  %1970 = vmatprep.subr.bf16.mxu1 %v2110_v0  ;;  %v2072_v55 = vld [vmem:[%s2670_s0 + $0x90] ss:$8 sps:$4 sm:$0xff]   ;;  %v2074_v57 = vld [vmem:[%s2670_s0 + $0xa4] ss:$8 sps:$4 sm:$0xff]   ;;  %v2078_v59 = vld [vmem:[%s2670_s0 + $0xa0] ss:$8 sps:$4 sm:$0xff]  }
  0x14   :  { %v2073_v56 = vld [vmem:[%s2670_s0 + $0x190] ss:$8 sps:$4 sm:$0xff]   ;;  %v2076_v58 = vld [vmem:[%s2670_s0 + $0x1a4] ss:$8 sps:$4 sm:$0xff]   ;;  %v2079_v60 = vld [vmem:[%s2670_s0 + $0x1a0] ss:$8 sps:$4 sm:$0xff]  }
  0x15   :  { %v2080_v61 = vld [vmem:[%s2670_s0 + $0xb4] ss:$8 sps:$4 sm:$0xff]   ;;  %v2084_v63 = vld [vmem:[%s2670_s0 + $0xb0] ss:$8 sps:$4 sm:$0xff]   ;;  %v2086_v1 = vld [vmem:[%s2670_s0 + $0xc4] ss:$8 sps:$4 sm:$0xff]  }
  0x16   :  { %548 = vmatpush1.bf16.msra.mxu0 %v2003_v7  ;;  %1986 = vmatpush1.bf16.msra.mxu1 %v2003_v7  ;;  %v2082_v62 = vld [vmem:[%s2670_s0 + $0x1b4] ss:$8 sps:$4 sm:$0xff]   ;;  %v2088_v2 = vld [vmem:[%s2670_s0 + $0x1c4] ss:$8 sps:$4 sm:$0xff]   ;;  %v2090_v3 = vld [vmem:[%s2670_s0 + $0xc0] ss:$8 sps:$4 sm:$0xff]  }
  0x17   :  { %549 = vmatprep.subr.bf16.mxu0 %v2110_v0  ;;  %1971 = vmatprep.subr.bf16.mxu1 %v2110_v0  ;;  %v2091_v4 = vld [vmem:[%s2670_s0 + $0x1c0] ss:$8 sps:$4 sm:$0xff]   ;;  %v2092_v5 = vld [vmem:[%s2670_s0 + $0xd4] ss:$8 sps:$4 sm:$0xff]   ;;  %v2096_v7 = vld [vmem:[%s2670_s0 + $0xd0] ss:$8 sps:$4 sm:$0xff]  }
  0x18   :  { %v2094_v6 = vld [vmem:[%s2670_s0 + $0x1d4] ss:$8 sps:$4 sm:$0xff]   ;;  %v2097_v8 = vld [vmem:[%s2670_s0 + $0x1d0] ss:$8 sps:$4 sm:$0xff]  }
  0x1a   :  { %550 = vmatpush1.bf16.msra.mxu0 %v2004_v9  ;;  %1987 = vmatpush1.bf16.msra.mxu1 %v2004_v9  ;;  %v2098_v9 = vld [vmem:[%s2670_s0 + $0xe4] ss:$8 sps:$4 sm:$0xff]  }
  0x1b   :  { %551 = vmatprep.subr.bf16.mxu0 %v2110_v0  ;;  %1972 = vmatprep.subr.bf16.mxu1 %v2110_v0 }
  0x1e   :  { %552 = vmatpush1.bf16.msra.mxu0 %v2005_v10  ;;  %1988 = vmatpush1.bf16.msra.mxu1 %v2005_v10  ;;  %v2100_v10 = vld [vmem:[%s2670_s0 + $0x1e4] ss:$8 sps:$4 sm:$0xff]  }
  0x1f   :  { %553 = vmatprep.subr.bf16.mxu0 %v2110_v0  ;;  %1973 = vmatprep.subr.bf16.mxu1 %v2110_v0 }
  0x22   :  { %554 = vmatpush1.bf16.msra.mxu0 %v2006_v11  ;;  %1989 = vmatpush1.bf16.msra.mxu1 %v2006_v11  ;;  %v2102_v11 = vld [vmem:[%s2670_s0 + $0xe0] ss:$8 sps:$4 sm:$0xff]  }
  0x23   :  { %555 = vmatprep.subr.bf16.mxu0 %v2110_v0  ;;  %1974 = vmatprep.subr.bf16.mxu1 %v2110_v0 }
  0x26   :  { %556 = vmatpush1.bf16.msra.mxu0 %v2007_v12  ;;  %1990 = vmatpush1.bf16.msra.mxu1 %v2007_v12  ;;  %v2103_v12 = vld [vmem:[%s2670_s0 + $0x1e0] ss:$8 sps:$4 sm:$0xff]  }
  0x27   :  { %557 = vmatprep.subr.bf16.mxu0 %v2110_v0  ;;  %1975 = vmatprep.subr.bf16.mxu1 %v2110_v0 }
  0x2a   :  { %558 = vmatpush1.bf16.msra.mxu0 %v2008_v13  ;;  %1991 = vmatpush1.bf16.msra.mxu1 %v2008_v13  ;;  %v2104_v13 = vld [vmem:[%s2670_s0 + $0xf4] ss:$8 sps:$4 sm:$0xff]  }
  0x2b   :  { %559 = vmatprep.subr.bf16.mxu0 %v2110_v0  ;;  %1976 = vmatprep.subr.bf16.mxu1 %v2110_v0 }
  0x2e   :  { %560 = vmatpush1.bf16.msra.mxu0 %v2009_v14  ;;  %1992 = vmatpush1.bf16.msra.mxu1 %v2009_v14  ;;  %v2106_v14 = vld [vmem:[%s2670_s0 + $0x1f4] ss:$8 sps:$4 sm:$0xff]  }
  0x2f   :  { %561 = vmatprep.subr.bf16.mxu0 %v2110_v0  ;;  %1977 = vmatprep.subr.bf16.mxu1 %v2110_v0 }
  0x32   :  { %562 = vmatpush1.bf16.msra.mxu0 %v2010_v15  ;;  %1993 = vmatpush1.bf16.msra.mxu1 %v2010_v15  ;;  %v2108_v15 = vld [vmem:[%s2670_s0 + $0xf0] ss:$8 sps:$4 sm:$0xff]  }
  0x33   :  { %563 = vmatprep.subr.bf16.mxu0 %v2110_v0  ;;  %1978 = vmatprep.subr.bf16.mxu1 %v2110_v0 }
  0x36   :  { %564 = vmatpush1.bf16.msra.mxu0 %v2011_v16  ;;  %1994 = vmatpush1.bf16.msra.mxu1 %v2011_v16  ;;  %v2109_v16 = vld [vmem:[%s2670_s0 + $0x1f0] ss:$8 sps:$4 sm:$0xff]  }
  0x37   :  { %565 = vmatprep.subr.bf16.mxu0 %v2110_v0  ;;  %1979 = vmatprep.subr.bf16.mxu1 %v2110_v0 }
  0x3a   :  { %566 = vmatpush1.bf16.msra.mxu0 %v2012_v17  ;;  %1995 = vmatpush1.bf16.msra.mxu1 %v2012_v17  ;;  %v1616_v17 = vld [vmem:[%s2671_s3] sm:$0xff]  }
  0x3b   :  { %567 = vmatprep.subr.bf16.mxu0 %v2110_v0  ;;  %1980 = vmatprep.subr.bf16.mxu1 %v2110_v0  ;;  %v2085_v0 = vld [vmem:[%s2670_s0 + $0x1b0] ss:$8 sps:$4 sm:$0xff]  }
  0x3e   :  { %568 = vmatpush1.bf16.msra.mxu0 %v2013_v18  ;;  %1996 = vmatpush1.bf16.msra.mxu1 %v2013_v18  ;;  %v1918_v18 = vld [vmem:[%s2671_s3 + $0x80] sm:$0xff]  }
  0x41   :  { %570 = vmatmul.mubr.bf16.vlgmr.msra.gmra.mrb[0].mxu0 %v2014_v19  ;;  %698 = vmatmul.mubr.bf16.vlgmr.msra.gmra.mrb[0].mxu1 %v2017_v20  ;;  %v2417_v19 = vld [vmem:[%s2672_s2] ss:$0 sm:$0xff]  ;;  %v1617_v20 = vunpack.c.l.bf16 %v1616_v17 }
  0x42   :  { %577 = vmatprep.mubr.bf16.mxu0 %v2020_v21  ;;  %705 = vmatprep.mubr.bf16.mxu1 %v2022_v22  ;;  %v1681_v21 = vunpack.c.l.bf16 %v1918_v18 }
  0x49   :  { %578 = vmatmul.mubr.bf16.gmra.mrb[4].mxu0 %v2024_v23  ;;  %706 = vmatmul.mubr.bf16.gmra.mrb[4].mxu1 %v2025_v24 }
  0x4a   :  { %585 = vmatprep.mubr.bf16.mxu0 %v2026_v25  ;;  %713 = vmatprep.mubr.bf16.mxu1 %v2028_v26 }
  0x51   :  { %586 = vmatmul.mubr.bf16.gmra.mrb[8].mxu0 %v2030_v27  ;;  %714 = vmatmul.mubr.bf16.gmra.mrb[8].mxu1 %v2031_v28  ;;  %v1618_v28 = vunpack.c.h.bf16 %v1616_v17 }
  0x52   :  { %593 = vmatprep.mubr.bf16.mxu0 %v2032_v29  ;;  %721 = vmatprep.mubr.bf16.mxu1 %v2034_v30  ;;  %v1682_v29 = vunpack.c.h.bf16 %v1918_v18 }
  0x59   :  { %594 = vmatmul.mubr.bf16.gmra.mrb[12].mxu0 %v2036_v31  ;;  %722 = vmatmul.mubr.bf16.gmra.mrb[12].mxu1 %v2037_v32 }
  0x5a   :  { %601 = vmatprep.mubr.bf16.mxu0 %v2038_v33  ;;  %729 = vmatprep.mubr.bf16.mxu1 %v2040_v34 }
  0x61   :  { %602 = vmatmul.mubr.bf16.gmra.mrb[16].mxu0 %v2042_v35  ;;  %730 = vmatmul.mubr.bf16.gmra.mrb[16].mxu1 %v2043_v36 }
  0x62   :  { %609 = vmatprep.mubr.bf16.mxu0 %v2044_v37  ;;  %737 = vmatprep.mubr.bf16.mxu1 %v2046_v38  ;;  %v1903_v38 = vld [vmem:[%s2671_s3 + $0x8] sm:$0xff]  }
  0x69   :  { %610 = vmatmul.mubr.bf16.gmra.mrb[20].mxu0 %v2048_v39  ;;  %738 = vmatmul.mubr.bf16.gmra.mrb[20].mxu1 %v2049_v40  ;;  %v1919_v39 = vld [vmem:[%s2671_s3 + $0x88] sm:$0xff]  }
  0x6a   :  { %617 = vmatprep.mubr.bf16.mxu0 %v2050_v41  ;;  %745 = vmatprep.mubr.bf16.mxu1 %v2052_v42  ;;  %v1621_v42 = vunpack.c.l.bf16 %v1903_v38 }
  0x71   :  { %618 = vmatmul.mubr.bf16.gmra.mrb[24].mxu0 %v2054_v43  ;;  %746 = vmatmul.mubr.bf16.gmra.mrb[24].mxu1 %v2055_v44  ;;  %v1685_v43 = vunpack.c.l.bf16 %v1919_v39 }
  0x72   :  { %625 = vmatprep.mubr.bf16.mxu0 %v2056_v45  ;;  %753 = vmatprep.mubr.bf16.mxu1 %v2058_v46 }
  0x79   :  { %626 = vmatmul.mubr.bf16.gmra.mrb[28].mxu0 %v2060_v47  ;;  %754 = vmatmul.mubr.bf16.gmra.mrb[28].mxu1 %v2061_v48 }
  0x7a   :  { %633 = vmatprep.mubr.bf16.mxu0 %v2062_v49  ;;  %761 = vmatprep.mubr.bf16.mxu1 %v2064_v50  ;;  %v1622_v50 = vunpack.c.h.bf16 %v1903_v38 }
  0x81   :  { %634 = vmatmul.mubr.bf16.gmra.mrb[32].mxu0 %v2066_v51  ;;  %762 = vmatmul.mubr.bf16.gmra.mrb[32].mxu1 %v2067_v52  ;;  %v1686_v51 = vunpack.c.h.bf16 %v1919_v39 }
  0x82   :  { %641 = vmatprep.mubr.bf16.mxu0 %v2068_v53  ;;  %769 = vmatprep.mubr.bf16.mxu1 %v2070_v54 }
  0x89   :  { %642 = vmatmul.mubr.bf16.gmra.mrb[36].mxu0 %v2072_v55  ;;  %770 = vmatmul.mubr.bf16.gmra.mrb[36].mxu1 %v2073_v56 }
  0x8a   :  { %649 = vmatprep.mubr.bf16.mxu0 %v2074_v57  ;;  %777 = vmatprep.mubr.bf16.mxu1 %v2076_v58 }
  0x91   :  { %650 = vmatmul.mubr.bf16.gmra.mrb[40].mxu0 %v2078_v59  ;;  %778 = vmatmul.mubr.bf16.gmra.mrb[40].mxu1 %v2079_v60 }
  0x92   :  { %657 = vmatprep.mubr.bf16.mxu0 %v2080_v61  ;;  %785 = vmatprep.mubr.bf16.mxu1 %v2082_v62 }
  0x99   :  { %658 = vmatmul.mubr.bf16.gmra.mrb[44].mxu0 %v2084_v63  ;;  %786 = vmatmul.mubr.bf16.gmra.mrb[44].mxu1 %v2085_v0 }
  0x9a   :  { %665 = vmatprep.mubr.bf16.mxu0 %v2086_v1  ;;  %793 = vmatprep.mubr.bf16.mxu1 %v2088_v2  ;;  %v1904_v2 = vld [vmem:[%s2671_s3 + $0x10] sm:$0xff]  }
  0xa1   :  { %666 = vmatmul.mubr.bf16.gmra.mrb[48].mxu0 %v2090_v3  ;;  %794 = vmatmul.mubr.bf16.gmra.mrb[48].mxu1 %v2091_v4  ;;  %v1920_v3 = vld [vmem:[%s2671_s3 + $0x90] sm:$0xff]  }
  0xa2   :  { %673 = vmatprep.mubr.bf16.mxu0 %v2092_v5  ;;  %801 = vmatprep.mubr.bf16.mxu1 %v2094_v6  ;;  %v1625_v6 = vunpack.c.l.bf16 %v1904_v2 }
  0xa9   :  { %674 = vmatmul.mubr.bf16.gmra.mrb[52].mxu0 %v2096_v7  ;;  %802 = vmatmul.mubr.bf16.gmra.mrb[52].mxu1 %v2097_v8  ;;  %v1689_v7 = vunpack.c.l.bf16 %v1920_v3 }
  0xaa   :  { %681 = vmatprep.mubr.bf16.mxu0 %v2098_v9  ;;  %809 = vmatprep.mubr.bf16.mxu1 %v2100_v10 }
  0xb1   :  { %682 = vmatmul.mubr.bf16.gmra.mrb[56].mxu0 %v2102_v11  ;;  %810 = vmatmul.mubr.bf16.gmra.mrb[56].mxu1 %v2103_v12 }
  0xb2   :  { %689 = vmatprep.mubr.bf16.mxu0 %v2104_v13  ;;  %817 = vmatprep.mubr.bf16.mxu1 %v2106_v14  ;;  %v1626_v14 = vunpack.c.h.bf16 %v1904_v2 }
  0xb9   :  { %690 = vmatmul.mubr.bf16.gmra.mrb[60].mxu0 %v2108_v15  ;;  %818 = vmatmul.mubr.bf16.gmra.mrb[60].mxu1 %v2109_v16  ;;  %v1690_v15 = vunpack.c.h.bf16 %v1920_v3 }
 0x114   :  { %v571_v22 = vpop.f32.mrb[0].mxu0  ;;  %v699_v23 = vpop.f32.mrb[0].mxu1 }
 0x115   :  { %v572_v24 = vadd.f32 %v2417_v19, %v571_v22  ;;  %v700_v25 = vadd.f32 %v2417_v19, %v699_v23  ;;  %v573_v26 = vpop.f32.mrb[1].mxu0  ;;  %v701_v27 = vpop.f32.mrb[1].mxu1 }
 0x116   :  { %v574_v30 = vpop.f32.mrb[2].mxu0  ;;  %v702_v31 = vpop.f32.mrb[2].mxu1 }
 0x117   :  { %v954_v32 = vadd.f32 %v1617_v20, %v572_v24  ;;  %v986_v33 = vadd.f32 %v1681_v21, %v700_v25  ;;  %v575_v34 = vadd.f32 %v2417_v19, %v574_v30  ;;  %v703_v35 = vadd.f32 %v2417_v19, %v702_v31  ;;  %v576_v36 = vpop.f32.mrb[3].mxu0  ;;  %v704_v37 = vpop.f32.mrb[3].mxu1  ;;  %v1905_v31 = vld [vmem:[%s2671_s3 + $0x18] sm:$0xff]  }
 0x119   :  { %v955_v40 = vadd.f32 %v1618_v28, %v575_v34  ;;  %v987_v41 = vadd.f32 %v1682_v29, %v703_v35  ;;  %v1018_v44 = vmax.f32 %v954_v32, 0.0  ;;  %v1050_v45 = vmax.f32 %v986_v33, 0.0  ;;  %v1921_v32 = vld [vmem:[%s2671_s3 + $0x98] sm:$0xff]  }
 0x11a   :  { %v1629_v35 = vunpack.c.l.bf16 %v1905_v31  ;;  %v1693_v36 = vunpack.c.l.bf16 %v1921_v32 }
 0x11b   :  { %v1019_v46 = vmax.f32 %v955_v40, 0.0  ;;  %v1051_v47 = vmax.f32 %v987_v41, 0.0 }
 0x11c   :  { %v579_v48 = vpop.f32.mrb[4].mxu0  ;;  %v707_v49 = vpop.f32.mrb[4].mxu1 }
 0x11d   :  { %v1746_v52 = vpack.c.bf16 %v1019_v46, %v1018_v44  ;;  %v1826_v53 = vpack.c.bf16 %v1051_v47, %v1050_v45  ;;  %v580_v54 = vadd.f32 %v2417_v19, %v579_v48  ;;  %v708_v55 = vadd.f32 %v2417_v19, %v707_v49  ;;  %v581_v56 = vpop.f32.mrb[5].mxu0  ;;  %v709_v57 = vpop.f32.mrb[5].mxu1 }
 0x11e   :  { %v582_v58 = vpop.f32.mrb[6].mxu0  ;;  %v710_v59 = vpop.f32.mrb[6].mxu1  ;;  %v1694_v44 = vunpack.c.h.bf16 %v1921_v32 }
 0x11f   :  { %1747 = vst [vmem:[%s2673_s4] sm:$0xff] %v1746_v52   ;;  %1949 = vst [vmem:[%s2673_s4 + $0x80] sm:$0xff] %v1826_v53   ;;  %v956_v60 = vadd.f32 %v1621_v42, %v580_v54  ;;  %v988_v61 = vadd.f32 %v1685_v43, %v708_v55  ;;  %v583_v62 = vadd.f32 %v2417_v19, %v582_v58  ;;  %v584_v0 = vpop.f32.mrb[7].mxu0  ;;  %v712_v1 = vpop.f32.mrb[7].mxu1  ;;  %v1630_v43 = vunpack.c.h.bf16 %v1905_v31 }
 0x120   :  { %v711_v63 = vadd.f32 %v2417_v19, %v710_v59  ;;  %v1906_v59 = vld [vmem:[%s2671_s3 + $0x20] sm:$0xff]  }
 0x121   :  { %v957_v4 = vadd.f32 %v1622_v50, %v583_v62  ;;  %v1020_v8 = vmax.f32 %v956_v60, 0.0  ;;  %v1052_v9 = vmax.f32 %v988_v61, 0.0  ;;  %v1922_v60 = vld [vmem:[%s2671_s3 + $0xa0] sm:$0xff]  }
 0x122   :  { %v989_v5 = vadd.f32 %v1686_v51, %v711_v63  ;;  %v1633_v63 = vunpack.c.l.bf16 %v1906_v59  ;;  %v1697_v0 = vunpack.c.l.bf16 %v1922_v60 }
 0x123   :  { %v1021_v10 = vmax.f32 %v957_v4, 0.0 }
 0x124   :  { %v1053_v11 = vmax.f32 %v989_v5, 0.0  ;;  %v587_v12 = vpop.f32.mrb[8].mxu0  ;;  %v715_v13 = vpop.f32.mrb[8].mxu1 }
 0x125   :  { %v1751_v16 = vpack.c.bf16 %v1021_v10, %v1020_v8  ;;  %v588_v18 = vadd.f32 %v2417_v19, %v587_v12  ;;  %v716_v20 = vadd.f32 %v2417_v19, %v715_v13  ;;  %v589_v21 = vpop.f32.mrb[9].mxu0  ;;  %v717_v22 = vpop.f32.mrb[9].mxu1  ;;  %v1698_v8 = vunpack.c.h.bf16 %v1922_v60 }
 0x126   :  { %v1831_v17 = vpack.c.bf16 %v1053_v11, %v1052_v9  ;;  %v590_v23 = vpop.f32.mrb[10].mxu0  ;;  %v718_v24 = vpop.f32.mrb[10].mxu1 }
 0x127   :  { %1934 = vst [vmem:[%s2673_s4 + $0x8] sm:$0xff] %v1751_v16   ;;  %v958_v25 = vadd.f32 %v1625_v6, %v588_v18  ;;  %v990_v26 = vadd.f32 %v1689_v7, %v716_v20  ;;  %v591_v27 = vadd.f32 %v2417_v19, %v590_v23  ;;  %v719_v28 = vadd.f32 %v2417_v19, %v718_v24  ;;  %v592_v29 = vpop.f32.mrb[11].mxu0  ;;  %v720_v30 = vpop.f32.mrb[11].mxu1  ;;  %v1907_v24 = vld [vmem:[%s2671_s3 + $0x28] sm:$0xff]  }
 0x128   :  { %1950 = vst [vmem:[%s2673_s4 + $0x88] sm:$0xff] %v1831_v17   ;;  %v1634_v7 = vunpack.c.h.bf16 %v1906_v59 }
 0x129   :  { %v959_v33 = vadd.f32 %v1626_v14, %v591_v27  ;;  %v991_v34 = vadd.f32 %v1690_v15, %v719_v28  ;;  %v1022_v37 = vmax.f32 %v958_v25, 0.0  ;;  %v1054_v38 = vmax.f32 %v990_v26, 0.0  ;;  %v1923_v25 = vld [vmem:[%s2671_s3 + $0xa8] sm:$0xff]  }
 0x12a   :  { %v1637_v28 = vunpack.c.l.bf16 %v1907_v24  ;;  %v1701_v29 = vunpack.c.l.bf16 %v1923_v25 }
 0x12b   :  { %v1023_v39 = vmax.f32 %v959_v33, 0.0  ;;  %v1055_v40 = vmax.f32 %v991_v34, 0.0 }
 0x12c   :  { %v595_v41 = vpop.f32.mrb[12].mxu0  ;;  %v723_v42 = vpop.f32.mrb[12].mxu1 }
 0x12d   :  { %v1756_v45 = vpack.c.bf16 %v1023_v39, %v1022_v37  ;;  %v1836_v46 = vpack.c.bf16 %v1055_v40, %v1054_v38  ;;  %v596_v47 = vadd.f32 %v2417_v19, %v595_v41  ;;  %v724_v48 = vadd.f32 %v2417_v19, %v723_v42  ;;  %v597_v49 = vpop.f32.mrb[13].mxu0  ;;  %v725_v50 = vpop.f32.mrb[13].mxu1 }
 0x12e   :  { %v598_v51 = vpop.f32.mrb[14].mxu0  ;;  %v726_v52 = vpop.f32.mrb[14].mxu1  ;;  %v1702_v37 = vunpack.c.h.bf16 %v1923_v25 }
 0x12f   :  { %1935 = vst [vmem:[%s2673_s4 + $0x10] sm:$0xff] %v1756_v45   ;;  %1951 = vst [vmem:[%s2673_s4 + $0x90] sm:$0xff] %v1836_v46   ;;  %v960_v53 = vadd.f32 %v1629_v35, %v596_v47  ;;  %v992_v54 = vadd.f32 %v1693_v36, %v724_v48  ;;  %v599_v55 = vadd.f32 %v2417_v19, %v598_v51  ;;  %v600_v57 = vpop.f32.mrb[15].mxu0  ;;  %v728_v58 = vpop.f32.mrb[15].mxu1  ;;  %v1638_v36 = vunpack.c.h.bf16 %v1907_v24 }
 0x130   :  { %v727_v56 = vadd.f32 %v2417_v19, %v726_v52  ;;  %v1908_v52 = vld [vmem:[%s2671_s3 + $0x30] sm:$0xff]  }
 0x131   :  { %v961_v61 = vadd.f32 %v1630_v43, %v599_v55  ;;  %v1024_v1 = vmax.f32 %v960_v53, 0.0  ;;  %v1056_v2 = vmax.f32 %v992_v54, 0.0  ;;  %v1924_v53 = vld [vmem:[%s2671_s3 + $0xb0] sm:$0xff]  }
 0x132   :  { %v993_v62 = vadd.f32 %v1694_v44, %v727_v56  ;;  %v1641_v56 = vunpack.c.l.bf16 %v1908_v52  ;;  %v1705_v57 = vunpack.c.l.bf16 %v1924_v53 }
 0x133   :  { %v1025_v3 = vmax.f32 %v961_v61, 0.0 }
 0x134   :  { %v1057_v4 = vmax.f32 %v993_v62, 0.0  ;;  %v603_v5 = vpop.f32.mrb[16].mxu0  ;;  %v731_v6 = vpop.f32.mrb[16].mxu1 }
 0x135   :  { %v1761_v9 = vpack.c.bf16 %v1025_v3, %v1024_v1  ;;  %v604_v11 = vadd.f32 %v2417_v19, %v603_v5  ;;  %v732_v12 = vadd.f32 %v2417_v19, %v731_v6  ;;  %v605_v13 = vpop.f32.mrb[17].mxu0  ;;  %v733_v14 = vpop.f32.mrb[17].mxu1  ;;  %v1706_v1 = vunpack.c.h.bf16 %v1924_v53 }
 0x136   :  { %v1841_v10 = vpack.c.bf16 %v1057_v4, %v1056_v2  ;;  %v606_v15 = vpop.f32.mrb[18].mxu0  ;;  %v734_v16 = vpop.f32.mrb[18].mxu1 }
 0x137   :  { %1936 = vst [vmem:[%s2673_s4 + $0x18] sm:$0xff] %v1761_v9   ;;  %v962_v17 = vadd.f32 %v1633_v63, %v604_v11  ;;  %v994_v18 = vadd.f32 %v1697_v0, %v732_v12  ;;  %v607_v20 = vadd.f32 %v2417_v19, %v606_v15  ;;  %v735_v21 = vadd.f32 %v2417_v19, %v734_v16  ;;  %v608_v22 = vpop.f32.mrb[19].mxu0  ;;  %v736_v23 = vpop.f32.mrb[19].mxu1  ;;  %v1909_v16 = vld [vmem:[%s2671_s3 + $0x38] sm:$0xff]  }
 0x138   :  { %1952 = vst [vmem:[%s2673_s4 + $0x98] sm:$0xff] %v1841_v10   ;;  %v1642_v0 = vunpack.c.h.bf16 %v1908_v52 }
 0x139   :  { %v963_v26 = vadd.f32 %v1634_v7, %v607_v20  ;;  %v995_v27 = vadd.f32 %v1698_v8, %v735_v21  ;;  %v1026_v30 = vmax.f32 %v962_v17, 0.0  ;;  %v1058_v31 = vmax.f32 %v994_v18, 0.0  ;;  %v1925_v17 = vld [vmem:[%s2671_s3 + $0xb8] sm:$0xff]  }
 0x13a   :  { %v1645_v21 = vunpack.c.l.bf16 %v1909_v16  ;;  %v1709_v22 = vunpack.c.l.bf16 %v1925_v17 }
 0x13b   :  { %v1027_v32 = vmax.f32 %v963_v26, 0.0  ;;  %v1059_v33 = vmax.f32 %v995_v27, 0.0 }
 0x13c   :  { %v611_v34 = vpop.f32.mrb[20].mxu0  ;;  %v739_v35 = vpop.f32.mrb[20].mxu1 }
 0x13d   :  { %v1766_v38 = vpack.c.bf16 %v1027_v32, %v1026_v30  ;;  %v1846_v39 = vpack.c.bf16 %v1059_v33, %v1058_v31  ;;  %v612_v40 = vadd.f32 %v2417_v19, %v611_v34  ;;  %v740_v41 = vadd.f32 %v2417_v19, %v739_v35  ;;  %v613_v42 = vpop.f32.mrb[21].mxu0  ;;  %v741_v43 = vpop.f32.mrb[21].mxu1 }
 0x13e   :  { %v614_v44 = vpop.f32.mrb[22].mxu0  ;;  %v742_v45 = vpop.f32.mrb[22].mxu1  ;;  %v1710_v30 = vunpack.c.h.bf16 %v1925_v17 }
 0x13f   :  { %1937 = vst [vmem:[%s2673_s4 + $0x20] sm:$0xff] %v1766_v38   ;;  %1953 = vst [vmem:[%s2673_s4 + $0xa0] sm:$0xff] %v1846_v39   ;;  %v964_v46 = vadd.f32 %v1637_v28, %v612_v40  ;;  %v996_v47 = vadd.f32 %v1701_v29, %v740_v41  ;;  %v615_v48 = vadd.f32 %v2417_v19, %v614_v44  ;;  %v616_v50 = vpop.f32.mrb[23].mxu0  ;;  %v744_v51 = vpop.f32.mrb[23].mxu1  ;;  %v1646_v29 = vunpack.c.h.bf16 %v1909_v16 }
 0x140   :  { %v743_v49 = vadd.f32 %v2417_v19, %v742_v45  ;;  %v1910_v45 = vld [vmem:[%s2671_s3 + $0x40] sm:$0xff]  }
 0x141   :  { %v965_v54 = vadd.f32 %v1638_v36, %v615_v48  ;;  %v1028_v58 = vmax.f32 %v964_v46, 0.0  ;;  %v1060_v59 = vmax.f32 %v996_v47, 0.0  ;;  %v1926_v46 = vld [vmem:[%s2671_s3 + $0xc0] sm:$0xff]  }
 0x142   :  { %v997_v55 = vadd.f32 %v1702_v37, %v743_v49  ;;  %v1649_v49 = vunpack.c.l.bf16 %v1910_v45  ;;  %v1713_v50 = vunpack.c.l.bf16 %v1926_v46 }
 0x143   :  { %v1029_v60 = vmax.f32 %v965_v54, 0.0 }
 0x144   :  { %v1061_v61 = vmax.f32 %v997_v55, 0.0  ;;  %v619_v62 = vpop.f32.mrb[24].mxu0  ;;  %v747_v63 = vpop.f32.mrb[24].mxu1 }
 0x145   :  { %v1771_v2 = vpack.c.bf16 %v1029_v60, %v1028_v58  ;;  %v620_v4 = vadd.f32 %v2417_v19, %v619_v62  ;;  %v748_v5 = vadd.f32 %v2417_v19, %v747_v63  ;;  %v621_v6 = vpop.f32.mrb[25].mxu0  ;;  %v749_v7 = vpop.f32.mrb[25].mxu1  ;;  %v1714_v58 = vunpack.c.h.bf16 %v1926_v46 }
 0x146   :  { %v1851_v3 = vpack.c.bf16 %v1061_v61, %v1060_v59  ;;  %v622_v8 = vpop.f32.mrb[26].mxu0  ;;  %v750_v9 = vpop.f32.mrb[26].mxu1 }
 0x147   :  { %1938 = vst [vmem:[%s2673_s4 + $0x28] sm:$0xff] %v1771_v2   ;;  %v966_v10 = vadd.f32 %v1641_v56, %v620_v4  ;;  %v998_v11 = vadd.f32 %v1705_v57, %v748_v5  ;;  %v623_v12 = vadd.f32 %v2417_v19, %v622_v8  ;;  %v751_v13 = vadd.f32 %v2417_v19, %v750_v9  ;;  %v624_v14 = vpop.f32.mrb[27].mxu0  ;;  %v752_v15 = vpop.f32.mrb[27].mxu1  ;;  %v1911_v9 = vld [vmem:[%s2671_s3 + $0x48] sm:$0xff]  }
 0x148   :  { %1954 = vst [vmem:[%s2673_s4 + $0xa8] sm:$0xff] %v1851_v3   ;;  %v1650_v57 = vunpack.c.h.bf16 %v1910_v45 }
 0x149   :  { %v967_v18 = vadd.f32 %v1642_v0, %v623_v12  ;;  %v999_v20 = vadd.f32 %v1706_v1, %v751_v13  ;;  %v1030_v23 = vmax.f32 %v966_v10, 0.0  ;;  %v1062_v24 = vmax.f32 %v998_v11, 0.0  ;;  %v1927_v10 = vld [vmem:[%s2671_s3 + $0xc8] sm:$0xff]  }
 0x14a   :  { %v1653_v13 = vunpack.c.l.bf16 %v1911_v9  ;;  %v1717_v14 = vunpack.c.l.bf16 %v1927_v10 }
 0x14b   :  { %v1031_v25 = vmax.f32 %v967_v18, 0.0  ;;  %v1063_v26 = vmax.f32 %v999_v20, 0.0 }
 0x14c   :  { %v627_v27 = vpop.f32.mrb[28].mxu0  ;;  %v755_v28 = vpop.f32.mrb[28].mxu1 }
 0x14d   :  { %v1776_v31 = vpack.c.bf16 %v1031_v25, %v1030_v23  ;;  %v1856_v32 = vpack.c.bf16 %v1063_v26, %v1062_v24  ;;  %v628_v33 = vadd.f32 %v2417_v19, %v627_v27  ;;  %v756_v34 = vadd.f32 %v2417_v19, %v755_v28  ;;  %v629_v35 = vpop.f32.mrb[29].mxu0  ;;  %v757_v36 = vpop.f32.mrb[29].mxu1 }
 0x14e   :  { %v630_v37 = vpop.f32.mrb[30].mxu0  ;;  %v758_v38 = vpop.f32.mrb[30].mxu1  ;;  %v1718_v23 = vunpack.c.h.bf16 %v1927_v10 }
 0x14f   :  { %1939 = vst [vmem:[%s2673_s4 + $0x30] sm:$0xff] %v1776_v31   ;;  %1955 = vst [vmem:[%s2673_s4 + $0xb0] sm:$0xff] %v1856_v32   ;;  %v968_v39 = vadd.f32 %v1645_v21, %v628_v33  ;;  %v1000_v40 = vadd.f32 %v1709_v22, %v756_v34  ;;  %v631_v41 = vadd.f32 %v2417_v19, %v630_v37  ;;  %v632_v43 = vpop.f32.mrb[31].mxu0  ;;  %v760_v44 = vpop.f32.mrb[31].mxu1  ;;  %v1654_v22 = vunpack.c.h.bf16 %v1911_v9 }
 0x150   :  { %v759_v42 = vadd.f32 %v2417_v19, %v758_v38  ;;  %v1912_v38 = vld [vmem:[%s2671_s3 + $0x50] sm:$0xff]  }
 0x151   :  { %v969_v47 = vadd.f32 %v1646_v29, %v631_v41  ;;  %v1032_v51 = vmax.f32 %v968_v39, 0.0  ;;  %v1064_v52 = vmax.f32 %v1000_v40, 0.0  ;;  %v1928_v39 = vld [vmem:[%s2671_s3 + $0xd0] sm:$0xff]  }
 0x152   :  { %v1001_v48 = vadd.f32 %v1710_v30, %v759_v42  ;;  %v1657_v42 = vunpack.c.l.bf16 %v1912_v38  ;;  %v1721_v43 = vunpack.c.l.bf16 %v1928_v39 }
 0x153   :  { %v1033_v53 = vmax.f32 %v969_v47, 0.0 }
 0x154   :  { %v1065_v54 = vmax.f32 %v1001_v48, 0.0  ;;  %v635_v55 = vpop.f32.mrb[32].mxu0  ;;  %v763_v56 = vpop.f32.mrb[32].mxu1 }
 0x155   :  { %v1781_v59 = vpack.c.bf16 %v1033_v53, %v1032_v51  ;;  %v636_v61 = vadd.f32 %v2417_v19, %v635_v55  ;;  %v764_v62 = vadd.f32 %v2417_v19, %v763_v56  ;;  %v637_v63 = vpop.f32.mrb[33].mxu0  ;;  %v765_v0 = vpop.f32.mrb[33].mxu1  ;;  %v1722_v51 = vunpack.c.h.bf16 %v1928_v39 }
 0x156   :  { %v1861_v60 = vpack.c.bf16 %v1065_v54, %v1064_v52  ;;  %v638_v1 = vpop.f32.mrb[34].mxu0  ;;  %v766_v2 = vpop.f32.mrb[34].mxu1 }
 0x157   :  { %1940 = vst [vmem:[%s2673_s4 + $0x38] sm:$0xff] %v1781_v59   ;;  %v970_v3 = vadd.f32 %v1649_v49, %v636_v61  ;;  %v1002_v4 = vadd.f32 %v1713_v50, %v764_v62  ;;  %v639_v5 = vadd.f32 %v2417_v19, %v638_v1  ;;  %v767_v6 = vadd.f32 %v2417_v19, %v766_v2  ;;  %v640_v7 = vpop.f32.mrb[35].mxu0  ;;  %v768_v8 = vpop.f32.mrb[35].mxu1  ;;  %v1913_v2 = vld [vmem:[%s2671_s3 + $0x58] sm:$0xff]  }
 0x158   :  { %1956 = vst [vmem:[%s2673_s4 + $0xb8] sm:$0xff] %v1861_v60   ;;  %v1658_v50 = vunpack.c.h.bf16 %v1912_v38 }
 0x159   :  { %v971_v11 = vadd.f32 %v1650_v57, %v639_v5  ;;  %v1003_v12 = vadd.f32 %v1714_v58, %v767_v6  ;;  %v1034_v15 = vmax.f32 %v970_v3, 0.0  ;;  %v1066_v16 = vmax.f32 %v1002_v4, 0.0  ;;  %v1929_v3 = vld [vmem:[%s2671_s3 + $0xd8] sm:$0xff]  }
 0x15a   :  { %v1661_v6 = vunpack.c.l.bf16 %v1913_v2  ;;  %v1725_v7 = vunpack.c.l.bf16 %v1929_v3 }
 0x15b   :  { %v1035_v17 = vmax.f32 %v971_v11, 0.0  ;;  %v1067_v18 = vmax.f32 %v1003_v12, 0.0 }
 0x15c   :  { %v643_v20 = vpop.f32.mrb[36].mxu0  ;;  %v771_v21 = vpop.f32.mrb[36].mxu1 }
 0x15d   :  { %v1786_v24 = vpack.c.bf16 %v1035_v17, %v1034_v15  ;;  %v1866_v25 = vpack.c.bf16 %v1067_v18, %v1066_v16  ;;  %v644_v26 = vadd.f32 %v2417_v19, %v643_v20  ;;  %v772_v27 = vadd.f32 %v2417_v19, %v771_v21  ;;  %v645_v28 = vpop.f32.mrb[37].mxu0  ;;  %v773_v29 = vpop.f32.mrb[37].mxu1 }
 0x15e   :  { %v646_v30 = vpop.f32.mrb[38].mxu0  ;;  %v774_v31 = vpop.f32.mrb[38].mxu1  ;;  %v1726_v15 = vunpack.c.h.bf16 %v1929_v3 }
 0x15f   :  { %1941 = vst [vmem:[%s2673_s4 + $0x40] sm:$0xff] %v1786_v24   ;;  %1957 = vst [vmem:[%s2673_s4 + $0xc0] sm:$0xff] %v1866_v25   ;;  %v972_v32 = vadd.f32 %v1653_v13, %v644_v26  ;;  %v1004_v33 = vadd.f32 %v1717_v14, %v772_v27  ;;  %v647_v34 = vadd.f32 %v2417_v19, %v646_v30  ;;  %v648_v36 = vpop.f32.mrb[39].mxu0  ;;  %v776_v37 = vpop.f32.mrb[39].mxu1  ;;  %v1662_v14 = vunpack.c.h.bf16 %v1913_v2 }
 0x160   :  { %v775_v35 = vadd.f32 %v2417_v19, %v774_v31  ;;  %v1914_v31 = vld [vmem:[%s2671_s3 + $0x60] sm:$0xff]  }
 0x161   :  { %v973_v40 = vadd.f32 %v1654_v22, %v647_v34  ;;  %v1036_v44 = vmax.f32 %v972_v32, 0.0  ;;  %v1068_v45 = vmax.f32 %v1004_v33, 0.0  ;;  %v1930_v32 = vld [vmem:[%s2671_s3 + $0xe0] sm:$0xff]  }
 0x162   :  { %v1005_v41 = vadd.f32 %v1718_v23, %v775_v35  ;;  %v1665_v35 = vunpack.c.l.bf16 %v1914_v31  ;;  %v1729_v36 = vunpack.c.l.bf16 %v1930_v32 }
 0x163   :  { %v1037_v46 = vmax.f32 %v973_v40, 0.0 }
 0x164   :  { %v1069_v47 = vmax.f32 %v1005_v41, 0.0  ;;  %v651_v48 = vpop.f32.mrb[40].mxu0  ;;  %v779_v49 = vpop.f32.mrb[40].mxu1 }
 0x165   :  { %v1791_v52 = vpack.c.bf16 %v1037_v46, %v1036_v44  ;;  %v652_v54 = vadd.f32 %v2417_v19, %v651_v48  ;;  %v780_v55 = vadd.f32 %v2417_v19, %v779_v49  ;;  %v653_v56 = vpop.f32.mrb[41].mxu0  ;;  %v781_v57 = vpop.f32.mrb[41].mxu1  ;;  %v1730_v44 = vunpack.c.h.bf16 %v1930_v32 }
 0x166   :  { %v1871_v53 = vpack.c.bf16 %v1069_v47, %v1068_v45  ;;  %v654_v58 = vpop.f32.mrb[42].mxu0  ;;  %v782_v59 = vpop.f32.mrb[42].mxu1 }
 0x167   :  { %1942 = vst [vmem:[%s2673_s4 + $0x48] sm:$0xff] %v1791_v52   ;;  %v974_v60 = vadd.f32 %v1657_v42, %v652_v54  ;;  %v1006_v61 = vadd.f32 %v1721_v43, %v780_v55  ;;  %v655_v62 = vadd.f32 %v2417_v19, %v654_v58  ;;  %v783_v63 = vadd.f32 %v2417_v19, %v782_v59  ;;  %v656_v0 = vpop.f32.mrb[43].mxu0  ;;  %v784_v1 = vpop.f32.mrb[43].mxu1  ;;  %v1915_v59 = vld [vmem:[%s2671_s3 + $0x68] sm:$0xff]  }
 0x168   :  { %1958 = vst [vmem:[%s2673_s4 + $0xc8] sm:$0xff] %v1871_v53   ;;  %v1666_v43 = vunpack.c.h.bf16 %v1914_v31 }
 0x169   :  { %v975_v4 = vadd.f32 %v1658_v50, %v655_v62  ;;  %v1007_v5 = vadd.f32 %v1722_v51, %v783_v63  ;;  %v1038_v8 = vmax.f32 %v974_v60, 0.0  ;;  %v1070_v9 = vmax.f32 %v1006_v61, 0.0  ;;  %v1931_v60 = vld [vmem:[%s2671_s3 + $0xe8] sm:$0xff]  }
 0x16a   :  { %v1669_v63 = vunpack.c.l.bf16 %v1915_v59  ;;  %v1733_v0 = vunpack.c.l.bf16 %v1931_v60 }
 0x16b   :  { %v1039_v10 = vmax.f32 %v975_v4, 0.0  ;;  %v1071_v11 = vmax.f32 %v1007_v5, 0.0 }
 0x16c   :  { %v659_v12 = vpop.f32.mrb[44].mxu0  ;;  %v787_v13 = vpop.f32.mrb[44].mxu1 }
 0x16d   :  { %v1796_v16 = vpack.c.bf16 %v1039_v10, %v1038_v8  ;;  %v1876_v17 = vpack.c.bf16 %v1071_v11, %v1070_v9  ;;  %v660_v18 = vadd.f32 %v2417_v19, %v659_v12  ;;  %v788_v20 = vadd.f32 %v2417_v19, %v787_v13  ;;  %v661_v21 = vpop.f32.mrb[45].mxu0  ;;  %v789_v22 = vpop.f32.mrb[45].mxu1 }
 0x16e   :  { %v662_v23 = vpop.f32.mrb[46].mxu0  ;;  %v790_v24 = vpop.f32.mrb[46].mxu1  ;;  %v1734_v8 = vunpack.c.h.bf16 %v1931_v60 }
 0x16f   :  { %1943 = vst [vmem:[%s2673_s4 + $0x50] sm:$0xff] %v1796_v16   ;;  %1959 = vst [vmem:[%s2673_s4 + $0xd0] sm:$0xff] %v1876_v17   ;;  %v976_v25 = vadd.f32 %v1661_v6, %v660_v18  ;;  %v1008_v26 = vadd.f32 %v1725_v7, %v788_v20  ;;  %v663_v27 = vadd.f32 %v2417_v19, %v662_v23  ;;  %v664_v29 = vpop.f32.mrb[47].mxu0  ;;  %v792_v30 = vpop.f32.mrb[47].mxu1  ;;  %v1670_v7 = vunpack.c.h.bf16 %v1915_v59 }
 0x170   :  { %v791_v28 = vadd.f32 %v2417_v19, %v790_v24  ;;  %v1916_v24 = vld [vmem:[%s2671_s3 + $0x70] sm:$0xff]  }
 0x171   :  { %v977_v33 = vadd.f32 %v1662_v14, %v663_v27  ;;  %v1040_v37 = vmax.f32 %v976_v25, 0.0  ;;  %v1072_v38 = vmax.f32 %v1008_v26, 0.0  ;;  %v1932_v25 = vld [vmem:[%s2671_s3 + $0xf0] sm:$0xff]  }
 0x172   :  { %v1009_v34 = vadd.f32 %v1726_v15, %v791_v28  ;;  %v1673_v28 = vunpack.c.l.bf16 %v1916_v24  ;;  %v1737_v29 = vunpack.c.l.bf16 %v1932_v25 }
 0x173   :  { %v1041_v39 = vmax.f32 %v977_v33, 0.0 }
 0x174   :  { %v1073_v40 = vmax.f32 %v1009_v34, 0.0  ;;  %v667_v41 = vpop.f32.mrb[48].mxu0  ;;  %v795_v42 = vpop.f32.mrb[48].mxu1 }
 0x175   :  { %v1801_v45 = vpack.c.bf16 %v1041_v39, %v1040_v37  ;;  %v668_v47 = vadd.f32 %v2417_v19, %v667_v41  ;;  %v796_v48 = vadd.f32 %v2417_v19, %v795_v42  ;;  %v669_v49 = vpop.f32.mrb[49].mxu0  ;;  %v797_v50 = vpop.f32.mrb[49].mxu1  ;;  %v1738_v37 = vunpack.c.h.bf16 %v1932_v25 }
 0x176   :  { %v1881_v46 = vpack.c.bf16 %v1073_v40, %v1072_v38  ;;  %v670_v51 = vpop.f32.mrb[50].mxu0  ;;  %v798_v52 = vpop.f32.mrb[50].mxu1 }
 0x177   :  { %1944 = vst [vmem:[%s2673_s4 + $0x58] sm:$0xff] %v1801_v45   ;;  %v978_v53 = vadd.f32 %v1665_v35, %v668_v47  ;;  %v1010_v54 = vadd.f32 %v1729_v36, %v796_v48  ;;  %v671_v55 = vadd.f32 %v2417_v19, %v670_v51  ;;  %v799_v56 = vadd.f32 %v2417_v19, %v798_v52  ;;  %v672_v57 = vpop.f32.mrb[51].mxu0  ;;  %v800_v58 = vpop.f32.mrb[51].mxu1  ;;  %v1917_v52 = vld [vmem:[%s2671_s3 + $0x78] sm:$0xff]  }
 0x178   :  { %1960 = vst [vmem:[%s2673_s4 + $0xd8] sm:$0xff] %v1881_v46   ;;  %v1674_v36 = vunpack.c.h.bf16 %v1916_v24 }
 0x179   :  { %v979_v61 = vadd.f32 %v1666_v43, %v671_v55  ;;  %v1011_v62 = vadd.f32 %v1730_v44, %v799_v56  ;;  %v1042_v1 = vmax.f32 %v978_v53, 0.0  ;;  %v1074_v2 = vmax.f32 %v1010_v54, 0.0  ;;  %v1933_v53 = vld [vmem:[%s2671_s3 + $0xf8] sm:$0xff]  }
 0x17a   :  { %v1677_v56 = vunpack.c.l.bf16 %v1917_v52  ;;  %v1741_v57 = vunpack.c.l.bf16 %v1933_v53 }
 0x17b   :  { %v1043_v3 = vmax.f32 %v979_v61, 0.0  ;;  %v1075_v4 = vmax.f32 %v1011_v62, 0.0 }
 0x17c   :  { %v675_v5 = vpop.f32.mrb[52].mxu0  ;;  %v803_v6 = vpop.f32.mrb[52].mxu1 }
 0x17d   :  { %v1806_v9 = vpack.c.bf16 %v1043_v3, %v1042_v1  ;;  %v1886_v10 = vpack.c.bf16 %v1075_v4, %v1074_v2  ;;  %v676_v11 = vadd.f32 %v2417_v19, %v675_v5  ;;  %v804_v12 = vadd.f32 %v2417_v19, %v803_v6  ;;  %v677_v13 = vpop.f32.mrb[53].mxu0  ;;  %v805_v14 = vpop.f32.mrb[53].mxu1 }
 0x17e   :  { %v678_v15 = vpop.f32.mrb[54].mxu0  ;;  %v806_v16 = vpop.f32.mrb[54].mxu1  ;;  %v1742_v1 = vunpack.c.h.bf16 %v1933_v53 }
 0x17f   :  { %1945 = vst [vmem:[%s2673_s4 + $0x60] sm:$0xff] %v1806_v9   ;;  %1961 = vst [vmem:[%s2673_s4 + $0xe0] sm:$0xff] %v1886_v10   ;;  %v980_v17 = vadd.f32 %v1669_v63, %v676_v11  ;;  %v1012_v18 = vadd.f32 %v1733_v0, %v804_v12  ;;  %v679_v20 = vadd.f32 %v2417_v19, %v678_v15  ;;  %v680_v22 = vpop.f32.mrb[55].mxu0  ;;  %v808_v23 = vpop.f32.mrb[55].mxu1  ;;  %v1678_v0 = vunpack.c.h.bf16 %v1917_v52 }
 0x180   :  { %v807_v21 = vadd.f32 %v2417_v19, %v806_v16 }
 0x181   :  { %v981_v26 = vadd.f32 %v1670_v7, %v679_v20  ;;  %v1044_v30 = vmax.f32 %v980_v17, 0.0  ;;  %v1076_v31 = vmax.f32 %v1012_v18, 0.0 }
 0x182   :  { %v1013_v27 = vadd.f32 %v1734_v8, %v807_v21 }
 0x183   :  { %v1045_v32 = vmax.f32 %v981_v26, 0.0 }
 0x184   :  { %v1077_v33 = vmax.f32 %v1013_v27, 0.0  ;;  %v683_v34 = vpop.f32.mrb[56].mxu0  ;;  %v811_v35 = vpop.f32.mrb[56].mxu1 }
 0x185   :  { %v1811_v38 = vpack.c.bf16 %v1045_v32, %v1044_v30  ;;  %v684_v40 = vadd.f32 %v2417_v19, %v683_v34  ;;  %v812_v41 = vadd.f32 %v2417_v19, %v811_v35  ;;  %v685_v42 = vpop.f32.mrb[57].mxu0  ;;  %v813_v43 = vpop.f32.mrb[57].mxu1 }
 0x186   :  { %v1891_v39 = vpack.c.bf16 %v1077_v33, %v1076_v31  ;;  %v686_v44 = vpop.f32.mrb[58].mxu0  ;;  %v814_v45 = vpop.f32.mrb[58].mxu1 }
 0x187   :  { %1946 = vst [vmem:[%s2673_s4 + $0x68] sm:$0xff] %v1811_v38   ;;  %v982_v46 = vadd.f32 %v1673_v28, %v684_v40  ;;  %v1014_v47 = vadd.f32 %v1737_v29, %v812_v41  ;;  %v687_v48 = vadd.f32 %v2417_v19, %v686_v44  ;;  %v815_v49 = vadd.f32 %v2417_v19, %v814_v45  ;;  %v688_v50 = vpop.f32.mrb[59].mxu0  ;;  %v816_v51 = vpop.f32.mrb[59].mxu1 }
 0x188   :  { %1962 = vst [vmem:[%s2673_s4 + $0xe8] sm:$0xff] %v1891_v39  }
 0x189   :  { %v983_v54 = vadd.f32 %v1674_v36, %v687_v48  ;;  %v1015_v55 = vadd.f32 %v1738_v37, %v815_v49  ;;  %v1046_v58 = vmax.f32 %v982_v46, 0.0  ;;  %v1078_v59 = vmax.f32 %v1014_v47, 0.0 }
 0x18b   :  { %v1047_v60 = vmax.f32 %v983_v54, 0.0  ;;  %v1079_v61 = vmax.f32 %v1015_v55, 0.0 }
 0x18c   :  { %v691_v62 = vpop.f32.mrb[60].mxu0  ;;  %v819_v63 = vpop.f32.mrb[60].mxu1 }
 0x18d   :  { %v1816_v2 = vpack.c.bf16 %v1047_v60, %v1046_v58  ;;  %v1896_v3 = vpack.c.bf16 %v1079_v61, %v1078_v59  ;;  %v692_v4 = vadd.f32 %v2417_v19, %v691_v62  ;;  %v820_v5 = vadd.f32 %v2417_v19, %v819_v63  ;;  %v693_v6 = vpop.f32.mrb[61].mxu0  ;;  %v821_v7 = vpop.f32.mrb[61].mxu1 }
 0x18e   :  { %v694_v8 = vpop.f32.mrb[62].mxu0  ;;  %v822_v9 = vpop.f32.mrb[62].mxu1 }
 0x18f   :  { %1947 = vst [vmem:[%s2673_s4 + $0x70] sm:$0xff] %v1816_v2   ;;  %1963 = vst [vmem:[%s2673_s4 + $0xf0] sm:$0xff] %v1896_v3   ;;  %v984_v10 = vadd.f32 %v1677_v56, %v692_v4  ;;  %v1016_v11 = vadd.f32 %v1741_v57, %v820_v5  ;;  %v695_v12 = vadd.f32 %v2417_v19, %v694_v8  ;;  %v696_v14 = vpop.f32.mrb[63].mxu0  ;;  %v824_v15 = vpop.f32.mrb[63].mxu1 }
 0x190   :  { %v823_v13 = vadd.f32 %v2417_v19, %v822_v9 }
 0x191   :  { %v985_v16 = vadd.f32 %v1678_v0, %v695_v12  ;;  %v1048_v18 = vmax.f32 %v984_v10, 0.0  ;;  %v1080_v20 = vmax.f32 %v1016_v11, 0.0 }
 0x192   :  { %v1017_v17 = vadd.f32 %v1742_v1, %v823_v13 }
 0x193   :  { %v1049_v21 = vmax.f32 %v985_v16, 0.0 }
 0x194   :  { %v1081_v22 = vmax.f32 %v1017_v17, 0.0 }
 0x195   :  { %v1821_v23 = vpack.c.bf16 %v1049_v21, %v1048_v18 }
 0x196   :  { %v1901_v24 = vpack.c.bf16 %v1081_v22, %v1080_v20 }
 0x197   :  { %1948 = vst [vmem:[%s2673_s4 + $0x78] sm:$0xff] %v1821_v23  }
 0x198   :  { %1964 = vst [vmem:[%s2673_s4 + $0xf8] sm:$0xff] %v1901_v24  }

// kernel: forward.11
= control target key start
LH: loop header
LB: loop body
LE: loop exit
PB: predicated region body
PF: predicated region fallthrough
CT: control target
= control target key end

     0   :  { %s836_s1 = inlined_call_operand.vmem [shape: bf16[256,128], index: 1, kind: input, shape index: {}]   ;;  %s837_s0 = inlined_call_operand.vmem [shape: bf16[128,256], index: 0, kind: input, shape index: {}]   ;;  %s838_s2 = inlined_call_operand.vmem [shape: f32[1,128], index: 2, kind: input, shape index: {}]   ;;  %s839_s3 = inlined_call_operand.vmem [shape: bf16[128,128], index: 3, kind: output, shape index: {}]  }
   0x1   :  { %v635_v0 = vld [vmem:[%s836_s1 + $0x40] sm:$0xff]   ;;  %v637_v2 = vld [vmem:[%s836_s1 + $0x48] sm:$0xff]   ;;  %v639_v4 = vld [vmem:[%s836_s1 + $0x50] sm:$0xff]  }
   0x2   :  { %v636_v1 = vld [vmem:[%s836_s1] sm:$0xff]   ;;  %555 = vmatprep.subr.bf16.mxu0 %v635_v0  ;;  %619 = vmatprep.subr.bf16.mxu1 %v635_v0  ;;  %v638_v3 = vld [vmem:[%s836_s1 + $0x8] sm:$0xff]   ;;  %v640_v5 = vld [vmem:[%s836_s1 + $0x10] sm:$0xff]  }
   0x3   :  { %556 = vmatpush3.bf16.msra.mxu0 %v636_v1  ;;  %627 = vmatpush3.bf16.msra.mxu1 %v636_v1  ;;  %v641_v6 = vld [vmem:[%s836_s1 + $0x58] sm:$0xff]   ;;  %v643_v8 = vld [vmem:[%s836_s1 + $0x60] sm:$0xff]   ;;  %v645_v10 = vld [vmem:[%s836_s1 + $0x68] sm:$0xff]  }
   0x4   :  { %557 = vmatprep.subr.bf16.mxu0 %v637_v2  ;;  %620 = vmatprep.subr.bf16.mxu1 %v637_v2  ;;  %v642_v7 = vld [vmem:[%s836_s1 + $0x18] sm:$0xff]   ;;  %v644_v9 = vld [vmem:[%s836_s1 + $0x20] sm:$0xff]   ;;  %v646_v13 = vld [vmem:[%s836_s1 + $0x28] sm:$0xff]  }
   0x5   :  { %v653_v11 = vld [vmem:[%s837_s0 + $0x4] ss:$8 sps:$4 sm:$0xff]   ;;  %v647_v14 = vld [vmem:[%s836_s1 + $0x70] sm:$0xff]   ;;  %v649_v16 = vld [vmem:[%s836_s1 + $0x78] sm:$0xff]  }
   0x6   :  { %v656_v12 = vld [vmem:[%s837_s0 + $0x44] ss:$8 sps:$4 sm:$0xff]   ;;  %278 = vmatprep.mubr.bf16.mxu0 %v653_v11  ;;  %v648_v15 = vld [vmem:[%s836_s1 + $0x30] sm:$0xff]   ;;  %v650_v17 = vld [vmem:[%s836_s1 + $0x38] sm:$0xff]  }
   0x7   :  { %558 = vmatpush3.bf16.msra.mxu0 %v638_v3  ;;  %628 = vmatpush3.bf16.msra.mxu1 %v638_v3  ;;  %v651_v18 = vld [vmem:[%s837_s0] ss:$8 sps:$4 sm:$0xff]   ;;  %v657_v20 = vld [vmem:[%s837_s0 + $0x14] ss:$8 sps:$4 sm:$0xff]   ;;  %v661_v22 = vld [vmem:[%s837_s0 + $0x10] ss:$8 sps:$4 sm:$0xff]  }
   0x8   :  { %559 = vmatprep.subr.bf16.mxu0 %v639_v4  ;;  %621 = vmatprep.subr.bf16.mxu1 %v639_v4  ;;  %v654_v19 = vld [vmem:[%s837_s0 + $0x40] ss:$8 sps:$4 sm:$0xff]   ;;  %v659_v21 = vld [vmem:[%s837_s0 + $0x54] ss:$8 sps:$4 sm:$0xff]   ;;  %v662_v23 = vld [vmem:[%s837_s0 + $0x50] ss:$8 sps:$4 sm:$0xff]  }
   0x9   :  { %310 = vmatprep.mubr.bf16.mxu1 %v656_v12  ;;  %v663_v24 = vld [vmem:[%s837_s0 + $0x24] ss:$8 sps:$4 sm:$0xff]   ;;  %v667_v26 = vld [vmem:[%s837_s0 + $0x20] ss:$8 sps:$4 sm:$0xff]   ;;  %v669_v28 = vld [vmem:[%s837_s0 + $0x34] ss:$8 sps:$4 sm:$0xff]  }
   0xa   :  { %v665_v25 = vld [vmem:[%s837_s0 + $0x64] ss:$8 sps:$4 sm:$0xff]   ;;  %v668_v27 = vld [vmem:[%s837_s0 + $0x60] ss:$8 sps:$4 sm:$0xff]   ;;  %v671_v29 = vld [vmem:[%s837_s0 + $0x74] ss:$8 sps:$4 sm:$0xff]  }
   0xb   :  { %560 = vmatpush3.bf16.msra.mxu0 %v640_v5  ;;  %629 = vmatpush3.bf16.msra.mxu1 %v640_v5  ;;  %v673_v30 = vld [vmem:[%s837_s0 + $0x30] ss:$8 sps:$4 sm:$0xff]   ;;  %v794_v34 = vld [vmem:[%s838_s2] ss:$0 sm:$0xff] }
   0xc   :  { %561 = vmatprep.subr.bf16.mxu0 %v641_v6  ;;  %622 = vmatprep.subr.bf16.mxu1 %v641_v6  ;;  %v674_v31 = vld [vmem:[%s837_s0 + $0x70] ss:$8 sps:$4 sm:$0xff]  }
   0xf   :  { %562 = vmatpush3.bf16.msra.mxu0 %v642_v7  ;;  %630 = vmatpush3.bf16.msra.mxu1 %v642_v7 }
  0x10   :  { %563 = vmatprep.subr.bf16.mxu0 %v643_v8  ;;  %623 = vmatprep.subr.bf16.mxu1 %v643_v8 }
  0x13   :  { %564 = vmatpush3.bf16.msra.mxu0 %v644_v9  ;;  %631 = vmatpush3.bf16.msra.mxu1 %v644_v9 }
  0x14   :  { %565 = vmatprep.subr.bf16.mxu0 %v645_v10  ;;  %624 = vmatprep.subr.bf16.mxu1 %v645_v10 }
  0x17   :  { %566 = vmatpush3.bf16.msra.mxu0 %v646_v13  ;;  %632 = vmatpush3.bf16.msra.mxu1 %v646_v13 }
  0x18   :  { %567 = vmatprep.subr.bf16.mxu0 %v647_v14  ;;  %625 = vmatprep.subr.bf16.mxu1 %v647_v14 }
  0x1b   :  { %568 = vmatpush3.bf16.msra.mxu0 %v648_v15  ;;  %633 = vmatpush3.bf16.msra.mxu1 %v648_v15 }
  0x1c   :  { %569 = vmatprep.subr.bf16.mxu0 %v649_v16  ;;  %626 = vmatprep.subr.bf16.mxu1 %v649_v16 }
  0x1f   :  { %570 = vmatpush3.bf16.msra.mxu0 %v650_v17  ;;  %634 = vmatpush3.bf16.msra.mxu1 %v650_v17 }
  0x22   :  { %279 = vmatmul.mubr.bf16.vlgmr.msra.gmra.mrb[0].mxu0 %v651_v18  ;;  %311 = vmatmul.mubr.bf16.vlgmr.msra.gmra.mrb[0].mxu1 %v654_v19 }
  0x23   :  { %286 = vmatprep.mubr.bf16.mxu0 %v657_v20  ;;  %318 = vmatprep.mubr.bf16.mxu1 %v659_v21 }
  0x2a   :  { %287 = vmatmul.mubr.bf16.gmra.mrb[4].mxu0 %v661_v22  ;;  %319 = vmatmul.mubr.bf16.gmra.mrb[4].mxu1 %v662_v23 }
  0x2b   :  { %294 = vmatprep.mubr.bf16.mxu0 %v663_v24  ;;  %326 = vmatprep.mubr.bf16.mxu1 %v665_v25 }
  0x32   :  { %295 = vmatmul.mubr.bf16.gmra.mrb[8].mxu0 %v667_v26  ;;  %327 = vmatmul.mubr.bf16.gmra.mrb[8].mxu1 %v668_v27 }
  0x33   :  { %302 = vmatprep.mubr.bf16.mxu0 %v669_v28  ;;  %334 = vmatprep.mubr.bf16.mxu1 %v671_v29 }
  0x3a   :  { %303 = vmatmul.mubr.bf16.gmra.mrb[12].mxu0 %v673_v30  ;;  %335 = vmatmul.mubr.bf16.gmra.mrb[12].mxu1 %v674_v31 }
  0xf5   :  { %v571_v32 = vpop.f32.mrb[0].mxu0  ;;  %v595_v33 = vpop.f32.mrb[0].mxu1 }
  0xf6   :  { %v572_v35 = vpop.f32.mrb[1].mxu0  ;;  %v596_v36 = vpop.f32.mrb[1].mxu1 }
  0xf7   :  { %v573_v37 = vadd.f32 %v572_v35, %v571_v32  ;;  %v597_v38 = vadd.f32 %v596_v36, %v595_v33  ;;  %v574_v39 = vpop.f32.mrb[2].mxu0  ;;  %v598_v40 = vpop.f32.mrb[2].mxu1 }
  0xf8   :  { %v575_v41 = vpop.f32.mrb[3].mxu0  ;;  %v599_v42 = vpop.f32.mrb[3].mxu1 }
  0xf9   :  { %v281_v43 = vadd.f32 %v573_v37, %v794_v34  ;;  %v313_v44 = vadd.f32 %v597_v38, %v794_v34  ;;  %v576_v45 = vadd.f32 %v575_v41, %v574_v39  ;;  %v600_v46 = vadd.f32 %v599_v42, %v598_v40 }
  0xfb   :  { %v284_v47 = vadd.f32 %v576_v45, %v794_v34  ;;  %v316_v48 = vadd.f32 %v600_v46, %v794_v34  ;;  %v343_v49 = vmax.f32 %v281_v43, 0.0  ;;  %v351_v50 = vmax.f32 %v313_v44, 0.0 }
  0xfd   :  { %v344_v51 = vmax.f32 %v284_v47, 0.0  ;;  %v352_v52 = vmax.f32 %v316_v48, 0.0  ;;  %v577_v53 = vpop.f32.mrb[4].mxu0  ;;  %v601_v54 = vpop.f32.mrb[4].mxu1 }
  0xfe   :  { %v578_v55 = vpop.f32.mrb[5].mxu0  ;;  %v602_v56 = vpop.f32.mrb[5].mxu1 }
  0xff   :  { %v511_v57 = vpack.c.bf16 %v344_v51, %v343_v49  ;;  %v531_v58 = vpack.c.bf16 %v352_v52, %v351_v50  ;;  %v579_v59 = vadd.f32 %v578_v55, %v577_v53  ;;  %v603_v60 = vadd.f32 %v602_v56, %v601_v54  ;;  %v580_v61 = vpop.f32.mrb[6].mxu0  ;;  %v604_v62 = vpop.f32.mrb[6].mxu1 }
 0x100   :  { %v581_v63 = vpop.f32.mrb[7].mxu0  ;;  %v605_v0 = vpop.f32.mrb[7].mxu1 }
 0x101   :  { %512 = vst [vmem:[%s839_s3] sm:$0xff] %v511_v57   ;;  %551 = vst [vmem:[%s839_s3 + $0x20] sm:$0xff] %v531_v58   ;;  %v289_v1 = vadd.f32 %v579_v59, %v794_v34  ;;  %v321_v2 = vadd.f32 %v603_v60, %v794_v34  ;;  %v582_v3 = vadd.f32 %v581_v63, %v580_v61 }
 0x102   :  { %v606_v4 = vadd.f32 %v605_v0, %v604_v62 }
 0x103   :  { %v292_v5 = vadd.f32 %v582_v3, %v794_v34  ;;  %v345_v7 = vmax.f32 %v289_v1, 0.0  ;;  %v353_v8 = vmax.f32 %v321_v2, 0.0 }
 0x104   :  { %v324_v6 = vadd.f32 %v606_v4, %v794_v34 }
 0x105   :  { %v346_v9 = vmax.f32 %v292_v5, 0.0  ;;  %v583_v11 = vpop.f32.mrb[8].mxu0  ;;  %v607_v12 = vpop.f32.mrb[8].mxu1 }
 0x106   :  { %v354_v10 = vmax.f32 %v324_v6, 0.0  ;;  %v584_v13 = vpop.f32.mrb[9].mxu0  ;;  %v608_v14 = vpop.f32.mrb[9].mxu1 }
 0x107   :  { %v516_v15 = vpack.c.bf16 %v346_v9, %v345_v7  ;;  %v585_v17 = vadd.f32 %v584_v13, %v583_v11  ;;  %v609_v18 = vadd.f32 %v608_v14, %v607_v12  ;;  %v586_v19 = vpop.f32.mrb[10].mxu0  ;;  %v610_v20 = vpop.f32.mrb[10].mxu1 }
 0x108   :  { %v536_v16 = vpack.c.bf16 %v354_v10, %v353_v8  ;;  %v587_v21 = vpop.f32.mrb[11].mxu0  ;;  %v611_v22 = vpop.f32.mrb[11].mxu1 }
 0x109   :  { %548 = vst [vmem:[%s839_s3 + $0x8] sm:$0xff] %v516_v15   ;;  %v297_v23 = vadd.f32 %v585_v17, %v794_v34  ;;  %v329_v24 = vadd.f32 %v609_v18, %v794_v34  ;;  %v588_v25 = vadd.f32 %v587_v21, %v586_v19  ;;  %v612_v26 = vadd.f32 %v611_v22, %v610_v20 }
 0x10a   :  { %552 = vst [vmem:[%s839_s3 + $0x28] sm:$0xff] %v536_v16  }
 0x10b   :  { %v300_v27 = vadd.f32 %v588_v25, %v794_v34  ;;  %v332_v28 = vadd.f32 %v612_v26, %v794_v34  ;;  %v347_v29 = vmax.f32 %v297_v23, 0.0  ;;  %v355_v30 = vmax.f32 %v329_v24, 0.0 }
 0x10d   :  { %v348_v31 = vmax.f32 %v300_v27, 0.0  ;;  %v356_v32 = vmax.f32 %v332_v28, 0.0  ;;  %v589_v33 = vpop.f32.mrb[12].mxu0  ;;  %v613_v35 = vpop.f32.mrb[12].mxu1 }
 0x10e   :  { %v590_v36 = vpop.f32.mrb[13].mxu0  ;;  %v614_v37 = vpop.f32.mrb[13].mxu1 }
 0x10f   :  { %v521_v38 = vpack.c.bf16 %v348_v31, %v347_v29  ;;  %v541_v39 = vpack.c.bf16 %v356_v32, %v355_v30  ;;  %v591_v40 = vadd.f32 %v590_v36, %v589_v33  ;;  %v615_v41 = vadd.f32 %v614_v37, %v613_v35  ;;  %v592_v42 = vpop.f32.mrb[14].mxu0  ;;  %v616_v43 = vpop.f32.mrb[14].mxu1 }
 0x110   :  { %v593_v44 = vpop.f32.mrb[15].mxu0  ;;  %v617_v45 = vpop.f32.mrb[15].mxu1 }
 0x111   :  { %549 = vst [vmem:[%s839_s3 + $0x10] sm:$0xff] %v521_v38   ;;  %553 = vst [vmem:[%s839_s3 + $0x30] sm:$0xff] %v541_v39   ;;  %v305_v46 = vadd.f32 %v591_v40, %v794_v34  ;;  %v337_v47 = vadd.f32 %v615_v41, %v794_v34  ;;  %v594_v48 = vadd.f32 %v593_v44, %v592_v42 }
 0x112   :  { %v618_v49 = vadd.f32 %v617_v45, %v616_v43 }
 0x113   :  { %v308_v50 = vadd.f32 %v594_v48, %v794_v34  ;;  %v349_v52 = vmax.f32 %v305_v46, 0.0  ;;  %v357_v53 = vmax.f32 %v337_v47, 0.0 }
 0x114   :  { %v340_v51 = vadd.f32 %v618_v49, %v794_v34 }
 0x115   :  { %v350_v54 = vmax.f32 %v308_v50, 0.0 }
 0x116   :  { %v358_v55 = vmax.f32 %v340_v51, 0.0 }
 0x117   :  { %v526_v56 = vpack.c.bf16 %v350_v54, %v349_v52 }
 0x118   :  { %v546_v57 = vpack.c.bf16 %v358_v55, %v357_v53 }
 0x119   :  { %550 = vst [vmem:[%s839_s3 + $0x18] sm:$0xff] %v526_v56  }
 0x11a   :  { %554 = vst [vmem:[%s839_s3 + $0x38] sm:$0xff] %v546_v57  }

// kernel: forward.12
= control target key start
LH: loop header
LB: loop body
LE: loop exit
PB: predicated region body
PF: predicated region fallthrough
CT: control target
= control target key end

     0   :  { %s1304_s1 = inlined_call_operand.vmem [shape: bf16[384,128], index: 1, kind: input, shape index: {}]   ;;  %s1305_s0 = inlined_call_operand.vmem [shape: bf16[128,384], index: 0, kind: input, shape index: {}]   ;;  %s1306_s2 = inlined_call_operand.vmem [shape: f32[1,128], index: 2, kind: input, shape index: {}]   ;;  %s1307_s3 = inlined_call_operand.vmem [shape: bf16[128,128], index: 3, kind: input, shape index: {}]   ;;  %s1308_s4 = inlined_call_operand.vmem [shape: bf16[128,128], index: 4, kind: output, shape index: {}]  }
   0x1   :  { %v998_v0 = vld [vmem:[%s1304_s1 + $0x40] sm:$0xff]   ;;  %v1000_v2 = vld [vmem:[%s1304_s1 + $0x48] sm:$0xff]   ;;  %v1003_v5 = vld [vmem:[%s1304_s1 + $0x50] sm:$0xff]  }
   0x2   :  { %v999_v1 = vld [vmem:[%s1304_s1] sm:$0xff]   ;;  %886 = vmatprep.subr.bf16.mxu0 %v998_v0  ;;  %v1002_v4 = vld [vmem:[%s1304_s1 + $0x8] sm:$0xff]   ;;  %v1005_v7 = vld [vmem:[%s1304_s1 + $0x10] sm:$0xff]  }
   0x3   :  { %887 = vmatpush3.bf16.msra.mxu0 %v999_v1  ;;  %v1001_v3 = vld [vmem:[%s1304_s1 + $0x80] sm:$0xff]   ;;  %v1004_v6 = vld [vmem:[%s1304_s1 + $0x88] sm:$0xff]   ;;  %v1006_v8 = vld [vmem:[%s1304_s1 + $0x58] sm:$0xff]  }
   0x4   :  { %888 = vmatprep.subr.bf16.mxu0 %v1000_v2  ;;  %966 = vmatprep.subr.bf16.mxu1 %v1001_v3  ;;  %v1007_v9 = vld [vmem:[%s1304_s1 + $0x90] sm:$0xff]   ;;  %v1008_v10 = vld [vmem:[%s1304_s1 + $0x18] sm:$0xff]   ;;  %v1009_v11 = vld [vmem:[%s1304_s1 + $0x60] sm:$0xff]  }
   0x5   :  { %967 = vmatpush3.bf16.msra.mxu1 %v1001_v3  ;;  %v1010_v12 = vld [vmem:[%s1304_s1 + $0x98] sm:$0xff]   ;;  %v1011_v13 = vld [vmem:[%s1304_s1 + $0x20] sm:$0xff]   ;;  %v1012_v15 = vld [vmem:[%s1304_s1 + $0x68] sm:$0xff]  }
   0x6   :  { %968 = vmatprep.subr.bf16.mxu1 %v1004_v6  ;;  %v1013_v14 = vld [vmem:[%s1304_s1 + $0xa0] sm:$0xff]   ;;  %v1014_v16 = vld [vmem:[%s1304_s1 + $0x28] sm:$0xff]   ;;  %v1015_v18 = vld [vmem:[%s1304_s1 + $0x70] sm:$0xff]  }
   0x7   :  { %889 = vmatpush3.bf16.msra.mxu0 %v1002_v4  ;;  %v1016_v17 = vld [vmem:[%s1304_s1 + $0xa8] sm:$0xff]   ;;  %v1017_v19 = vld [vmem:[%s1304_s1 + $0x30] sm:$0xff]   ;;  %v1018_v20 = vld [vmem:[%s1304_s1 + $0x78] sm:$0xff]  }
   0x8   :  { %890 = vmatprep.subr.bf16.mxu0 %v1003_v5  ;;  %v1019_v21 = vld [vmem:[%s1304_s1 + $0xb0] sm:$0xff]   ;;  %v1020_v23 = vld [vmem:[%s1304_s1 + $0x38] sm:$0xff]   ;;  %v1021_v26 = vld [vmem:[%s1305_s0] ss:$12 sps:$4 sm:$0xff]  }
   0x9   :  { %969 = vmatpush3.bf16.msra.mxu1 %v1004_v6  ;;  %v1023_v22 = vld [vmem:[%s1305_s0 + $0x4] ss:$12 sps:$4 sm:$0xff]   ;;  %v1025_v24 = vld [vmem:[%s1305_s0 + $0x8] ss:$12 sps:$4 sm:$0xff]   ;;  %v1024_v25 = vld [vmem:[%s1304_s1 + $0xb8] sm:$0xff]  }
   0xa   :  { %970 = vmatprep.subr.bf16.mxu1 %v1007_v9  ;;  %409 = vmatprep.mubr.bf16.mxu0 %v1023_v22  ;;  %v1027_v27 = vld [vmem:[%s1305_s0 + $0x1c] ss:$12 sps:$4 sm:$0xff]   ;;  %v1026_v28 = vld [vmem:[%s1305_s0 + $0x20] ss:$12 sps:$4 sm:$0xff]   ;;  %v1033_v29 = vld [vmem:[%s1305_s0 + $0x38] ss:$12 sps:$4 sm:$0xff]  }
   0xb   :  { %891 = vmatpush3.bf16.msra.mxu0 %v1005_v7  ;;  %982 = vmatprep.mubr.bf16.mxu1 %v1025_v24  ;;  %v1029_v30 = vld [vmem:[%s1305_s0 + $0x18] ss:$12 sps:$4 sm:$0xff]   ;;  %v1030_v31 = vld [vmem:[%s1305_s0 + $0x34] ss:$12 sps:$4 sm:$0xff]   ;;  %v1034_v32 = vld [vmem:[%s1305_s0 + $0x50] ss:$12 sps:$4 sm:$0xff]  }
   0xc   :  { %892 = vmatprep.subr.bf16.mxu0 %v1006_v8  ;;  %v1041_v33 = vld [vmem:[%s1305_s0 + $0x68] ss:$12 sps:$4 sm:$0xff]   ;;  %v1032_v34 = vld [vmem:[%s1305_s0 + $0x30] ss:$12 sps:$4 sm:$0xff]   ;;  %v1035_v35 = vld [vmem:[%s1305_s0 + $0x4c] ss:$12 sps:$4 sm:$0xff]  }
   0xd   :  { %971 = vmatpush3.bf16.msra.mxu1 %v1007_v9  ;;  %v1042_v36 = vld [vmem:[%s1305_s0 + $0x80] ss:$12 sps:$4 sm:$0xff]   ;;  %v1049_v37 = vld [vmem:[%s1305_s0 + $0x98] ss:$12 sps:$4 sm:$0xff]   ;;  %v1037_v38 = vld [vmem:[%s1305_s0 + $0x48] ss:$12 sps:$4 sm:$0xff]  }
   0xe   :  { %972 = vmatprep.subr.bf16.mxu1 %v1010_v12  ;;  %v1038_v39 = vld [vmem:[%s1305_s0 + $0x64] ss:$12 sps:$4 sm:$0xff]   ;;  %v1040_v41 = vld [vmem:[%s1305_s0 + $0x60] ss:$12 sps:$4 sm:$0xff]   ;;  %v1043_v42 = vld [vmem:[%s1305_s0 + $0x7c] ss:$12 sps:$4 sm:$0xff]  }
   0xf   :  { %893 = vmatpush3.bf16.msra.mxu0 %v1008_v10  ;;  %v1050_v40 = vld [vmem:[%s1305_s0 + $0xb0] ss:$12 sps:$4 sm:$0xff]   ;;  %v1045_v43 = vld [vmem:[%s1305_s0 + $0x78] ss:$12 sps:$4 sm:$0xff]   ;;  %v1046_v44 = vld [vmem:[%s1305_s0 + $0x94] ss:$12 sps:$4 sm:$0xff]  }
  0x10   :  { %894 = vmatprep.subr.bf16.mxu0 %v1009_v11  ;;  %v1048_v45 = vld [vmem:[%s1305_s0 + $0x90] ss:$12 sps:$4 sm:$0xff]   ;;  %v1051_v46 = vld [vmem:[%s1305_s0 + $0xac] ss:$12 sps:$4 sm:$0xff]   ;;  %v1053_v47 = vld [vmem:[%s1305_s0 + $0xa8] ss:$12 sps:$4 sm:$0xff]  }
  0x11   :  { %973 = vmatpush3.bf16.msra.mxu1 %v1010_v12  ;;  %v1226_v50 = vld [vmem:[%s1306_s2] ss:$0 sm:$0xff]  ;;  %v872_v4 = vld [vmem:[%s1307_s3 + $0x8] sm:$0xff]  }
  0x12   :  { %974 = vmatprep.subr.bf16.mxu1 %v1013_v14  ;;  %v801_v51 = vld [vmem:[%s1307_s3] sm:$0xff]   ;;  %v806_v9 = vunpack.c.l.bf16 %v872_v4 }
  0x13   :  { %895 = vmatpush3.bf16.msra.mxu0 %v1011_v13  ;;  %v802_v59 = vunpack.c.l.bf16 %v801_v51  ;;  %v803_v0 = vunpack.c.h.bf16 %v801_v51 }
  0x14   :  { %896 = vmatprep.subr.bf16.mxu0 %v1012_v15 }
  0x15   :  { %975 = vmatpush3.bf16.msra.mxu1 %v1013_v14 }
  0x16   :  { %976 = vmatprep.subr.bf16.mxu1 %v1016_v17 }
  0x17   :  { %897 = vmatpush3.bf16.msra.mxu0 %v1014_v16 }
  0x18   :  { %898 = vmatprep.subr.bf16.mxu0 %v1015_v18 }
  0x19   :  { %977 = vmatpush3.bf16.msra.mxu1 %v1016_v17 }
  0x1a   :  { %978 = vmatprep.subr.bf16.mxu1 %v1019_v21 }
  0x1b   :  { %899 = vmatpush3.bf16.msra.mxu0 %v1017_v19 }
  0x1c   :  { %900 = vmatprep.subr.bf16.mxu0 %v1018_v20 }
  0x1d   :  { %979 = vmatpush3.bf16.msra.mxu1 %v1019_v21  ;;  %v807_v21 = vunpack.c.h.bf16 %v872_v4 }
  0x1e   :  { %980 = vmatprep.subr.bf16.mxu1 %v1024_v25 }
  0x1f   :  { %901 = vmatpush3.bf16.msra.mxu0 %v1020_v23 }
  0x21   :  { %981 = vmatpush3.bf16.msra.mxu1 %v1024_v25 }
  0x22   :  { %410 = vmatmul.mubr.bf16.vlgmr.msra.gmra.mrb[0].mxu0 %v1021_v26  ;;  %v873_v26 = vld [vmem:[%s1307_s3 + $0x10] sm:$0xff]  }
  0x23   :  { %417 = vmatprep.mubr.bf16.mxu0 %v1027_v27 }
  0x24   :  { %983 = vmatmul.mubr.bf16.vlgmr.msra.gmra.mrb[0].mxu1 %v1026_v28 }
  0x25   :  { %986 = vmatprep.mubr.bf16.mxu1 %v1033_v29 }
  0x2a   :  { %418 = vmatmul.mubr.bf16.gmra.mrb[4].mxu0 %v1029_v30 }
  0x2b   :  { %425 = vmatprep.mubr.bf16.mxu0 %v1030_v31 }
  0x2c   :  { %987 = vmatmul.mubr.bf16.gmra.mrb[4].mxu1 %v1034_v32  ;;  %v810_v32 = vunpack.c.l.bf16 %v873_v26 }
  0x2d   :  { %990 = vmatprep.mubr.bf16.mxu1 %v1041_v33 }
  0x32   :  { %426 = vmatmul.mubr.bf16.gmra.mrb[8].mxu0 %v1032_v34 }
  0x33   :  { %433 = vmatprep.mubr.bf16.mxu0 %v1035_v35 }
  0x34   :  { %991 = vmatmul.mubr.bf16.gmra.mrb[8].mxu1 %v1042_v36 }
  0x35   :  { %994 = vmatprep.mubr.bf16.mxu1 %v1049_v37 }
  0x3a   :  { %434 = vmatmul.mubr.bf16.gmra.mrb[12].mxu0 %v1037_v38 }
  0x3b   :  { %441 = vmatprep.mubr.bf16.mxu0 %v1038_v39 }
  0x3c   :  { %995 = vmatmul.mubr.bf16.gmra.mrb[12].mxu1 %v1050_v40 }
  0x42   :  { %442 = vmatmul.mubr.bf16.gmra.mrb[16].mxu0 %v1040_v41 }
  0x43   :  { %449 = vmatprep.mubr.bf16.mxu0 %v1043_v42 }
  0x4a   :  { %450 = vmatmul.mubr.bf16.gmra.mrb[20].mxu0 %v1045_v43  ;;  %v811_v43 = vunpack.c.h.bf16 %v873_v26 }
  0x4b   :  { %457 = vmatprep.mubr.bf16.mxu0 %v1046_v44 }
  0x52   :  { %458 = vmatmul.mubr.bf16.gmra.mrb[24].mxu0 %v1048_v45 }
  0x53   :  { %465 = vmatprep.mubr.bf16.mxu0 %v1051_v46 }
  0x5a   :  { %466 = vmatmul.mubr.bf16.gmra.mrb[28].mxu0 %v1053_v47 }
  0xf5   :  { %v902_v48 = vpop.f32.mrb[0].mxu0 }
  0xf6   :  { %v903_v49 = vpop.f32.mrb[1].mxu0 }
  0xf7   :  { %v904_v52 = vadd.f32 %v903_v49, %v902_v48  ;;  %v905_v53 = vpop.f32.mrb[2].mxu0  ;;  %v984_v55 = vpop.f32.mrb[0].mxu1  ;;  %v874_v48 = vld [vmem:[%s1307_s3 + $0x18] sm:$0xff]  }
  0xf8   :  { %v906_v54 = vpop.f32.mrb[3].mxu0  ;;  %v508_v58 = vpop.f32.mrb[1].mxu1 }
  0xf9   :  { %v907_v56 = vadd.f32 %v906_v54, %v905_v53  ;;  %v412_v57 = vadd.f32 %v904_v52, %v1226_v50  ;;  %v985_v60 = vpop.f32.mrb[2].mxu1  ;;  %v814_v54 = vunpack.c.l.bf16 %v874_v48 }
  0xfa   :  { %v511_v63 = vpop.f32.mrb[3].mxu1 }
  0xfb   :  { %v509_v61 = vadd.f32 %v508_v58, %v412_v57  ;;  %v415_v62 = vadd.f32 %v907_v56, %v1226_v50 }
  0xfd   :  { %v603_v1 = vadd.f32 %v802_v59, %v509_v61  ;;  %v512_v2 = vadd.f32 %v511_v63, %v415_v62  ;;  %v908_v3 = vpop.f32.mrb[4].mxu0 }
  0xfe   :  { %v909_v5 = vpop.f32.mrb[5].mxu0 }
  0xff   :  { %v604_v6 = vadd.f32 %v803_v0, %v512_v2  ;;  %v910_v7 = vadd.f32 %v909_v5, %v908_v3  ;;  %v911_v8 = vpop.f32.mrb[6].mxu0  ;;  %v988_v11 = vpop.f32.mrb[4].mxu1  ;;  %v619_v12 = vmax.f32 %v603_v1, 0.0  ;;  %v815_v2 = vunpack.c.h.bf16 %v874_v48 }
 0x100   :  { %v912_v10 = vpop.f32.mrb[7].mxu0  ;;  %v524_v16 = vpop.f32.mrb[5].mxu1 }
 0x101   :  { %v620_v13 = vmax.f32 %v604_v6, 0.0  ;;  %v420_v14 = vadd.f32 %v910_v7, %v1226_v50  ;;  %v913_v15 = vadd.f32 %v912_v10, %v911_v8  ;;  %v989_v17 = vpop.f32.mrb[6].mxu1  ;;  %v875_v7 = vld [vmem:[%s1307_s3 + $0x20] sm:$0xff]  }
 0x102   :  { %v527_v22 = vpop.f32.mrb[7].mxu1 }
 0x103   :  { %v835_v18 = vpack.c.bf16 %v620_v13, %v619_v12  ;;  %v517_v19 = vadd.f32 %v984_v55, %v420_v14  ;;  %v423_v20 = vadd.f32 %v913_v15, %v1226_v50  ;;  %v818_v13 = vunpack.c.l.bf16 %v875_v7 }
 0x105   :  { %836 = vst [vmem:[%s1308_s4] sm:$0xff] %v835_v18   ;;  %v605_v23 = vadd.f32 %v806_v9, %v517_v19  ;;  %v520_v24 = vadd.f32 %v985_v60, %v423_v20  ;;  %v914_v25 = vpop.f32.mrb[8].mxu0 }
 0x106   :  { %v915_v27 = vpop.f32.mrb[9].mxu0 }
 0x107   :  { %v606_v28 = vadd.f32 %v807_v21, %v520_v24  ;;  %v916_v29 = vadd.f32 %v915_v27, %v914_v25  ;;  %v917_v30 = vpop.f32.mrb[10].mxu0  ;;  %v1244_v33 = vpop.f32.mrb[8].mxu1  ;;  %v621_v34 = vmax.f32 %v605_v23, 0.0  ;;  %v819_v21 = vunpack.c.h.bf16 %v875_v7  ;;  %v876_v25 = vld [vmem:[%s1307_s3 + $0x28] sm:$0xff]  }
 0x108   :  { %v918_v31 = vpop.f32.mrb[11].mxu0  ;;  %v540_v38 = vpop.f32.mrb[9].mxu1 }
 0x109   :  { %v622_v35 = vmax.f32 %v606_v28, 0.0  ;;  %v919_v36 = vadd.f32 %v918_v31, %v917_v30  ;;  %v428_v37 = vadd.f32 %v916_v29, %v1226_v50  ;;  %v1247_v39 = vpop.f32.mrb[10].mxu1  ;;  %v822_v30 = vunpack.c.l.bf16 %v876_v25 }
 0x10a   :  { %v543_v44 = vpop.f32.mrb[11].mxu1 }
 0x10b   :  { %v840_v40 = vpack.c.bf16 %v622_v35, %v621_v34  ;;  %v525_v41 = vadd.f32 %v524_v16, %v428_v37  ;;  %v431_v42 = vadd.f32 %v919_v36, %v1226_v50 }
 0x10d   :  { %879 = vst [vmem:[%s1308_s4 + $0x8] sm:$0xff] %v840_v40   ;;  %v607_v45 = vadd.f32 %v810_v32, %v525_v41  ;;  %v528_v46 = vadd.f32 %v527_v22, %v431_v42  ;;  %v920_v47 = vpop.f32.mrb[12].mxu0  ;;  %v823_v41 = vunpack.c.h.bf16 %v876_v25 }
 0x10e   :  { %v921_v49 = vpop.f32.mrb[13].mxu0 }
 0x10f   :  { %v608_v51 = vadd.f32 %v811_v43, %v528_v46  ;;  %v922_v52 = vadd.f32 %v921_v49, %v920_v47  ;;  %v923_v53 = vpop.f32.mrb[14].mxu0  ;;  %v1256_v56 = vpop.f32.mrb[12].mxu1  ;;  %v623_v57 = vmax.f32 %v607_v45, 0.0  ;;  %v877_v45 = vld [vmem:[%s1307_s3 + $0x30] sm:$0xff]  }
 0x110   :  { %v924_v55 = vpop.f32.mrb[15].mxu0  ;;  %v556_v61 = vpop.f32.mrb[13].mxu1 }
 0x111   :  { %v624_v58 = vmax.f32 %v608_v51, 0.0  ;;  %v436_v59 = vadd.f32 %v922_v52, %v1226_v50  ;;  %v925_v60 = vadd.f32 %v924_v55, %v923_v53  ;;  %v1259_v62 = vpop.f32.mrb[14].mxu1  ;;  %v826_v51 = vunpack.c.l.bf16 %v877_v45 }
 0x112   :  { %v559_v3 = vpop.f32.mrb[15].mxu1 }
 0x113   :  { %v845_v63 = vpack.c.bf16 %v624_v58, %v623_v57  ;;  %v533_v0 = vadd.f32 %v988_v11, %v436_v59  ;;  %v439_v1 = vadd.f32 %v925_v60, %v1226_v50  ;;  %v827_v59 = vunpack.c.h.bf16 %v877_v45 }
 0x115   :  { %880 = vst [vmem:[%s1308_s4 + $0x10] sm:$0xff] %v845_v63   ;;  %v609_v4 = vadd.f32 %v814_v54, %v533_v0  ;;  %v536_v5 = vadd.f32 %v989_v17, %v439_v1  ;;  %v926_v6 = vpop.f32.mrb[16].mxu0  ;;  %v878_v1 = vld [vmem:[%s1307_s3 + $0x38] sm:$0xff]  }
 0x116   :  { %v927_v8 = vpop.f32.mrb[17].mxu0  ;;  %v830_v7 = vunpack.c.l.bf16 %v878_v1 }
 0x117   :  { %v610_v9 = vadd.f32 %v815_v2, %v536_v5  ;;  %v928_v10 = vadd.f32 %v927_v8, %v926_v6  ;;  %v929_v12 = vpop.f32.mrb[18].mxu0  ;;  %v625_v14 = vmax.f32 %v609_v4, 0.0 }
 0x118   :  { %v930_v11 = vpop.f32.mrb[19].mxu0 }
 0x119   :  { %v626_v15 = vmax.f32 %v610_v9, 0.0  ;;  %v931_v16 = vadd.f32 %v930_v11, %v929_v12  ;;  %v444_v18 = vadd.f32 %v928_v10, %v1226_v50 }
 0x11b   :  { %v850_v19 = vpack.c.bf16 %v626_v15, %v625_v14  ;;  %v541_v20 = vadd.f32 %v540_v38, %v444_v18  ;;  %v447_v17 = vadd.f32 %v931_v16, %v1226_v50  ;;  %v831_v14 = vunpack.c.h.bf16 %v878_v1 }
 0x11d   :  { %881 = vst [vmem:[%s1308_s4 + $0x18] sm:$0xff] %v850_v19   ;;  %v611_v22 = vadd.f32 %v818_v13, %v541_v20  ;;  %v544_v23 = vadd.f32 %v543_v44, %v447_v17  ;;  %v932_v24 = vpop.f32.mrb[20].mxu0 }
 0x11e   :  { %v933_v26 = vpop.f32.mrb[21].mxu0 }
 0x11f   :  { %v612_v27 = vadd.f32 %v819_v21, %v544_v23  ;;  %v934_v28 = vadd.f32 %v933_v26, %v932_v24  ;;  %v935_v29 = vpop.f32.mrb[22].mxu0  ;;  %v627_v32 = vmax.f32 %v611_v22, 0.0 }
 0x120   :  { %v936_v31 = vpop.f32.mrb[23].mxu0 }
 0x121   :  { %v628_v34 = vmax.f32 %v612_v27, 0.0  ;;  %v452_v35 = vadd.f32 %v934_v28, %v1226_v50  ;;  %v937_v36 = vadd.f32 %v936_v31, %v935_v29 }
 0x123   :  { %v855_v37 = vpack.c.bf16 %v628_v34, %v627_v32  ;;  %v549_v38 = vadd.f32 %v1244_v33, %v452_v35  ;;  %v455_v40 = vadd.f32 %v937_v36, %v1226_v50 }
 0x125   :  { %882 = vst [vmem:[%s1308_s4 + $0x20] sm:$0xff] %v855_v37   ;;  %v613_v42 = vadd.f32 %v822_v30, %v549_v38  ;;  %v552_v43 = vadd.f32 %v1247_v39, %v455_v40  ;;  %v938_v44 = vpop.f32.mrb[24].mxu0 }
 0x126   :  { %v939_v46 = vpop.f32.mrb[25].mxu0 }
 0x127   :  { %v614_v47 = vadd.f32 %v823_v41, %v552_v43  ;;  %v940_v48 = vadd.f32 %v939_v46, %v938_v44  ;;  %v941_v49 = vpop.f32.mrb[26].mxu0  ;;  %v629_v52 = vmax.f32 %v613_v42, 0.0 }
 0x128   :  { %v942_v33 = vpop.f32.mrb[27].mxu0 }
 0x129   :  { %v630_v53 = vmax.f32 %v614_v47, 0.0  ;;  %v943_v54 = vadd.f32 %v942_v33, %v941_v49  ;;  %v460_v55 = vadd.f32 %v940_v48, %v1226_v50 }
 0x12b   :  { %v860_v57 = vpack.c.bf16 %v630_v53, %v629_v52  ;;  %v557_v58 = vadd.f32 %v556_v61, %v460_v55  ;;  %v463_v39 = vadd.f32 %v943_v54, %v1226_v50 }
 0x12d   :  { %883 = vst [vmem:[%s1308_s4 + $0x28] sm:$0xff] %v860_v57   ;;  %v615_v60 = vadd.f32 %v826_v51, %v557_v58  ;;  %v560_v63 = vadd.f32 %v559_v3, %v463_v39  ;;  %v944_v0 = vpop.f32.mrb[28].mxu0 }
 0x12e   :  { %v945_v2 = vpop.f32.mrb[29].mxu0 }
 0x12f   :  { %v616_v4 = vadd.f32 %v827_v59, %v560_v63  ;;  %v946_v5 = vadd.f32 %v945_v2, %v944_v0  ;;  %v947_v6 = vpop.f32.mrb[30].mxu0  ;;  %v631_v8 = vmax.f32 %v615_v60, 0.0 }
 0x130   :  { %v948_v61 = vpop.f32.mrb[31].mxu0 }
 0x131   :  { %v632_v9 = vmax.f32 %v616_v4, 0.0  ;;  %v468_v10 = vadd.f32 %v946_v5, %v1226_v50  ;;  %v949_v12 = vadd.f32 %v948_v61, %v947_v6 }
 0x133   :  { %v865_v11 = vpack.c.bf16 %v632_v9, %v631_v8  ;;  %v565_v13 = vadd.f32 %v1256_v56, %v468_v10  ;;  %v471_v3 = vadd.f32 %v949_v12, %v1226_v50 }
 0x135   :  { %884 = vst [vmem:[%s1308_s4 + $0x30] sm:$0xff] %v865_v11   ;;  %v617_v15 = vadd.f32 %v830_v7, %v565_v13  ;;  %v568_v16 = vadd.f32 %v1259_v62, %v471_v3 }
 0x137   :  { %v618_v18 = vadd.f32 %v831_v14, %v568_v16  ;;  %v633_v19 = vmax.f32 %v617_v15, 0.0 }
 0x139   :  { %v634_v20 = vmax.f32 %v618_v18, 0.0 }
 0x13b   :  { %v870_v17 = vpack.c.bf16 %v634_v20, %v633_v19 }
 0x13d   :  { %885 = vst [vmem:[%s1308_s4 + $0x38] sm:$0xff] %v870_v17  }

// kernel: forward.13
= control target key start
LH: loop header
LB: loop body
LE: loop exit
PB: predicated region body
PF: predicated region fallthrough
CT: control target
= control target key end

     0   :  { %s639_s1 = inlined_call_operand.vmem [shape: bf16[384,128], index: 1, kind: input, shape index: {}]   ;;  %s640_s0 = inlined_call_operand.vmem [shape: bf16[32,384], index: 0, kind: input, shape index: {}]   ;;  %s641_s2 = inlined_call_operand.vmem [shape: f32[1,128], index: 2, kind: input, shape index: {}]   ;;  %s642_s3 = inlined_call_operand.vmem [shape: bf16[32,128], index: 3, kind: output, shape index: {}]  }
   0x1   :  { %v488_v0 = vld [vmem:[%s639_s1 + $0x40] sm:$0xff]   ;;  %v490_v2 = vld [vmem:[%s639_s1 + $0x48] sm:$0xff]   ;;  %v493_v5 = vld [vmem:[%s639_s1 + $0x50] sm:$0xff]  }
   0x2   :  { %v489_v1 = vld [vmem:[%s639_s1] sm:$0xff]   ;;  %430 = vmatprep.subr.bf16.mxu0 %v488_v0  ;;  %v492_v4 = vld [vmem:[%s639_s1 + $0x8] sm:$0xff]   ;;  %v495_v7 = vld [vmem:[%s639_s1 + $0x10] sm:$0xff]  }
   0x3   :  { %431 = vmatpush3.bf16.msra.mxu0 %v489_v1  ;;  %v491_v3 = vld [vmem:[%s639_s1 + $0x80] sm:$0xff]   ;;  %v494_v6 = vld [vmem:[%s639_s1 + $0x88] sm:$0xff]   ;;  %v496_v8 = vld [vmem:[%s639_s1 + $0x58] sm:$0xff]  }
   0x4   :  { %432 = vmatprep.subr.bf16.mxu0 %v490_v2  ;;  %468 = vmatprep.subr.bf16.mxu1 %v491_v3  ;;  %v497_v9 = vld [vmem:[%s639_s1 + $0x90] sm:$0xff]   ;;  %v498_v10 = vld [vmem:[%s639_s1 + $0x18] sm:$0xff]   ;;  %v499_v11 = vld [vmem:[%s639_s1 + $0x60] sm:$0xff]  }
   0x5   :  { %469 = vmatpush3.bf16.msra.mxu1 %v491_v3  ;;  %v500_v12 = vld [vmem:[%s639_s1 + $0x98] sm:$0xff]   ;;  %v501_v13 = vld [vmem:[%s639_s1 + $0x20] sm:$0xff]   ;;  %v502_v15 = vld [vmem:[%s639_s1 + $0x68] sm:$0xff]  }
   0x6   :  { %470 = vmatprep.subr.bf16.mxu1 %v494_v6  ;;  %v503_v14 = vld [vmem:[%s639_s1 + $0xa0] sm:$0xff]   ;;  %v504_v16 = vld [vmem:[%s639_s1 + $0x28] sm:$0xff]   ;;  %v505_v18 = vld [vmem:[%s639_s1 + $0x70] sm:$0xff]  }
   0x7   :  { %433 = vmatpush3.bf16.msra.mxu0 %v492_v4  ;;  %v506_v17 = vld [vmem:[%s639_s1 + $0xa8] sm:$0xff]   ;;  %v507_v19 = vld [vmem:[%s639_s1 + $0x30] sm:$0xff]   ;;  %v508_v20 = vld [vmem:[%s639_s1 + $0x78] sm:$0xff]  }
   0x8   :  { %434 = vmatprep.subr.bf16.mxu0 %v493_v5  ;;  %v509_v21 = vld [vmem:[%s639_s1 + $0xb0] sm:$0xff]   ;;  %v510_v23 = vld [vmem:[%s639_s1 + $0x38] sm:$0xff]   ;;  %v511_v26 = vld [vmem:[%s640_s0] ss:$12 sps:$4 sm:$0xff]  }
   0x9   :  { %471 = vmatpush3.bf16.msra.mxu1 %v494_v6  ;;  %v513_v22 = vld [vmem:[%s640_s0 + $0x4] ss:$12 sps:$4 sm:$0xff]   ;;  %v515_v24 = vld [vmem:[%s640_s0 + $0x8] ss:$12 sps:$4 sm:$0xff]   ;;  %v514_v25 = vld [vmem:[%s639_s1 + $0xb8] sm:$0xff]  }
   0xa   :  { %472 = vmatprep.subr.bf16.mxu1 %v497_v9  ;;  %286 = vmatprep.mubr.bf16.mxu0 %v513_v22  ;;  %v517_v27 = vld [vmem:[%s640_s0 + $0x1c] ss:$12 sps:$4 sm:$0xff]   ;;  %v516_v28 = vld [vmem:[%s640_s0 + $0x20] ss:$12 sps:$4 sm:$0xff]   ;;  %v519_v29 = vld [vmem:[%s640_s0 + $0x18] ss:$12 sps:$4 sm:$0xff]  }
   0xb   :  { %435 = vmatpush3.bf16.msra.mxu0 %v495_v7  ;;  %484 = vmatprep.mubr.bf16.mxu1 %v515_v24  ;;  %v380_v32 = vld [vmem:[%s641_s2] ss:$0 sm:$0xff] }
   0xc   :  { %436 = vmatprep.subr.bf16.mxu0 %v496_v8 }
   0xd   :  { %473 = vmatpush3.bf16.msra.mxu1 %v497_v9 }
   0xe   :  { %474 = vmatprep.subr.bf16.mxu1 %v500_v12 }
   0xf   :  { %437 = vmatpush3.bf16.msra.mxu0 %v498_v10 }
  0x10   :  { %438 = vmatprep.subr.bf16.mxu0 %v499_v11 }
  0x11   :  { %475 = vmatpush3.bf16.msra.mxu1 %v500_v12 }
  0x12   :  { %476 = vmatprep.subr.bf16.mxu1 %v503_v14 }
  0x13   :  { %439 = vmatpush3.bf16.msra.mxu0 %v501_v13 }
  0x14   :  { %440 = vmatprep.subr.bf16.mxu0 %v502_v15 }
  0x15   :  { %477 = vmatpush3.bf16.msra.mxu1 %v503_v14 }
  0x16   :  { %478 = vmatprep.subr.bf16.mxu1 %v506_v17 }
  0x17   :  { %441 = vmatpush3.bf16.msra.mxu0 %v504_v16 }
  0x18   :  { %442 = vmatprep.subr.bf16.mxu0 %v505_v18 }
  0x19   :  { %479 = vmatpush3.bf16.msra.mxu1 %v506_v17 }
  0x1a   :  { %480 = vmatprep.subr.bf16.mxu1 %v509_v21 }
  0x1b   :  { %443 = vmatpush3.bf16.msra.mxu0 %v507_v19 }
  0x1c   :  { %444 = vmatprep.subr.bf16.mxu0 %v508_v20 }
  0x1d   :  { %481 = vmatpush3.bf16.msra.mxu1 %v509_v21 }
  0x1e   :  { %482 = vmatprep.subr.bf16.mxu1 %v514_v25 }
  0x1f   :  { %445 = vmatpush3.bf16.msra.mxu0 %v510_v23 }
  0x21   :  { %483 = vmatpush3.bf16.msra.mxu1 %v514_v25 }
  0x22   :  { %287 = vmatmul.mubr.bf16.vlgmr.msra.gmra.mrb[0].mxu0 %v511_v26 }
  0x23   :  { %294 = vmatprep.mubr.bf16.mxu0 %v517_v27 }
  0x24   :  { %485 = vmatmul.mubr.bf16.vlgmr.msra.gmra.mrb[0].mxu1 %v516_v28 }
  0x2a   :  { %295 = vmatmul.mubr.bf16.gmra.mrb[4].mxu0 %v519_v29 }
  0xf5   :  { %v446_v30 = vpop.f32.mrb[0].mxu0 }
  0xf6   :  { %v447_v31 = vpop.f32.mrb[1].mxu0 }
  0xf7   :  { %v448_v33 = vadd.f32 %v447_v31, %v446_v30  ;;  %v449_v34 = vpop.f32.mrb[2].mxu0  ;;  %v486_v36 = vpop.f32.mrb[0].mxu1 }
  0xf8   :  { %v450_v35 = vpop.f32.mrb[3].mxu0  ;;  %v337_v39 = vpop.f32.mrb[1].mxu1 }
  0xf9   :  { %v451_v37 = vadd.f32 %v450_v35, %v449_v34  ;;  %v289_v38 = vadd.f32 %v448_v33, %v380_v32  ;;  %v487_v40 = vpop.f32.mrb[2].mxu1 }
  0xfa   :  { %v340_v43 = vpop.f32.mrb[3].mxu1 }
  0xfb   :  { %v338_v41 = vadd.f32 %v337_v39, %v289_v38  ;;  %v292_v42 = vadd.f32 %v451_v37, %v380_v32 }
  0xfd   :  { %v341_v44 = vadd.f32 %v340_v43, %v292_v42  ;;  %v452_v45 = vpop.f32.mrb[4].mxu0  ;;  %v352_v47 = vmax.f32 %v338_v41, 0.0 }
  0xfe   :  { %v453_v46 = vpop.f32.mrb[5].mxu0 }
  0xff   :  { %v353_v48 = vmax.f32 %v341_v44, 0.0  ;;  %v454_v49 = vadd.f32 %v453_v46, %v452_v45  ;;  %v455_v50 = vpop.f32.mrb[6].mxu0 }
 0x100   :  { %v456_v51 = vpop.f32.mrb[7].mxu0 }
 0x101   :  { %v422_v52 = vpack.c.bf16 %v353_v48, %v352_v47  ;;  %v297_v53 = vadd.f32 %v454_v49, %v380_v32  ;;  %v457_v54 = vadd.f32 %v456_v51, %v455_v50 }
 0x103   :  { %423 = vst [vmem:[%s642_s3] sm:$0xff] %v422_v52   ;;  %v346_v55 = vadd.f32 %v486_v36, %v297_v53  ;;  %v300_v56 = vadd.f32 %v457_v54, %v380_v32 }
 0x105   :  { %v349_v57 = vadd.f32 %v487_v40, %v300_v56  ;;  %v354_v58 = vmax.f32 %v346_v55, 0.0 }
 0x107   :  { %v355_v59 = vmax.f32 %v349_v57, 0.0 }
 0x109   :  { %v427_v60 = vpack.c.bf16 %v355_v59, %v354_v58 }
 0x10b   :  { %429 = vst [vmem:[%s642_s3 + $0x8] sm:$0xff] %v427_v60  }

// kernel: forward.15
= control target key start
LH: loop header
LB: loop body
LE: loop exit
PB: predicated region body
PF: predicated region fallthrough
CT: control target
= control target key end

     0   :  { %vm17_vm0 = vcmask 523264   ;;  %s123_s0 = inlined_call_operand.vmem [shape: bf16[2,16,64], index: 0, kind: input, shape index: {}]   ;;  %s124_s1 = inlined_call_operand.hbm [shape: f32[2,64], index: 1, kind: output, shape index: {}]  }
   0x1   :  { %v61_v0 = vld [vmem:[%s123_s0] sm:$0xff]   ;;  %v68_v1 = vld [vmem:[%s123_s0 + $0x8] sm:$0xff]  }
   0x2   :  { %v62_v2 = vunpack.c.l.bf16 %v61_v0  ;;  %v63_v3 = vunpack.c.h.bf16 %v61_v0  ;;  %v66_v4 = vunpack.c.l.bf16 %v68_v1  ;;  %v67_v5 = vunpack.c.h.bf16 %v68_v1 }
   0x3   :  { %6 = vsyncpa [#allocation3], 0  ;;  %s94_s0 = smov [#allocation2]   ;;  %vm41_vm1 = vcmask 1041409   ;;  %vm44_vm2 = vcmask 517120  }
   0x4   :  { %v18_v6 = vsel %vm17_vm0, %v62_v2, 0.0  ;;  %v19_v7 = vsel %vm17_vm0, %v63_v3, 0.0  ;;  %v27_v8 = vsel %vm17_vm0, %v66_v4, 0.0  ;;  %v28_v9 = vsel %vm17_vm0, %v67_v5, 0.0  ;;  %s52_s10 = sshll.u32 %s94_s0, 4  ;;  %s53_s10 = int_to_ptr.vmem [resolvable:$true] %s52_s10 }
   0x5   :  { %v20_v10 = vadd.f32 %v19_v7, %v18_v6  ;;  %v29_v11 = vadd.f32 %v28_v9, %v27_v8  ;;  %s70_s11 = scalar_lea.vmem %s53_s10, 32  ;;  %p75_p1 = scmp.lt.s32.totalorder %s53_s10, %s53_s10 }
   0x6   :  { %p71_p0 = scmp.ne.s32.totalorder %s53_s10, %s70_s11  ;;  %p76_p2 = scmp.lt.s32.totalorder %s70_s11, %s70_s11 }
   0x7   :  { %v21_v12 = vrot.slane %v20_v10, 4  ;;  %v30_v13 = vrot.slane %v29_v11, 4 }
   0x8   :  { %p77_p3 = por %p76_p2, %p75_p1 }
   0x9   :  { %v22_v14 = vadd.f32 %v21_v12, %v20_v10  ;;  %v31_v15 = vadd.f32 %v30_v13, %v29_v11 }
   0xa   :  { %p78_p4 = pnand %p77_p3, %p71_p0 }
   0xb   :  { %v23_v16 = vrot.slane %v22_v14, 2  ;;  %v32_v17 = vrot.slane %v31_v15, 2 }
   0xd   :  { %v24_v18 = vadd.f32 %v23_v16, %v22_v14  ;;  %v33_v19 = vadd.f32 %v32_v17, %v31_v15 }
   0xf   :  { %v25_v20 = vrot.slane %v24_v18, 1  ;;  %v34_v21 = vrot.slane %v33_v19, 1 }
  0x11   :  { %v26_v22 = vadd.f32 %v25_v20, %v24_v18  ;;  %v35_v23 = vadd.f32 %v34_v21, %v33_v19 }
  0x13   :  { %v37_v24 = vmul.f32 0.0625, %v26_v22  ;;  %v38_v25 = vmul.f32 0.0625, %v35_v23 }
  0x15   :  { %v42_v26 = vsel %vm41_vm1, %v38_v25, %v37_v24 }
  0x16   :  { %45 = vst.msk [vmem:[#allocation2] sm:$0x3] %vm44_vm2, %v42_v26 }
  0x17   :  { %81 = shalt.err (!%p78_p4)
}
  0x18   :  { %s82_s14 = scalar_lea.hbm %s124_s1, 32 }
  0x19   :  { %p83_p5 = scmp.ne.s32.totalorder %s124_s1, %s82_s14  ;;  %p86_p6 = scmp.lt.u32.totalorder %s82_s14, %s124_s1 }
  0x1b   :  { %p88_p7 = pnand %p86_p6, %p83_p5 }
  0x1d   :  { %91 = shalt.err (!%p88_p7)
}
  0x1e   :  { %55 = dma.vmem_to_hbm [thread:$0]  %s53_s10, 32, %s124_s1, [#allocation3]  }
  0x1f   :  { %92 = dma.done.wait [#allocation3], 32  }
  0x20   :  { %93 = vsyncadd [#allocation3], 4294967264 }
  0x21   :  { %59 = vsyncpa [#allocation3], 1 }

// kernel: forward.14
= control target key start
LH: loop header
LB: loop body
LE: loop exit
PB: predicated region body
PF: predicated region fallthrough
CT: control target
= control target key end

     0   :  { %s1005_s1 = inlined_call_operand.vmem [shape: bf16[640,128], index: 1, kind: input, shape index: {}]   ;;  %s1006_s0 = inlined_call_operand.vmem [shape: bf16[32,640], index: 0, kind: input, shape index: {}]   ;;  %s1007_s2 = inlined_call_operand.vmem [shape: f32[1,128], index: 2, kind: input, shape index: {}]   ;;  %s1008_s3 = inlined_call_operand.vmem [shape: bf16[32,128], index: 3, kind: input, shape index: {}]   ;;  %s1009_s4 = inlined_call_operand.vmem [shape: bf16[32,128], index: 4, kind: output, shape index: {}]  }
   0x1   :  { %v761_v0 = vld [vmem:[%s1005_s1 + $0x40] sm:$0xff]   ;;  %v765_v4 = vld [vmem:[%s1005_s1 + $0x48] sm:$0xff]   ;;  %v769_v8 = vld [vmem:[%s1005_s1 + $0x50] sm:$0xff]  }
   0x2   :  { %v762_v1 = vld [vmem:[%s1005_s1] sm:$0xff]   ;;  %675 = vmatprep.subr.bf16.mxu0 %v761_v0  ;;  %v766_v5 = vld [vmem:[%s1005_s1 + $0x8] sm:$0xff]   ;;  %v770_v9 = vld [vmem:[%s1005_s1 + $0x10] sm:$0xff]  }
   0x3   :  { %v763_v2 = vld [vmem:[%s1005_s1 + $0xc0] sm:$0xff]   ;;  %676 = vmatpush3.bf16.msra.mxu0 %v762_v1  ;;  %v767_v6 = vld [vmem:[%s1005_s1 + $0xc8] sm:$0xff]   ;;  %v771_v10 = vld [vmem:[%s1005_s1 + $0xd0] sm:$0xff]  }
   0x4   :  { %v764_v3 = vld [vmem:[%s1005_s1 + $0x80] sm:$0xff]   ;;  %703 = vmatprep.subr.bf16.mxu1 %v763_v2  ;;  %677 = vmatprep.subr.bf16.mxu0 %v765_v4  ;;  %v768_v7 = vld [vmem:[%s1005_s1 + $0x88] sm:$0xff]   ;;  %v772_v11 = vld [vmem:[%s1005_s1 + $0x90] sm:$0xff]  }
   0x5   :  { %704 = vmatpush3.bf16.msra.mxu1 %v764_v3  ;;  %v773_v12 = vld [vmem:[%s1005_s1 + $0x58] sm:$0xff]   ;;  %v777_v16 = vld [vmem:[%s1005_s1 + $0x60] sm:$0xff]   ;;  %v781_v20 = vld [vmem:[%s1005_s1 + $0x68] sm:$0xff]  }
   0x6   :  { %705 = vmatprep.subr.bf16.mxu1 %v767_v6  ;;  %v774_v13 = vld [vmem:[%s1005_s1 + $0x18] sm:$0xff]   ;;  %v778_v17 = vld [vmem:[%s1005_s1 + $0x20] sm:$0xff]   ;;  %v782_v21 = vld [vmem:[%s1005_s1 + $0x28] sm:$0xff]  }
   0x7   :  { %678 = vmatpush3.bf16.msra.mxu0 %v766_v5  ;;  %v775_v14 = vld [vmem:[%s1005_s1 + $0xd8] sm:$0xff]   ;;  %v779_v18 = vld [vmem:[%s1005_s1 + $0xe0] sm:$0xff]   ;;  %v783_v22 = vld [vmem:[%s1005_s1 + $0xe8] sm:$0xff]  }
   0x8   :  { %679 = vmatprep.subr.bf16.mxu0 %v769_v8  ;;  %v776_v15 = vld [vmem:[%s1005_s1 + $0x98] sm:$0xff]   ;;  %v780_v19 = vld [vmem:[%s1005_s1 + $0xa0] sm:$0xff]   ;;  %v784_v23 = vld [vmem:[%s1005_s1 + $0xa8] sm:$0xff]  }
   0x9   :  { %706 = vmatpush3.bf16.msra.mxu1 %v768_v7  ;;  %v785_v24 = vld [vmem:[%s1005_s1 + $0x70] sm:$0xff]   ;;  %v789_v28 = vld [vmem:[%s1005_s1 + $0x78] sm:$0xff]   ;;  %v796_v34 = vld [vmem:[%s1005_s1 + $0x100] sm:$0xff]  }
   0xa   :  { %707 = vmatprep.subr.bf16.mxu1 %v771_v10  ;;  %v786_v25 = vld [vmem:[%s1005_s1 + $0x30] sm:$0xff]   ;;  %v790_v29 = vld [vmem:[%s1005_s1 + $0x38] sm:$0xff]   ;;  %v799_v36 = vld [vmem:[%s1006_s0 + $0xc] ss:$20 sps:$4 sm:$0xff]  }
   0xb   :  { %680 = vmatpush3.bf16.msra.mxu0 %v770_v9  ;;  %v787_v26 = vld [vmem:[%s1005_s1 + $0xf0] sm:$0xff]   ;;  %v791_v30 = vld [vmem:[%s1005_s1 + $0xf8] sm:$0xff]   ;;  %v800_v37 = vld [vmem:[%s1005_s1 + $0x108] sm:$0xff]   ;;  %490 = vmatprep.mubr.bf16.mxu1 %v799_v36 }
   0xc   :  { %681 = vmatprep.subr.bf16.mxu0 %v773_v12  ;;  %v788_v27 = vld [vmem:[%s1005_s1 + $0xb0] sm:$0xff]   ;;  %v794_v32 = vld [vmem:[%s1006_s0 + $0x4] ss:$20 sps:$4 sm:$0xff]   ;;  %v797_v35 = vld [vmem:[%s1006_s0 + $0x8] ss:$20 sps:$4 sm:$0xff]  }
   0xd   :  { %708 = vmatpush3.bf16.msra.mxu1 %v772_v11  ;;  %v792_v31 = vld [vmem:[%s1006_s0] ss:$20 sps:$4 sm:$0xff]   ;;  %v795_v33 = vld [vmem:[%s1005_s1 + $0xb8] sm:$0xff]   ;;  %441 = vmatprep.mubr.bf16.mxu0 %v794_v32  ;;  %v810_v43 = vld [vmem:[%s1006_s0 + $0x30] ss:$20 sps:$4 sm:$0xff]  }
   0xe   :  { %709 = vmatprep.subr.bf16.mxu1 %v775_v14  ;;  %v801_v38 = vld [vmem:[%s1005_s1 + $0x110] sm:$0xff]   ;;  %v804_v39 = vld [vmem:[%s1006_s0 + $0x2c] ss:$20 sps:$4 sm:$0xff]   ;;  %v802_v40 = vld [vmem:[%s1005_s1 + $0x118] sm:$0xff]  }
   0xf   :  { %682 = vmatpush3.bf16.msra.mxu0 %v774_v13  ;;  %v807_v41 = vld [vmem:[%s1006_s0 + $0x28] ss:$20 sps:$4 sm:$0xff]   ;;  %v803_v44 = vld [vmem:[%s1005_s1 + $0x120] sm:$0xff]   ;;  %v811_v47 = vld [vmem:[%s1005_s1 + $0x130] sm:$0xff]  }
  0x10   :  { %683 = vmatprep.subr.bf16.mxu0 %v777_v16  ;;  %v808_v42 = vld [vmem:[%s1006_s0 + $0x34] ss:$20 sps:$4 sm:$0xff]   ;;  %v813_v45 = vld [vmem:[%s1006_s0 + $0x10] ss:$20 sps:$4 sm:$0xff]   ;;  %v812_v48 = vld [vmem:[%s1005_s1 + $0x138] sm:$0xff]  }
  0x11   :  { %710 = vmatpush3.bf16.msra.mxu1 %v776_v15  ;;  %v806_v46 = vld [vmem:[%s1005_s1 + $0x128] sm:$0xff]   ;;  %v596_v51 = vld [vmem:[%s1007_s2] ss:$0 sm:$0xff] }
  0x12   :  { %711 = vmatprep.subr.bf16.mxu1 %v779_v18  ;;  %v814_v49 = vld [vmem:[%s1006_s0 + $0x38] ss:$20 sps:$4 sm:$0xff]  }
  0x13   :  { %684 = vmatpush3.bf16.msra.mxu0 %v778_v17 }
  0x14   :  { %685 = vmatprep.subr.bf16.mxu0 %v781_v20  ;;  %v656_v20 = vld [vmem:[%s1008_s3] sm:$0xff]  }
  0x15   :  { %712 = vmatpush3.bf16.msra.mxu1 %v780_v19  ;;  %v673_v19 = vld [vmem:[%s1008_s3 + $0x8] sm:$0xff]  }
  0x16   :  { %713 = vmatprep.subr.bf16.mxu1 %v783_v22 }
  0x17   :  { %686 = vmatpush3.bf16.msra.mxu0 %v782_v21  ;;  %v661_v21 = vunpack.c.l.bf16 %v673_v19 }
  0x18   :  { %687 = vmatprep.subr.bf16.mxu0 %v785_v24 }
  0x19   :  { %714 = vmatpush3.bf16.msra.mxu1 %v784_v23  ;;  %v657_v23 = vunpack.c.l.bf16 %v656_v20 }
  0x1a   :  { %715 = vmatprep.subr.bf16.mxu1 %v787_v26  ;;  %v662_v26 = vunpack.c.h.bf16 %v673_v19 }
  0x1b   :  { %688 = vmatpush3.bf16.msra.mxu0 %v786_v25 }
  0x1c   :  { %689 = vmatprep.subr.bf16.mxu0 %v789_v28 }
  0x1d   :  { %716 = vmatpush3.bf16.msra.mxu1 %v788_v27 }
  0x1e   :  { %717 = vmatprep.subr.bf16.mxu1 %v791_v30 }
  0x1f   :  { %690 = vmatpush3.bf16.msra.mxu0 %v790_v29  ;;  %v658_v29 = vunpack.c.h.bf16 %v656_v20 }
  0x20   :  { %741 = vmatprep.subr.bf16.mxu0 %v796_v34 }
  0x21   :  { %718 = vmatpush3.bf16.msra.mxu1 %v795_v33 }
  0x22   :  { %442 = vmatmul.mubr.bf16.vlgmr.msra.gmra.mrb[0].mxu0 %v792_v31 }
  0x23   :  { %742 = vmatpush3.bf16.msra.mxu0 %v796_v34  ;;  %449 = vmatprep.mubr.bf16.mxu0 %v804_v39 }
  0x24   :  { %491 = vmatmul.mubr.bf16.vlgmr.msra.gmra.mrb[0].mxu1 %v797_v35  ;;  %743 = vmatprep.subr.bf16.mxu0 %v800_v37 }
  0x25   :  { %498 = vmatprep.mubr.bf16.mxu1 %v808_v42 }
  0x27   :  { %744 = vmatpush3.bf16.msra.mxu0 %v800_v37 }
  0x28   :  { %745 = vmatprep.subr.bf16.mxu0 %v801_v38 }
  0x2a   :  { %450 = vmatmul.mubr.bf16.gmra.mrb[4].mxu0 %v807_v41 }
  0x2b   :  { %746 = vmatpush3.bf16.msra.mxu0 %v801_v38  ;;  %757 = vmatprep.mubr.bf16.mxu0 %v813_v45 }
  0x2c   :  { %747 = vmatprep.subr.bf16.mxu0 %v802_v40  ;;  %499 = vmatmul.mubr.bf16.gmra.mrb[4].mxu1 %v810_v43 }
  0x2f   :  { %748 = vmatpush3.bf16.msra.mxu0 %v802_v40 }
  0x30   :  { %749 = vmatprep.subr.bf16.mxu0 %v803_v44 }
  0x33   :  { %750 = vmatpush3.bf16.msra.mxu0 %v803_v44 }
  0x34   :  { %751 = vmatprep.subr.bf16.mxu0 %v806_v46 }
  0x37   :  { %752 = vmatpush3.bf16.msra.mxu0 %v806_v46 }
  0x38   :  { %753 = vmatprep.subr.bf16.mxu0 %v811_v47 }
  0x3b   :  { %754 = vmatpush3.bf16.msra.mxu0 %v811_v47 }
  0x3c   :  { %755 = vmatprep.subr.bf16.mxu0 %v812_v48 }
  0x3f   :  { %756 = vmatpush3.bf16.msra.mxu0 %v812_v48 }
  0x42   :  { %758 = vmatmul.mubr.bf16.vlgmr.msra.gmra.mrb[8].mxu0 %v814_v49 }
  0xf5   :  { %v691_v50 = vpop.f32.mrb[0].mxu0 }
  0xf6   :  { %v692_v52 = vpop.f32.mrb[1].mxu0 }
  0xf7   :  { %v693_v53 = vadd.f32 %v692_v52, %v691_v50  ;;  %v694_v54 = vpop.f32.mrb[2].mxu0  ;;  %v719_v55 = vpop.f32.mrb[0].mxu1 }
  0xf8   :  { %v695_v56 = vpop.f32.mrb[3].mxu0  ;;  %v720_v59 = vpop.f32.mrb[1].mxu1 }
  0xf9   :  { %v444_v57 = vadd.f32 %v693_v53, %v596_v51  ;;  %v696_v58 = vadd.f32 %v695_v56, %v694_v54  ;;  %v721_v60 = vadd.f32 %v720_v59, %v719_v55  ;;  %v722_v61 = vpop.f32.mrb[2].mxu1 }
  0xfa   :  { %v723_v63 = vpop.f32.mrb[3].mxu1 }
  0xfb   :  { %v447_v62 = vadd.f32 %v696_v58, %v596_v51  ;;  %v724_v0 = vadd.f32 %v723_v63, %v722_v61  ;;  %v493_v1 = vadd.f32 %v721_v60, %v444_v57 }
  0xfd   :  { %v697_v2 = vpop.f32.mrb[4].mxu0  ;;  %v496_v4 = vadd.f32 %v724_v0, %v447_v62 }
  0xfe   :  { %v698_v3 = vpop.f32.mrb[5].mxu0 }
  0xff   :  { %v699_v5 = vadd.f32 %v698_v3, %v697_v2  ;;  %v700_v6 = vpop.f32.mrb[6].mxu0  ;;  %v725_v7 = vpop.f32.mrb[4].mxu1 }
 0x100   :  { %v701_v8 = vpop.f32.mrb[7].mxu0  ;;  %v726_v11 = vpop.f32.mrb[5].mxu1 }
 0x101   :  { %v452_v9 = vadd.f32 %v699_v5, %v596_v51  ;;  %v702_v10 = vadd.f32 %v701_v8, %v700_v6  ;;  %v727_v12 = vadd.f32 %v726_v11, %v725_v7  ;;  %v728_v13 = vpop.f32.mrb[6].mxu1 }
 0x102   :  { %v729_v15 = vpop.f32.mrb[7].mxu1 }
 0x103   :  { %v455_v14 = vadd.f32 %v702_v10, %v596_v51  ;;  %v730_v16 = vadd.f32 %v729_v15, %v728_v13  ;;  %v501_v17 = vadd.f32 %v727_v12, %v452_v9 }
 0x105   :  { %v504_v18 = vadd.f32 %v730_v16, %v455_v14 }
 0x115   :  { %v759_v22 = vpop.f32.mrb[8].mxu0 }
 0x116   :  { %v550_v24 = vadd.f32 %v759_v22, %v501_v17  ;;  %v541_v25 = vpop.f32.mrb[9].mxu0 }
 0x117   :  { %v542_v27 = vadd.f32 %v541_v25, %v493_v1  ;;  %v760_v28 = vpop.f32.mrb[10].mxu0 }
 0x118   :  { %v566_v30 = vadd.f32 %v661_v21, %v550_v24  ;;  %v553_v31 = vadd.f32 %v760_v28, %v504_v18  ;;  %v544_v32 = vpop.f32.mrb[11].mxu0 }
 0x119   :  { %v564_v33 = vadd.f32 %v657_v23, %v542_v27  ;;  %v545_v34 = vadd.f32 %v544_v32, %v496_v4 }
 0x11a   :  { %v567_v35 = vadd.f32 %v662_v26, %v553_v31  ;;  %v570_v37 = vmax.f32 %v566_v30, 0.0 }
 0x11b   :  { %v565_v36 = vadd.f32 %v658_v29, %v545_v34  ;;  %v568_v39 = vmax.f32 %v564_v33, 0.0 }
 0x11c   :  { %v571_v38 = vmax.f32 %v567_v35, 0.0 }
 0x11d   :  { %v569_v40 = vmax.f32 %v565_v36, 0.0 }
 0x11e   :  { %v671_v41 = vpack.c.bf16 %v571_v38, %v570_v37 }
 0x11f   :  { %v666_v42 = vpack.c.bf16 %v569_v40, %v568_v39 }
 0x120   :  { %674 = vst [vmem:[%s1009_s4 + $0x8] sm:$0xff] %v671_v41  }
 0x121   :  { %667 = vst [vmem:[%s1009_s4] sm:$0xff] %v666_v42  }

</bundles_post_ra>
